<compile_context>
chip_gen: v7x
topology: tpu7x:2x2x1
jax: 0.10.0
libtpu: 0.0.40
codegen_flags: <defaults>
</compile_context>

<pallas_src>
import functools
import math

import numpy as np
import jax
import jax.numpy as jnp
from jax.experimental import pallas as pl
from jax.experimental.pallas import tpu as pltpu

EPS = 1e-5


# ----------------------------------------------------------------------------
# in-kernel helpers (traced inside the Pallas kernel)
# ----------------------------------------------------------------------------
def _gelu(x):
    # tanh-approximation GELU ("gelu_new") -> EUP tanh.
    # TODO(synk): use exact erf GELU if config.model.hidden_act == "gelu".
    return 0.5 * x * (1.0 + jnp.tanh(
        math.sqrt(2.0 / math.pi) * (x + 0.044715 * x * x * x)))


def _layernorm(x, g, b, eps=EPS):
    mu = jnp.mean(x, axis=-1, keepdims=True)
    var = jnp.mean((x - mu) ** 2, axis=-1, keepdims=True)
    return (x - mu) * jax.lax.rsqrt(var + eps) * g + b


# ----------------------------------------------------------------------------
# model config (synthetic, mirrors the PyTorch config.model.* fields)
# ----------------------------------------------------------------------------
CFG = dict(
    in_channels=4,
    n_conv_layers=2,
    conv_dim=(16, 32),
    conv_kernel=(3, 3),
    conv_stride=(2, 2),
    hidden_size=32,
    num_attention_heads=4,
    intermediate_size=64,
    num_hidden_layers=2,
    num_conv_pos_embeddings=16,
    num_conv_pos_embedding_groups=4,
)


# ----------------------------------------------------------------------------
# deterministic synthetic parameters (layouts chosen for the fused kernel)
# ----------------------------------------------------------------------------
def init_params(key, cfg):
    keys = iter(jax.random.split(key, 64))

    def nrm(shape, scale=0.05):
        return scale * jax.random.normal(next(keys), shape, jnp.float32)

    H = cfg["hidden_size"]
    I = cfg["intermediate_size"]
    L = cfg["num_hidden_layers"]
    K = cfg["num_conv_pos_embeddings"]
    G = cfg["num_conv_pos_embedding_groups"]
    gs = H // G
    c1, c2 = cfg["conv_dim"]
    cin = cfg["in_channels"]
    k1, k2 = cfg["conv_kernel"]

    params = {}
    # feature encoder: conv1 as an im2col matrix ((C_in*k1), c1) flattened in
    # (C, k) order (matches torch Conv1d weight.transpose/reshape); conv2 as
    # per-tap (k2, c1, c2) so the kernel does k2 shifted MACs.
    params["conv1_w"] = nrm((cin * k1, c1))
    params["conv1_b"] = nrm((1, c1))
    params["conv2_w"] = nrm((k2, c1, c2))
    params["conv2_b"] = nrm((1, c2))

    # feature projection (LayerNorm + Linear)
    params["fp_g"] = jnp.ones((1, c2), jnp.float32)
    params["fp_b"] = jnp.zeros((1, c2), jnp.float32)
    params["fp_w"] = nrm((c2, H))
    params["fp_bias"] = nrm((1, H))

    # positional grouped Conv1d(H, H, K, groups=G) expressed as per-tap
    # block-diagonal dense weights (K, H_in, H_out), built vectorized.
    # TODO(synk): weight_norm reparameterization (g * v/||v|| over dim=2) is
    # not applied; the synthetic weight is treated as the effective weight.
    w_pc = nrm((H, gs, K))                         # torch layout (out, in/group, K)
    w_g = w_pc.reshape(G, gs, gs, K)               # (G, o_local, c, K)
    blocks = jnp.transpose(w_g, (0, 3, 2, 1))      # (G, K, c, o_local)
    dense5 = jnp.zeros((K, G, gs, G, gs), jnp.float32)
    dense5 = dense5.at[:, jnp.arange(G), :, jnp.arange(G), :].set(blocks)
    params["pc_w"] = dense5.reshape(K, H, H)
    params["pc_b"] = nrm((1, H))

    # encoder input LayerNorm
    params["eln_g"] = jnp.ones((1, H), jnp.float32)
    params["eln_b"] = jnp.zeros((1, H), jnp.float32)

    # transformer layers stacked along a leading layer axis; QKV fused.
    def stack(fn):
        return jnp.stack([fn() for _ in range(L)])

    params["wqkv"] = stack(lambda: jnp.concatenate(
        [nrm((H, H)), nrm((H, H)), nrm((H, H))], axis=1))          # (L, H, 3H)
    params["bqkv"] = stack(lambda: jnp.concatenate(
        [nrm((1, H)), nrm((1, H)), nrm((1, H))], axis=1))          # (L, 1, 3H)
    params["wo"] = stack(lambda: nrm((H, H)))
    params["bo"] = stack(lambda: nrm((1, H)))
    params["ln1_g"] = jnp.ones((L, 1, H), jnp.float32)
    params["ln1_b"] = jnp.zeros((L, 1, H), jnp.float32)
    params["wi"] = stack(lambda: nrm((H, I)))
    params["bi"] = stack(lambda: nrm((1, I)))
    params["wo2"] = stack(lambda: nrm((I, H)))
    params["bo2"] = stack(lambda: nrm((1, H)))
    params["ln2_g"] = jnp.ones((L, 1, H), jnp.float32)
    params["ln2_b"] = jnp.zeros((L, 1, H), jnp.float32)
    return params


# ----------------------------------------------------------------------------
# fused forward pass (one pallas_call, grid over batch, "parallel")
# ----------------------------------------------------------------------------
def debci_forward(params, cfg, input_values):
    """input_values: (B, T, C_in) -> (last_hidden (B,T',H), extract_features (B,T',c_last))."""
    assert cfg["n_conv_layers"] == 2, "fused kernel is specialized for 2 conv layers"
    B, T, Cin = input_values.shape
    k1, k2 = cfg["conv_kernel"]
    s1, s2 = cfg["conv_stride"]
    c1, c2 = cfg["conv_dim"]
    H = cfg["hidden_size"]
    nh = cfg["num_attention_heads"]
    hd = H // nh
    L = cfg["num_hidden_layers"]
    K = cfg["num_conv_pos_embeddings"]
    pad = K // 2

    T1 = (T - k1) // s1 + 1                 # conv1 output length
    T2 = (T1 - k2) // s2 + 1                # conv2 output length == sequence length
    T_pc = T2 + 2 * pad - K + 1             # pos-conv length before SamePad trim
    trim = 1 if K % 2 == 0 else 0
    scale = 1.0 / math.sqrt(hd)

    # conv1 output rows are produced grouped by (t1 mod s2) so conv2's
    # stride-s2 taps become CONTIGUOUS static slices inside the kernel.
    t_order = np.concatenate([np.arange(c, T1, s2) for c in range(s2)])
    counts = [len(np.arange(c, T1, s2)) for c in range(s2)]
    class_start = np.concatenate([[0], np.cumsum(counts)])
    conv2_starts = tuple(int(class_start[j % s2] + j // s2) for j in range(k2))

    # im2col for conv1 directly on the channels-last input (single tiny gather)
    rows = t_order[:, None] * s1 + np.arange(k1)[None, :]          # (T1, k1)
    p1 = input_values[:, rows, :]                                  # (B, T1, k1, Cin)
    p1 = jnp.transpose(p1, (0, 1, 3, 2)).reshape(B, T1, Cin * k1)  # (C, k) flattening

    def kernel(p1_ref, w1_ref, b1_ref, w2_ref, b2_ref,
               fpg_ref, fpb_ref, fpw_ref, fpbias_ref,
               pcw_ref, pcb_ref, elng_ref, elnb_ref,
               wqkv_ref, bqkv_ref, wo_ref, bo_ref, g1_ref, be1_ref,
               wi_ref, bi_ref, wo2_ref, bo2_ref, g2_ref, be2_ref,
               hid_ref, feat_ref, y1_ref, xpad_ref):
        f32 = jnp.float32

        # ---- feature encoder: conv1 (im2col matmul) then conv2 (k2 shifted MACs)
        y1_ref[...] = _gelu(jnp.dot(p1_ref[...], w1_ref[...],
                                    preferred_element_type=f32) + b1_ref[...])
        acc = jnp.zeros((T2, c2), f32) + b2_ref[...]
        for j in range(k2):
            st = conv2_starts[j]
            acc = acc + jnp.dot(y1_ref[st:st + T2, :], w2_ref[j],
                                preferred_element_type=f32)
        extract = _gelu(acc)                                   # (T2, c2), natural order

        # ---- feature projection: LayerNorm -> Linear
        normed = _layernorm(extract, fpg_ref[...], fpb_ref[...])
        feat_ref[...] = normed
        hidden = jnp.dot(normed, fpw_ref[...],
                         preferred_element_type=f32) + fpbias_ref[...]   # (T2, H)

        # ---- positional conv embedding: K shifted MACs on VMEM-resident hidden
        xpad_ref[...] = jnp.zeros((T2 + 2 * pad, H), f32)
        xpad_ref[pad:pad + T2, :] = hidden
        pacc = jnp.zeros((T_pc, H), f32) + pcb_ref[...]
        for j in range(K):
            pacc = pacc + jnp.dot(xpad_ref[j:j + T_pc, :], pcw_ref[j],
                                  preferred_element_type=f32)
        pos = _gelu(pacc)
        if trim:                                               # DeBCISamePadLayer
            pos = pos[:T_pc - trim, :]

        hs = _layernorm(hidden + pos, elng_ref[...], elnb_ref[...])

        # ---- transformer encoder layers (fused QKV, per-head scores/PV)
        for l in range(L):
            x = hs
            qkv = jnp.dot(x, wqkv_ref[l],
                          preferred_element_type=f32) + bqkv_ref[l]      # (T2, 3H)
            q = qkv[:, 0:H] * scale
            kk = qkv[:, H:2 * H]
            vv = qkv[:, 2 * H:3 * H]
            attn = jnp.zeros((T2, H), f32) + bo_ref[l]
            for h in range(nh):
                qh = q[:, h * hd:(h + 1) * hd]
                kh = kk[:, h * hd:(h + 1) * hd]
                vh = vv[:, h * hd:(h + 1) * hd]
                s = jax.lax.dot_general(qh, kh, (((1,), (1,)), ((), ())),
                                        preferred_element_type=f32)      # (T2, T2)
                s = s - jnp.max(s, axis=-1, keepdims=True)
                e = jnp.exp(s)
                p = e * pl.reciprocal(jnp.sum(e, axis=-1, keepdims=True),
                                      approx=True)
                oh = jnp.dot(p, vh, preferred_element_type=f32)          # (T2, hd)
                # accumulate through the out-projection (sublane row slice)
                attn = attn + jnp.dot(oh, wo_ref[l, h * hd:(h + 1) * hd, :],
                                      preferred_element_type=f32)
            hs = _layernorm(x + attn, g1_ref[l], be1_ref[l])
            ff = _gelu(jnp.dot(hs, wi_ref[l],
                               preferred_element_type=f32) + bi_ref[l])
            ff = jnp.dot(ff, wo2_ref[l],
                         preferred_element_type=f32) + bo2_ref[l]
            hs = _layernorm(hs + ff, g2_ref[l], be2_ref[l])

        hid_ref[...] = hs

    weights = [params["conv1_w"], params["conv1_b"],
               params["conv2_w"], params["conv2_b"],
               params["fp_g"], params["fp_b"], params["fp_w"], params["fp_bias"],
               params["pc_w"], params["pc_b"],
               params["eln_g"], params["eln_b"],
               params["wqkv"], params["bqkv"], params["wo"], params["bo"],
               params["ln1_g"], params["ln1_b"], params["wi"], params["bi"],
               params["wo2"], params["bo2"], params["ln2_g"], params["ln2_b"]]

    def _full(x):
        n = x.ndim
        return pl.BlockSpec(x.shape, lambda b, n=n: (0,) * n)

    in_specs = ([pl.BlockSpec((None, T1, Cin * k1), lambda b: (b, 0, 0))]
                + [_full(w) for w in weights])
    out_specs = [pl.BlockSpec((None, T2, H), lambda b: (b, 0, 0)),
                 pl.BlockSpec((None, T2, c2), lambda b: (b, 0, 0))]
    out_shape = (jax.ShapeDtypeStruct((B, T2, H), jnp.float32),
                 jax.ShapeDtypeStruct((B, T2, c2), jnp.float32))

    last_hidden, extract_features = pl.pallas_call(
        kernel,
        grid=(B,),
        in_specs=in_specs,
        out_specs=out_specs,
        out_shape=out_shape,
        scratch_shapes=[pltpu.VMEM((T1, c1), jnp.float32),
                        pltpu.VMEM((T2 + 2 * pad, H), jnp.float32)],
        compiler_params=pltpu.CompilerParams(
            dimension_semantics=("parallel",)),
    )(p1, *weights)
    return last_hidden, extract_features


# ----------------------------------------------------------------------------
if __name__ == "__main__":
    key = jax.random.PRNGKey(0)
    pkey, xkey = jax.random.split(key)
    params = init_params(pkey, CFG)

    # input_values: (batch=2, time=64, in_channels=4), channels-last like the
    # PyTorch forward (which permutes to NCW internally).
    x = jax.random.normal(xkey, (2, 64, CFG["in_channels"]), jnp.float32)

    fwd = jax.jit(lambda p, xv: debci_forward(p, CFG, xv))
    last_hidden_state, extract_features = fwd(params, x)
    jax.block_until_ready((last_hidden_state, extract_features))

    assert last_hidden_state.shape == (2, 15, CFG["hidden_size"])
    assert extract_features.shape == (2, 15, CFG["conv_dim"][-1])
    assert bool(jnp.all(jnp.isfinite(last_hidden_state)))
    assert bool(jnp.all(jnp.isfinite(extract_features)))
    print("KERNEL_OK")
</pallas_src>

<mosaic_0001>
module attributes {stable_mosaic.version = 11 : i64} {
  func.func @kernel(%arg0: i32, %arg1: memref<1x31x12xf32, #tpu.memory_space<vmem>>, %arg2: memref<12x16xf32, #tpu.memory_space<vmem>>, %arg3: memref<1x16xf32, #tpu.memory_space<vmem>>, %arg4: memref<3x16x32xf32, #tpu.memory_space<vmem>>, %arg5: memref<1x32xf32, #tpu.memory_space<vmem>>, %arg6: memref<1x32xf32, #tpu.memory_space<vmem>>, %arg7: memref<1x32xf32, #tpu.memory_space<vmem>>, %arg8: memref<32x32xf32, #tpu.memory_space<vmem>>, %arg9: memref<1x32xf32, #tpu.memory_space<vmem>>, %arg10: memref<16x32x32xf32, #tpu.memory_space<vmem>>, %arg11: memref<1x32xf32, #tpu.memory_space<vmem>>, %arg12: memref<1x32xf32, #tpu.memory_space<vmem>>, %arg13: memref<1x32xf32, #tpu.memory_space<vmem>>, %arg14: memref<2x32x96xf32, #tpu.memory_space<vmem>>, %arg15: memref<2x1x96xf32, #tpu.memory_space<vmem>>, %arg16: memref<2x32x32xf32, #tpu.memory_space<vmem>>, %arg17: memref<2x1x32xf32, #tpu.memory_space<vmem>>, %arg18: memref<2x1x32xf32, #tpu.memory_space<vmem>>, %arg19: memref<2x1x32xf32, #tpu.memory_space<vmem>>, %arg20: memref<2x32x64xf32, #tpu.memory_space<vmem>>, %arg21: memref<2x1x64xf32, #tpu.memory_space<vmem>>, %arg22: memref<2x64x32xf32, #tpu.memory_space<vmem>>, %arg23: memref<2x1x32xf32, #tpu.memory_space<vmem>>, %arg24: memref<2x1x32xf32, #tpu.memory_space<vmem>>, %arg25: memref<2x1x32xf32, #tpu.memory_space<vmem>>, %arg26: memref<1x15x32xf32, #tpu.memory_space<vmem>>, %arg27: memref<1x15x32xf32, #tpu.memory_space<vmem>>, %arg28: memref<31x16xf32, #tpu.memory_space<vmem>>, %arg29: memref<31x32xf32, #tpu.memory_space<vmem>>) attributes {dimension_semantics = [#tpu.dimension_semantics<parallel>], iteration_bounds = array<i64: 2>, scalar_prefetch = 0 : i64, scratch_operands = 2 : i64, tpu.core_type = #tpu.core_type<tc>, window_params = [{transform_indices = @transform_0, window_bounds = array<i64: 1, 31, 12>}, {pipeline_mode = #tpu.pipeline_mode<synchronous>, transform_indices = @transform_1, window_bounds = array<i64: 12, 16>}, {pipeline_mode = #tpu.pipeline_mode<synchronous>, transform_indices = @transform_2, window_bounds = array<i64: 1, 16>}, {pipeline_mode = #tpu.pipeline_mode<synchronous>, transform_indices = @transform_3, window_bounds = array<i64: 3, 16, 32>}, {pipeline_mode = #tpu.pipeline_mode<synchronous>, transform_indices = @transform_4, window_bounds = array<i64: 1, 32>}, {pipeline_mode = #tpu.pipeline_mode<synchronous>, transform_indices = @transform_5, window_bounds = array<i64: 1, 32>}, {pipeline_mode = #tpu.pipeline_mode<synchronous>, transform_indices = @transform_6, window_bounds = array<i64: 1, 32>}, {pipeline_mode = #tpu.pipeline_mode<synchronous>, transform_indices = @transform_7, window_bounds = array<i64: 32, 32>}, {pipeline_mode = #tpu.pipeline_mode<synchronous>, transform_indices = @transform_8, window_bounds = array<i64: 1, 32>}, {pipeline_mode = #tpu.pipeline_mode<synchronous>, transform_indices = @transform_9, window_bounds = array<i64: 16, 32, 32>}, {pipeline_mode = #tpu.pipeline_mode<synchronous>, transform_indices = @transform_10, window_bounds = array<i64: 1, 32>}, {pipeline_mode = #tpu.pipeline_mode<synchronous>, transform_indices = @transform_11, window_bounds = array<i64: 1, 32>}, {pipeline_mode = #tpu.pipeline_mode<synchronous>, transform_indices = @transform_12, window_bounds = array<i64: 1, 32>}, {pipeline_mode = #tpu.pipeline_mode<synchronous>, transform_indices = @transform_13, window_bounds = array<i64: 2, 32, 96>}, {pipeline_mode = #tpu.pipeline_mode<synchronous>, transform_indices = @transform_14, window_bounds = array<i64: 2, 1, 96>}, {pipeline_mode = #tpu.pipeline_mode<synchronous>, transform_indices = @transform_15, window_bounds = array<i64: 2, 32, 32>}, {pipeline_mode = #tpu.pipeline_mode<synchronous>, transform_indices = @transform_16, window_bounds = array<i64: 2, 1, 32>}, {pipeline_mode = #tpu.pipeline_mode<synchronous>, transform_indices = @transform_17, window_bounds = array<i64: 2, 1, 32>}, {pipeline_mode = #tpu.pipeline_mode<synchronous>, transform_indices = @transform_18, window_bounds = array<i64: 2, 1, 32>}, {pipeline_mode = #tpu.pipeline_mode<synchronous>, transform_indices = @transform_19, window_bounds = array<i64: 2, 32, 64>}, {pipeline_mode = #tpu.pipeline_mode<synchronous>, transform_indices = @transform_20, window_bounds = array<i64: 2, 1, 64>}, {pipeline_mode = #tpu.pipeline_mode<synchronous>, transform_indices = @transform_21, window_bounds = array<i64: 2, 64, 32>}, {pipeline_mode = #tpu.pipeline_mode<synchronous>, transform_indices = @transform_22, window_bounds = array<i64: 2, 1, 32>}, {pipeline_mode = #tpu.pipeline_mode<synchronous>, transform_indices = @transform_23, window_bounds = array<i64: 2, 1, 32>}, {pipeline_mode = #tpu.pipeline_mode<synchronous>, transform_indices = @transform_24, window_bounds = array<i64: 2, 1, 32>}, {transform_indices = @transform_25, window_bounds = array<i64: 1, 15, 32>}, {transform_indices = @transform_26, window_bounds = array<i64: 1, 15, 32>}]} {
    %c0 = arith.constant 0 : index
    %c0_0 = arith.constant 0 : index
    %c0_1 = arith.constant 0 : index
    %0 = vector.load %arg1[%c0, %c0_0, %c0_1] : memref<1x31x12xf32, #tpu.memory_space<vmem>>, vector<1x31x12xf32>
    %1 = vector.shape_cast %0 : vector<1x31x12xf32> to vector<31x12xf32>
    %c0_2 = arith.constant 0 : index
    %c0_3 = arith.constant 0 : index
    %2 = vector.load %arg2[%c0_2, %c0_3] : memref<12x16xf32, #tpu.memory_space<vmem>>, vector<12x16xf32>
    %cst = arith.constant dense<0.000000e+00> : vector<31x16xf32>
    %3 = tpu.matmul %1, %2, %cst {dimension_numbers = #tpu.dot_dimension_numbers<[1], [0], [0], [1], [0, 0, 1, 1], [], []>} : vector<31x12xf32>, vector<12x16xf32>, vector<31x16xf32> -> vector<31x16xf32>
    %c0_4 = arith.constant 0 : index
    %c0_5 = arith.constant 0 : index
    %4 = vector.load %arg3[%c0_4, %c0_5] : memref<1x16xf32, #tpu.memory_space<vmem>>, vector<1x16xf32>
    %5 = vector.broadcast %4 : vector<1x16xf32> to vector<31x16xf32>
    %6 = arith.addf %3, %5 : vector<31x16xf32>
    %cst_6 = arith.constant 5.000000e-01 : f32
    %7 = vector.broadcast %cst_6 : f32 to vector<31x16xf32>
    %8 = arith.mulf %7, %6 : vector<31x16xf32>
    %cst_7 = arith.constant 4.471500e-02 : f32
    %9 = vector.broadcast %cst_7 : f32 to vector<31x16xf32>
    %10 = arith.mulf %9, %6 : vector<31x16xf32>
    %11 = arith.mulf %10, %6 : vector<31x16xf32>
    %12 = arith.mulf %11, %6 : vector<31x16xf32>
    %13 = arith.addf %6, %12 : vector<31x16xf32>
    %cst_8 = arith.constant 0.797884583 : f32
    %14 = vector.broadcast %cst_8 : f32 to vector<31x16xf32>
    %15 = arith.mulf %14, %13 : vector<31x16xf32>
    %16 = math.tanh %15 : vector<31x16xf32>
    %cst_9 = arith.constant 1.000000e+00 : f32
    %17 = vector.broadcast %cst_9 : f32 to vector<31x16xf32>
    %18 = arith.addf %17, %16 : vector<31x16xf32>
    %19 = arith.mulf %8, %18 : vector<31x16xf32>
    %c0_10 = arith.constant 0 : index
    %c0_11 = arith.constant 0 : index
    %20 = vector.load %arg28[%c0_10, %c0_11] : memref<31x16xf32, #tpu.memory_space<vmem>>, vector<31x16xf32>
    tpu.vector_store %arg28[%c0_10, %c0_11], %19 {strides = array<i32>} : memref<31x16xf32, #tpu.memory_space<vmem>>, vector<31x16xf32>,
    %cst_12 = arith.constant 0.000000e+00 : f32
    %21 = vector.broadcast %cst_12 : f32 to vector<15x32xf32>
    %c0_13 = arith.constant 0 : index
    %c0_14 = arith.constant 0 : index
    %22 = vector.load %arg5[%c0_13, %c0_14] : memref<1x32xf32, #tpu.memory_space<vmem>>, vector<1x32xf32>
    %23 = vector.broadcast %22 : vector<1x32xf32> to vector<15x32xf32>
    %24 = arith.addf %21, %23 : vector<15x32xf32>
    %c0_15 = arith.constant 0 : index
    %c0_16 = arith.constant 0 : index
    %25 = vector.load %arg28[%c0_15, %c0_16] : memref<31x16xf32, #tpu.memory_space<vmem>>, vector<15x16xf32>
    %c0_17 = arith.constant 0 : index
    %c0_18 = arith.constant 0 : index
    %c0_19 = arith.constant 0 : index
    %26 = vector.load %arg4[%c0_17, %c0_18, %c0_19] : memref<3x16x32xf32, #tpu.memory_space<vmem>>, vector<1x16x32xf32>
    %27 = vector.shape_cast %26 : vector<1x16x32xf32> to vector<16x32xf32>
    %cst_20 = arith.constant dense<0.000000e+00> : vector<15x32xf32>
    %28 = tpu.matmul %25, %27, %cst_20 {dimension_numbers = #tpu.dot_dimension_numbers<[1], [0], [0], [1], [0, 0, 1, 1], [], []>} : vector<15x16xf32>, vector<16x32xf32>, vector<15x32xf32> -> vector<15x32xf32>
    %29 = arith.addf %24, %28 : vector<15x32xf32>
    %c16 = arith.constant 16 : index
    %c0_21 = arith.constant 0 : index
    %30 = vector.load %arg28[%c16, %c0_21] : memref<31x16xf32, #tpu.memory_space<vmem>>, vector<15x16xf32>
    %c1 = arith.constant 1 : index
    %c0_22 = arith.constant 0 : index
    %c0_23 = arith.constant 0 : index
    %31 = vector.load %arg4[%c1, %c0_22, %c0_23] : memref<3x16x32xf32, #tpu.memory_space<vmem>>, vector<1x16x32xf32>
    %32 = vector.shape_cast %31 : vector<1x16x32xf32> to vector<16x32xf32>
    %cst_24 = arith.constant dense<0.000000e+00> : vector<15x32xf32>
    %33 = tpu.matmul %30, %32, %cst_24 {dimension_numbers = #tpu.dot_dimension_numbers<[1], [0], [0], [1], [0, 0, 1, 1], [], []>} : vector<15x16xf32>, vector<16x32xf32>, vector<15x32xf32> -> vector<15x32xf32>
    %34 = arith.addf %29, %33 : vector<15x32xf32>
    %c1_25 = arith.constant 1 : index
    %c0_26 = arith.constant 0 : index
    %35 = vector.load %arg28[%c1_25, %c0_26] : memref<31x16xf32, #tpu.memory_space<vmem>>, vector<15x16xf32>
    %c2 = arith.constant 2 : index
    %c0_27 = arith.constant 0 : index
    %c0_28 = arith.constant 0 : index
    %36 = vector.load %arg4[%c2, %c0_27, %c0_28] : memref<3x16x32xf32, #tpu.memory_space<vmem>>, vector<1x16x32xf32>
    %37 = vector.shape_cast %36 : vector<1x16x32xf32> to vector<16x32xf32>
    %cst_29 = arith.constant dense<0.000000e+00> : vector<15x32xf32>
    %38 = tpu.matmul %35, %37, %cst_29 {dimension_numbers = #tpu.dot_dimension_numbers<[1], [0], [0], [1], [0, 0, 1, 1], [], []>} : vector<15x16xf32>, vector<16x32xf32>, vector<15x32xf32> -> vector<15x32xf32>
    %39 = arith.addf %34, %38 : vector<15x32xf32>
    %cst_30 = arith.constant 5.000000e-01 : f32
    %40 = vector.broadcast %cst_30 : f32 to vector<15x32xf32>
    %41 = arith.mulf %40, %39 : vector<15x32xf32>
    %cst_31 = arith.constant 4.471500e-02 : f32
    %42 = vector.broadcast %cst_31 : f32 to vector<15x32xf32>
    %43 = arith.mulf %42, %39 : vector<15x32xf32>
    %44 = arith.mulf %43, %39 : vector<15x32xf32>
    %45 = arith.mulf %44, %39 : vector<15x32xf32>
    %46 = arith.addf %39, %45 : vector<15x32xf32>
    %cst_32 = arith.constant 0.797884583 : f32
    %47 = vector.broadcast %cst_32 : f32 to vector<15x32xf32>
    %48 = arith.mulf %47, %46 : vector<15x32xf32>
    %49 = math.tanh %48 : vector<15x32xf32>
    %cst_33 = arith.constant 1.000000e+00 : f32
    %50 = vector.broadcast %cst_33 : f32 to vector<15x32xf32>
    %51 = arith.addf %50, %49 : vector<15x32xf32>
    %52 = arith.mulf %41, %51 : vector<15x32xf32>
    %c0_34 = arith.constant 0 : index
    %c0_35 = arith.constant 0 : index
    %53 = vector.load %arg6[%c0_34, %c0_35] : memref<1x32xf32, #tpu.memory_space<vmem>>, vector<1x32xf32>
    %c0_36 = arith.constant 0 : index
    %c0_37 = arith.constant 0 : index
    %54 = vector.load %arg7[%c0_36, %c0_37] : memref<1x32xf32, #tpu.memory_space<vmem>>, vector<1x32xf32>
    %cst_38 = arith.constant dense<0.000000e+00> : vector<15xf32>
    %55 = vector.multi_reduction <add>, %52, %cst_38 [1] : vector<15x32xf32> to vector<15xf32>
    %56 = vector.shape_cast %55 : vector<15xf32> to vector<15x1xf32>
    %cst_39 = arith.constant 3.200000e+01 : f32
    %57 = vector.broadcast %cst_39 : f32 to vector<15x1xf32>
    %58 = arith.divf %56, %57 : vector<15x1xf32>
    %59 = vector.broadcast %58 : vector<15x1xf32> to vector<15x32xf32>
    %60 = arith.subf %52, %59 : vector<15x32xf32>
    %61 = arith.mulf %60, %60 : vector<15x32xf32>
    %cst_40 = arith.constant dense<0.000000e+00> : vector<15xf32>
    %62 = vector.multi_reduction <add>, %61, %cst_40 [1] : vector<15x32xf32> to vector<15xf32>
    %63 = vector.shape_cast %62 : vector<15xf32> to vector<15x1xf32>
    %cst_41 = arith.constant 3.200000e+01 : f32
    %64 = vector.broadcast %cst_41 : f32 to vector<15x1xf32>
    %65 = arith.divf %63, %64 : vector<15x1xf32>
    %66 = vector.broadcast %58 : vector<15x1xf32> to vector<15x32xf32>
    %67 = arith.subf %52, %66 : vector<15x32xf32>
    %cst_42 = arith.constant 9.99999974E-6 : f32
    %68 = vector.broadcast %cst_42 : f32 to vector<15x1xf32>
    %69 = arith.addf %65, %68 : vector<15x1xf32>
    %70 = math.rsqrt %69 : vector<15x1xf32>
    %71 = vector.broadcast %70 : vector<15x1xf32> to vector<15x32xf32>
    %72 = arith.mulf %67, %71 : vector<15x32xf32>
    %73 = vector.broadcast %53 : vector<1x32xf32> to vector<15x32xf32>
    %74 = arith.mulf %72, %73 : vector<15x32xf32>
    %75 = vector.broadcast %54 : vector<1x32xf32> to vector<15x32xf32>
    %76 = arith.addf %74, %75 : vector<15x32xf32>
    %c0_43 = arith.constant 0 : index
    %c0_44 = arith.constant 0 : index
    %c0_45 = arith.constant 0 : index
    %77 = vector.load %arg27[%c0_43, %c0_44, %c0_45] : memref<1x15x32xf32, #tpu.memory_space<vmem>>, vector<1x15x32xf32>
    %78 = vector.shape_cast %77 : vector<1x15x32xf32> to vector<15x32xf32>
    %79 = vector.shape_cast %76 : vector<15x32xf32> to vector<1x15x32xf32>
    tpu.vector_store %arg27[%c0_43, %c0_44, %c0_45], %79 {strides = array<i32>} : memref<1x15x32xf32, #tpu.memory_space<vmem>>, vector<1x15x32xf32>,
    %c0_46 = arith.constant 0 : index
    %c0_47 = arith.constant 0 : index
    %80 = vector.load %arg8[%c0_46, %c0_47] : memref<32x32xf32, #tpu.memory_space<vmem>>, vector<32x32xf32>
    %cst_48 = arith.constant dense<0.000000e+00> : vector<15x32xf32>
    %81 = tpu.matmul %76, %80, %cst_48 {dimension_numbers = #tpu.dot_dimension_numbers<[1], [0], [0], [1], [0, 0, 1, 1], [], []>} : vector<15x32xf32>, vector<32x32xf32>, vector<15x32xf32> -> vector<15x32xf32>
    %c0_49 = arith.constant 0 : index
    %c0_50 = arith.constant 0 : index
    %82 = vector.load %arg9[%c0_49, %c0_50] : memref<1x32xf32, #tpu.memory_space<vmem>>, vector<1x32xf32>
    %83 = vector.broadcast %82 : vector<1x32xf32> to vector<15x32xf32>
    %84 = arith.addf %81, %83 : vector<15x32xf32>
    %cst_51 = arith.constant 0.000000e+00 : f32
    %85 = vector.broadcast %cst_51 : f32 to vector<31x32xf32>
    %c0_52 = arith.constant 0 : index
    %c0_53 = arith.constant 0 : index
    %86 = vector.load %arg29[%c0_52, %c0_53] : memref<31x32xf32, #tpu.memory_space<vmem>>, vector<31x32xf32>
    tpu.vector_store %arg29[%c0_52, %c0_53], %85 {strides = array<i32>} : memref<31x32xf32, #tpu.memory_space<vmem>>, vector<31x32xf32>,
    %c8 = arith.constant 8 : index
    %c0_54 = arith.constant 0 : index
    %87 = vector.load %arg29[%c8, %c0_54] : memref<31x32xf32, #tpu.memory_space<vmem>>, vector<15x32xf32>
    tpu.vector_store %arg29[%c8, %c0_54], %84 {strides = array<i32>} : memref<31x32xf32, #tpu.memory_space<vmem>>, vector<15x32xf32>,
    %cst_55 = arith.constant 0.000000e+00 : f32
    %88 = vector.broadcast %cst_55 : f32 to vector<16x32xf32>
    %c0_56 = arith.constant 0 : index
    %c0_57 = arith.constant 0 : index
    %89 = vector.load %arg11[%c0_56, %c0_57] : memref<1x32xf32, #tpu.memory_space<vmem>>, vector<1x32xf32>
    %90 = vector.broadcast %89 : vector<1x32xf32> to vector<16x32xf32>
    %91 = arith.addf %88, %90 : vector<16x32xf32>
    %c0_58 = arith.constant 0 : index
    %c0_59 = arith.constant 0 : index
    %92 = vector.load %arg29[%c0_58, %c0_59] : memref<31x32xf32, #tpu.memory_space<vmem>>, vector<16x32xf32>
    %c0_60 = arith.constant 0 : index
    %c0_61 = arith.constant 0 : index
    %c0_62 = arith.constant 0 : index
    %93 = vector.load %arg10[%c0_60, %c0_61, %c0_62] : memref<16x32x32xf32, #tpu.memory_space<vmem>>, vector<1x32x32xf32>
    %94 = vector.shape_cast %93 : vector<1x32x32xf32> to vector<32x32xf32>
    %cst_63 = arith.constant dense<0.000000e+00> : vector<16x32xf32>
    %95 = tpu.matmul %92, %94, %cst_63 {dimension_numbers = #tpu.dot_dimension_numbers<[1], [0], [0], [1], [0, 0, 1, 1], [], []>} : vector<16x32xf32>, vector<32x32xf32>, vector<16x32xf32> -> vector<16x32xf32>
    %96 = arith.addf %91, %95 : vector<16x32xf32>
    %c1_64 = arith.constant 1 : index
    %c0_65 = arith.constant 0 : index
    %97 = vector.load %arg29[%c1_64, %c0_65] : memref<31x32xf32, #tpu.memory_space<vmem>>, vector<16x32xf32>
    %c1_66 = arith.constant 1 : index
    %c0_67 = arith.constant 0 : index
    %c0_68 = arith.constant 0 : index
    %98 = vector.load %arg10[%c1_66, %c0_67, %c0_68] : memref<16x32x32xf32, #tpu.memory_space<vmem>>, vector<1x32x32xf32>
    %99 = vector.shape_cast %98 : vector<1x32x32xf32> to vector<32x32xf32>
    %cst_69 = arith.constant dense<0.000000e+00> : vector<16x32xf32>
    %100 = tpu.matmul %97, %99, %cst_69 {dimension_numbers = #tpu.dot_dimension_numbers<[1], [0], [0], [1], [0, 0, 1, 1], [], []>} : vector<16x32xf32>, vector<32x32xf32>, vector<16x32xf32> -> vector<16x32xf32>
    %101 = arith.addf %96, %100 : vector<16x32xf32>
    %c2_70 = arith.constant 2 : index
    %c0_71 = arith.constant 0 : index
    %102 = vector.load %arg29[%c2_70, %c0_71] : memref<31x32xf32, #tpu.memory_space<vmem>>, vector<16x32xf32>
    %c2_72 = arith.constant 2 : index
    %c0_73 = arith.constant 0 : index
    %c0_74 = arith.constant 0 : index
    %103 = vector.load %arg10[%c2_72, %c0_73, %c0_74] : memref<16x32x32xf32, #tpu.memory_space<vmem>>, vector<1x32x32xf32>
    %104 = vector.shape_cast %103 : vector<1x32x32xf32> to vector<32x32xf32>
    %cst_75 = arith.constant dense<0.000000e+00> : vector<16x32xf32>
    %105 = tpu.matmul %102, %104, %cst_75 {dimension_numbers = #tpu.dot_dimension_numbers<[1], [0], [0], [1], [0, 0, 1, 1], [], []>} : vector<16x32xf32>, vector<32x32xf32>, vector<16x32xf32> -> vector<16x32xf32>
    %106 = arith.addf %101, %105 : vector<16x32xf32>
    %c3 = arith.constant 3 : index
    %c0_76 = arith.constant 0 : index
    %107 = vector.load %arg29[%c3, %c0_76] : memref<31x32xf32, #tpu.memory_space<vmem>>, vector<16x32xf32>
    %c3_77 = arith.constant 3 : index
    %c0_78 = arith.constant 0 : index
    %c0_79 = arith.constant 0 : index
    %108 = vector.load %arg10[%c3_77, %c0_78, %c0_79] : memref<16x32x32xf32, #tpu.memory_space<vmem>>, vector<1x32x32xf32>
    %109 = vector.shape_cast %108 : vector<1x32x32xf32> to vector<32x32xf32>
    %cst_80 = arith.constant dense<0.000000e+00> : vector<16x32xf32>
    %110 = tpu.matmul %107, %109, %cst_80 {dimension_numbers = #tpu.dot_dimension_numbers<[1], [0], [0], [1], [0, 0, 1, 1], [], []>} : vector<16x32xf32>, vector<32x32xf32>, vector<16x32xf32> -> vector<16x32xf32>
    %111 = arith.addf %106, %110 : vector<16x32xf32>
    %c4 = arith.constant 4 : index
    %c0_81 = arith.constant 0 : index
    %112 = vector.load %arg29[%c4, %c0_81] : memref<31x32xf32, #tpu.memory_space<vmem>>, vector<16x32xf32>
    %c4_82 = arith.constant 4 : index
    %c0_83 = arith.constant 0 : index
    %c0_84 = arith.constant 0 : index
    %113 = vector.load %arg10[%c4_82, %c0_83, %c0_84] : memref<16x32x32xf32, #tpu.memory_space<vmem>>, vector<1x32x32xf32>
    %114 = vector.shape_cast %113 : vector<1x32x32xf32> to vector<32x32xf32>
    %cst_85 = arith.constant dense<0.000000e+00> : vector<16x32xf32>
    %115 = tpu.matmul %112, %114, %cst_85 {dimension_numbers = #tpu.dot_dimension_numbers<[1], [0], [0], [1], [0, 0, 1, 1], [], []>} : vector<16x32xf32>, vector<32x32xf32>, vector<16x32xf32> -> vector<16x32xf32>
    %116 = arith.addf %111, %115 : vector<16x32xf32>
    %c5 = arith.constant 5 : index
    %c0_86 = arith.constant 0 : index
    %117 = vector.load %arg29[%c5, %c0_86] : memref<31x32xf32, #tpu.memory_space<vmem>>, vector<16x32xf32>
    %c5_87 = arith.constant 5 : index
    %c0_88 = arith.constant 0 : index
    %c0_89 = arith.constant 0 : index
    %118 = vector.load %arg10[%c5_87, %c0_88, %c0_89] : memref<16x32x32xf32, #tpu.memory_space<vmem>>, vector<1x32x32xf32>
    %119 = vector.shape_cast %118 : vector<1x32x32xf32> to vector<32x32xf32>
    %cst_90 = arith.constant dense<0.000000e+00> : vector<16x32xf32>
    %120 = tpu.matmul %117, %119, %cst_90 {dimension_numbers = #tpu.dot_dimension_numbers<[1], [0], [0], [1], [0, 0, 1, 1], [], []>} : vector<16x32xf32>, vector<32x32xf32>, vector<16x32xf32> -> vector<16x32xf32>
    %121 = arith.addf %116, %120 : vector<16x32xf32>
    %c6 = arith.constant 6 : index
    %c0_91 = arith.constant 0 : index
    %122 = vector.load %arg29[%c6, %c0_91] : memref<31x32xf32, #tpu.memory_space<vmem>>, vector<16x32xf32>
    %c6_92 = arith.constant 6 : index
    %c0_93 = arith.constant 0 : index
    %c0_94 = arith.constant 0 : index
    %123 = vector.load %arg10[%c6_92, %c0_93, %c0_94] : memref<16x32x32xf32, #tpu.memory_space<vmem>>, vector<1x32x32xf32>
    %124 = vector.shape_cast %123 : vector<1x32x32xf32> to vector<32x32xf32>
    %cst_95 = arith.constant dense<0.000000e+00> : vector<16x32xf32>
    %125 = tpu.matmul %122, %124, %cst_95 {dimension_numbers = #tpu.dot_dimension_numbers<[1], [0], [0], [1], [0, 0, 1, 1], [], []>} : vector<16x32xf32>, vector<32x32xf32>, vector<16x32xf32> -> vector<16x32xf32>
    %126 = arith.addf %121, %125 : vector<16x32xf32>
    %c7 = arith.constant 7 : index
    %c0_96 = arith.constant 0 : index
    %127 = vector.load %arg29[%c7, %c0_96] : memref<31x32xf32, #tpu.memory_space<vmem>>, vector<16x32xf32>
    %c7_97 = arith.constant 7 : index
    %c0_98 = arith.constant 0 : index
    %c0_99 = arith.constant 0 : index
    %128 = vector.load %arg10[%c7_97, %c0_98, %c0_99] : memref<16x32x32xf32, #tpu.memory_space<vmem>>, vector<1x32x32xf32>
    %129 = vector.shape_cast %128 : vector<1x32x32xf32> to vector<32x32xf32>
    %cst_100 = arith.constant dense<0.000000e+00> : vector<16x32xf32>
    %130 = tpu.matmul %127, %129, %cst_100 {dimension_numbers = #tpu.dot_dimension_numbers<[1], [0], [0], [1], [0, 0, 1, 1], [], []>} : vector<16x32xf32>, vector<32x32xf32>, vector<16x32xf32> -> vector<16x32xf32>
    %131 = arith.addf %126, %130 : vector<16x32xf32>
    %c8_101 = arith.constant 8 : index
    %c0_102 = arith.constant 0 : index
    %132 = vector.load %arg29[%c8_101, %c0_102] : memref<31x32xf32, #tpu.memory_space<vmem>>, vector<16x32xf32>
    %c8_103 = arith.constant 8 : index
    %c0_104 = arith.constant 0 : index
    %c0_105 = arith.constant 0 : index
    %133 = vector.load %arg10[%c8_103, %c0_104, %c0_105] : memref<16x32x32xf32, #tpu.memory_space<vmem>>, vector<1x32x32xf32>
    %134 = vector.shape_cast %133 : vector<1x32x32xf32> to vector<32x32xf32>
    %cst_106 = arith.constant dense<0.000000e+00> : vector<16x32xf32>
    %135 = tpu.matmul %132, %134, %cst_106 {dimension_numbers = #tpu.dot_dimension_numbers<[1], [0], [0], [1], [0, 0, 1, 1], [], []>} : vector<16x32xf32>, vector<32x32xf32>, vector<16x32xf32> -> vector<16x32xf32>
    %136 = arith.addf %131, %135 : vector<16x32xf32>
    %c9 = arith.constant 9 : index
    %c0_107 = arith.constant 0 : index
    %137 = vector.load %arg29[%c9, %c0_107] : memref<31x32xf32, #tpu.memory_space<vmem>>, vector<16x32xf32>
    %c9_108 = arith.constant 9 : index
    %c0_109 = arith.constant 0 : index
    %c0_110 = arith.constant 0 : index
    %138 = vector.load %arg10[%c9_108, %c0_109, %c0_110] : memref<16x32x32xf32, #tpu.memory_space<vmem>>, vector<1x32x32xf32>
    %139 = vector.shape_cast %138 : vector<1x32x32xf32> to vector<32x32xf32>
    %cst_111 = arith.constant dense<0.000000e+00> : vector<16x32xf32>
    %140 = tpu.matmul %137, %139, %cst_111 {dimension_numbers = #tpu.dot_dimension_numbers<[1], [0], [0], [1], [0, 0, 1, 1], [], []>} : vector<16x32xf32>, vector<32x32xf32>, vector<16x32xf32> -> vector<16x32xf32>
    %141 = arith.addf %136, %140 : vector<16x32xf32>
    %c10 = arith.constant 10 : index
    %c0_112 = arith.constant 0 : index
    %142 = vector.load %arg29[%c10, %c0_112] : memref<31x32xf32, #tpu.memory_space<vmem>>, vector<16x32xf32>
    %c10_113 = arith.constant 10 : index
    %c0_114 = arith.constant 0 : index
    %c0_115 = arith.constant 0 : index
    %143 = vector.load %arg10[%c10_113, %c0_114, %c0_115] : memref<16x32x32xf32, #tpu.memory_space<vmem>>, vector<1x32x32xf32>
    %144 = vector.shape_cast %143 : vector<1x32x32xf32> to vector<32x32xf32>
    %cst_116 = arith.constant dense<0.000000e+00> : vector<16x32xf32>
    %145 = tpu.matmul %142, %144, %cst_116 {dimension_numbers = #tpu.dot_dimension_numbers<[1], [0], [0], [1], [0, 0, 1, 1], [], []>} : vector<16x32xf32>, vector<32x32xf32>, vector<16x32xf32> -> vector<16x32xf32>
    %146 = arith.addf %141, %145 : vector<16x32xf32>
    %c11 = arith.constant 11 : index
    %c0_117 = arith.constant 0 : index
    %147 = vector.load %arg29[%c11, %c0_117] : memref<31x32xf32, #tpu.memory_space<vmem>>, vector<16x32xf32>
    %c11_118 = arith.constant 11 : index
    %c0_119 = arith.constant 0 : index
    %c0_120 = arith.constant 0 : index
    %148 = vector.load %arg10[%c11_118, %c0_119, %c0_120] : memref<16x32x32xf32, #tpu.memory_space<vmem>>, vector<1x32x32xf32>
    %149 = vector.shape_cast %148 : vector<1x32x32xf32> to vector<32x32xf32>
    %cst_121 = arith.constant dense<0.000000e+00> : vector<16x32xf32>
    %150 = tpu.matmul %147, %149, %cst_121 {dimension_numbers = #tpu.dot_dimension_numbers<[1], [0], [0], [1], [0, 0, 1, 1], [], []>} : vector<16x32xf32>, vector<32x32xf32>, vector<16x32xf32> -> vector<16x32xf32>
    %151 = arith.addf %146, %150 : vector<16x32xf32>
    %c12 = arith.constant 12 : index
    %c0_122 = arith.constant 0 : index
    %152 = vector.load %arg29[%c12, %c0_122] : memref<31x32xf32, #tpu.memory_space<vmem>>, vector<16x32xf32>
    %c12_123 = arith.constant 12 : index
    %c0_124 = arith.constant 0 : index
    %c0_125 = arith.constant 0 : index
    %153 = vector.load %arg10[%c12_123, %c0_124, %c0_125] : memref<16x32x32xf32, #tpu.memory_space<vmem>>, vector<1x32x32xf32>
    %154 = vector.shape_cast %153 : vector<1x32x32xf32> to vector<32x32xf32>
    %cst_126 = arith.constant dense<0.000000e+00> : vector<16x32xf32>
    %155 = tpu.matmul %152, %154, %cst_126 {dimension_numbers = #tpu.dot_dimension_numbers<[1], [0], [0], [1], [0, 0, 1, 1], [], []>} : vector<16x32xf32>, vector<32x32xf32>, vector<16x32xf32> -> vector<16x32xf32>
    %156 = arith.addf %151, %155 : vector<16x32xf32>
    %c13 = arith.constant 13 : index
    %c0_127 = arith.constant 0 : index
    %157 = vector.load %arg29[%c13, %c0_127] : memref<31x32xf32, #tpu.memory_space<vmem>>, vector<16x32xf32>
    %c13_128 = arith.constant 13 : index
    %c0_129 = arith.constant 0 : index
    %c0_130 = arith.constant 0 : index
    %158 = vector.load %arg10[%c13_128, %c0_129, %c0_130] : memref<16x32x32xf32, #tpu.memory_space<vmem>>, vector<1x32x32xf32>
    %159 = vector.shape_cast %158 : vector<1x32x32xf32> to vector<32x32xf32>
    %cst_131 = arith.constant dense<0.000000e+00> : vector<16x32xf32>
    %160 = tpu.matmul %157, %159, %cst_131 {dimension_numbers = #tpu.dot_dimension_numbers<[1], [0], [0], [1], [0, 0, 1, 1], [], []>} : vector<16x32xf32>, vector<32x32xf32>, vector<16x32xf32> -> vector<16x32xf32>
    %161 = arith.addf %156, %160 : vector<16x32xf32>
    %c14 = arith.constant 14 : index
    %c0_132 = arith.constant 0 : index
    %162 = vector.load %arg29[%c14, %c0_132] : memref<31x32xf32, #tpu.memory_space<vmem>>, vector<16x32xf32>
    %c14_133 = arith.constant 14 : index
    %c0_134 = arith.constant 0 : index
    %c0_135 = arith.constant 0 : index
    %163 = vector.load %arg10[%c14_133, %c0_134, %c0_135] : memref<16x32x32xf32, #tpu.memory_space<vmem>>, vector<1x32x32xf32>
    %164 = vector.shape_cast %163 : vector<1x32x32xf32> to vector<32x32xf32>
    %cst_136 = arith.constant dense<0.000000e+00> : vector<16x32xf32>
    %165 = tpu.matmul %162, %164, %cst_136 {dimension_numbers = #tpu.dot_dimension_numbers<[1], [0], [0], [1], [0, 0, 1, 1], [], []>} : vector<16x32xf32>, vector<32x32xf32>, vector<16x32xf32> -> vector<16x32xf32>
    %166 = arith.addf %161, %165 : vector<16x32xf32>
    %c15 = arith.constant 15 : index
    %c0_137 = arith.constant 0 : index
    %167 = vector.load %arg29[%c15, %c0_137] : memref<31x32xf32, #tpu.memory_space<vmem>>, vector<16x32xf32>
    %c15_138 = arith.constant 15 : index
    %c0_139 = arith.constant 0 : index
    %c0_140 = arith.constant 0 : index
    %168 = vector.load %arg10[%c15_138, %c0_139, %c0_140] : memref<16x32x32xf32, #tpu.memory_space<vmem>>, vector<1x32x32xf32>
    %169 = vector.shape_cast %168 : vector<1x32x32xf32> to vector<32x32xf32>
    %cst_141 = arith.constant dense<0.000000e+00> : vector<16x32xf32>
    %170 = tpu.matmul %167, %169, %cst_141 {dimension_numbers = #tpu.dot_dimension_numbers<[1], [0], [0], [1], [0, 0, 1, 1], [], []>} : vector<16x32xf32>, vector<32x32xf32>, vector<16x32xf32> -> vector<16x32xf32>
    %171 = arith.addf %166, %170 : vector<16x32xf32>
    %cst_142 = arith.constant 5.000000e-01 : f32
    %172 = vector.broadcast %cst_142 : f32 to vector<16x32xf32>
    %173 = arith.mulf %172, %171 : vector<16x32xf32>
    %cst_143 = arith.constant 4.471500e-02 : f32
    %174 = vector.broadcast %cst_143 : f32 to vector<16x32xf32>
    %175 = arith.mulf %174, %171 : vector<16x32xf32>
    %176 = arith.mulf %175, %171 : vector<16x32xf32>
    %177 = arith.mulf %176, %171 : vector<16x32xf32>
    %178 = arith.addf %171, %177 : vector<16x32xf32>
    %cst_144 = arith.constant 0.797884583 : f32
    %179 = vector.broadcast %cst_144 : f32 to vector<16x32xf32>
    %180 = arith.mulf %179, %178 : vector<16x32xf32>
    %181 = math.tanh %180 : vector<16x32xf32>
    %cst_145 = arith.constant 1.000000e+00 : f32
    %182 = vector.broadcast %cst_145 : f32 to vector<16x32xf32>
    %183 = arith.addf %182, %181 : vector<16x32xf32>
    %184 = arith.mulf %173, %183 : vector<16x32xf32>
    %185 = vector.extract_strided_slice %184 {offsets = [0, 0], sizes = [15, 32], strides = [1, 1]} : vector<16x32xf32> to vector<15x32xf32>
    %186 = arith.addf %84, %185 : vector<15x32xf32>
    %c0_146 = arith.constant 0 : index
    %c0_147 = arith.constant 0 : index
    %187 = vector.load %arg12[%c0_146, %c0_147] : memref<1x32xf32, #tpu.memory_space<vmem>>, vector<1x32xf32>
    %c0_148 = arith.constant 0 : index
    %c0_149 = arith.constant 0 : index
    %188 = vector.load %arg13[%c0_148, %c0_149] : memref<1x32xf32, #tpu.memory_space<vmem>>, vector<1x32xf32>
    %cst_150 = arith.constant dense<0.000000e+00> : vector<15xf32>
    %189 = vector.multi_reduction <add>, %186, %cst_150 [1] : vector<15x32xf32> to vector<15xf32>
    %190 = vector.shape_cast %189 : vector<15xf32> to vector<15x1xf32>
    %cst_151 = arith.constant 3.200000e+01 : f32
    %191 = vector.broadcast %cst_151 : f32 to vector<15x1xf32>
    %192 = arith.divf %190, %191 : vector<15x1xf32>
    %193 = vector.broadcast %192 : vector<15x1xf32> to vector<15x32xf32>
    %194 = arith.subf %186, %193 : vector<15x32xf32>
    %195 = arith.mulf %194, %194 : vector<15x32xf32>
    %cst_152 = arith.constant dense<0.000000e+00> : vector<15xf32>
    %196 = vector.multi_reduction <add>, %195, %cst_152 [1] : vector<15x32xf32> to vector<15xf32>
    %197 = vector.shape_cast %196 : vector<15xf32> to vector<15x1xf32>
    %cst_153 = arith.constant 3.200000e+01 : f32
    %198 = vector.broadcast %cst_153 : f32 to vector<15x1xf32>
    %199 = arith.divf %197, %198 : vector<15x1xf32>
    %200 = vector.broadcast %192 : vector<15x1xf32> to vector<15x32xf32>
    %201 = arith.subf %186, %200 : vector<15x32xf32>
    %cst_154 = arith.constant 9.99999974E-6 : f32
    %202 = vector.broadcast %cst_154 : f32 to vector<15x1xf32>
    %203 = arith.addf %199, %202 : vector<15x1xf32>
    %204 = math.rsqrt %203 : vector<15x1xf32>
    %205 = vector.broadcast %204 : vector<15x1xf32> to vector<15x32xf32>
    %206 = arith.mulf %201, %205 : vector<15x32xf32>
    %207 = vector.broadcast %187 : vector<1x32xf32> to vector<15x32xf32>
    %208 = arith.mulf %206, %207 : vector<15x32xf32>
    %209 = vector.broadcast %188 : vector<1x32xf32> to vector<15x32xf32>
    %210 = arith.addf %208, %209 : vector<15x32xf32>
    %c0_155 = arith.constant 0 : index
    %c0_156 = arith.constant 0 : index
    %c0_157 = arith.constant 0 : index
    %211 = vector.load %arg14[%c0_155, %c0_156, %c0_157] : memref<2x32x96xf32, #tpu.memory_space<vmem>>, vector<1x32x96xf32>
    %212 = vector.shape_cast %211 : vector<1x32x96xf32> to vector<32x96xf32>
    %cst_158 = arith.constant dense<0.000000e+00> : vector<15x96xf32>
    %213 = tpu.matmul %210, %212, %cst_158 {dimension_numbers = #tpu.dot_dimension_numbers<[1], [0], [0], [1], [0, 0, 1, 1], [], []>} : vector<15x32xf32>, vector<32x96xf32>, vector<15x96xf32> -> vector<15x96xf32>
    %c0_159 = arith.constant 0 : index
    %c0_160 = arith.constant 0 : index
    %c0_161 = arith.constant 0 : index
    %214 = vector.load %arg15[%c0_159, %c0_160, %c0_161] : memref<2x1x96xf32, #tpu.memory_space<vmem>>, vector<1x1x96xf32>
    %215 = vector.shape_cast %214 : vector<1x1x96xf32> to vector<1x96xf32>
    %216 = vector.broadcast %215 : vector<1x96xf32> to vector<15x96xf32>
    %217 = arith.addf %213, %216 : vector<15x96xf32>
    %218 = vector.extract_strided_slice %217 {offsets = [0, 0], sizes = [15, 32], strides = [1, 1]} : vector<15x96xf32> to vector<15x32xf32>
    %cst_162 = arith.constant 0.353553385 : f32
    %219 = vector.broadcast %cst_162 : f32 to vector<15x32xf32>
    %220 = arith.mulf %218, %219 : vector<15x32xf32>
    %221 = vector.extract_strided_slice %217 {offsets = [0, 32], sizes = [15, 32], strides = [1, 1]} : vector<15x96xf32> to vector<15x32xf32>
    %222 = vector.extract_strided_slice %217 {offsets = [0, 64], sizes = [15, 32], strides = [1, 1]} : vector<15x96xf32> to vector<15x32xf32>
    %cst_163 = arith.constant 0.000000e+00 : f32
    %223 = vector.broadcast %cst_163 : f32 to vector<15x32xf32>
    %c0_164 = arith.constant 0 : index
    %c0_165 = arith.constant 0 : index
    %c0_166 = arith.constant 0 : index
    %224 = vector.load %arg17[%c0_164, %c0_165, %c0_166] : memref<2x1x32xf32, #tpu.memory_space<vmem>>, vector<1x1x32xf32>
    %225 = vector.shape_cast %224 : vector<1x1x32xf32> to vector<1x32xf32>
    %226 = vector.broadcast %225 : vector<1x32xf32> to vector<15x32xf32>
    %227 = arith.addf %223, %226 : vector<15x32xf32>
    %228 = vector.extract_strided_slice %220 {offsets = [0, 0], sizes = [15, 8], strides = [1, 1]} : vector<15x32xf32> to vector<15x8xf32>
    %229 = vector.extract_strided_slice %221 {offsets = [0, 0], sizes = [15, 8], strides = [1, 1]} : vector<15x32xf32> to vector<15x8xf32>
    %230 = vector.extract_strided_slice %222 {offsets = [0, 0], sizes = [15, 8], strides = [1, 1]} : vector<15x32xf32> to vector<15x8xf32>
    %cst_167 = arith.constant dense<0.000000e+00> : vector<15x15xf32>
    %231 = tpu.matmul %228, %229, %cst_167 {dimension_numbers = #tpu.dot_dimension_numbers<[1], [1], [0], [0], [0, 0, 1, 0], [], []>} : vector<15x8xf32>, vector<15x8xf32>, vector<15x15xf32> -> vector<15x15xf32>
    %cst_168 = arith.constant dense<0xFF800000> : vector<15xf32>
    %232 = vector.multi_reduction <maximumf>, %231, %cst_168 [1] : vector<15x15xf32> to vector<15xf32>
    %233 = vector.shape_cast %232 : vector<15xf32> to vector<15x1xf32>
    %234 = vector.broadcast %233 : vector<15x1xf32> to vector<15x15xf32>
    %235 = arith.subf %231, %234 : vector<15x15xf32>
    %236 = math.exp %235 : vector<15x15xf32>
    %cst_169 = arith.constant dense<0.000000e+00> : vector<15xf32>
    %237 = vector.multi_reduction <add>, %236, %cst_169 [1] : vector<15x15xf32> to vector<15xf32>
    %238 = vector.shape_cast %237 : vector<15xf32> to vector<15x1xf32>
    %239 = tpu.reciprocal %238 {approx = true} : vector<15x1xf32> -> vector<15x1xf32>
    %240 = vector.broadcast %239 : vector<15x1xf32> to vector<15x15xf32>
    %241 = arith.mulf %236, %240 : vector<15x15xf32>
    %cst_170 = arith.constant dense<0.000000e+00> : vector<15x8xf32>
    %242 = tpu.matmul %241, %230, %cst_170 {dimension_numbers = #tpu.dot_dimension_numbers<[1], [0], [0], [1], [0, 0, 1, 1], [], []>} : vector<15x15xf32>, vector<15x8xf32>, vector<15x8xf32> -> vector<15x8xf32>
    %c0_171 = arith.constant 0 : index
    %c0_172 = arith.constant 0 : index
    %c0_173 = arith.constant 0 : index
    %243 = vector.load %arg16[%c0_171, %c0_172, %c0_173] : memref<2x32x32xf32, #tpu.memory_space<vmem>>, vector<1x8x32xf32>
    %244 = vector.shape_cast %243 : vector<1x8x32xf32> to vector<8x32xf32>
    %cst_174 = arith.constant dense<0.000000e+00> : vector<15x32xf32>
    %245 = tpu.matmul %242, %244, %cst_174 {dimension_numbers = #tpu.dot_dimension_numbers<[1], [0], [0], [1], [0, 0, 1, 1], [], []>} : vector<15x8xf32>, vector<8x32xf32>, vector<15x32xf32> -> vector<15x32xf32>
    %246 = arith.addf %227, %245 : vector<15x32xf32>
    %247 = vector.extract_strided_slice %220 {offsets = [0, 8], sizes = [15, 8], strides = [1, 1]} : vector<15x32xf32> to vector<15x8xf32>
    %248 = vector.extract_strided_slice %221 {offsets = [0, 8], sizes = [15, 8], strides = [1, 1]} : vector<15x32xf32> to vector<15x8xf32>
    %249 = vector.extract_strided_slice %222 {offsets = [0, 8], sizes = [15, 8], strides = [1, 1]} : vector<15x32xf32> to vector<15x8xf32>
    %cst_175 = arith.constant dense<0.000000e+00> : vector<15x15xf32>
    %250 = tpu.matmul %247, %248, %cst_175 {dimension_numbers = #tpu.dot_dimension_numbers<[1], [1], [0], [0], [0, 0, 1, 0], [], []>} : vector<15x8xf32>, vector<15x8xf32>, vector<15x15xf32> -> vector<15x15xf32>
    %cst_176 = arith.constant dense<0xFF800000> : vector<15xf32>
    %251 = vector.multi_reduction <maximumf>, %250, %cst_176 [1] : vector<15x15xf32> to vector<15xf32>
    %252 = vector.shape_cast %251 : vector<15xf32> to vector<15x1xf32>
    %253 = vector.broadcast %252 : vector<15x1xf32> to vector<15x15xf32>
    %254 = arith.subf %250, %253 : vector<15x15xf32>
    %255 = math.exp %254 : vector<15x15xf32>
    %cst_177 = arith.constant dense<0.000000e+00> : vector<15xf32>
    %256 = vector.multi_reduction <add>, %255, %cst_177 [1] : vector<15x15xf32> to vector<15xf32>
    %257 = vector.shape_cast %256 : vector<15xf32> to vector<15x1xf32>
    %258 = tpu.reciprocal %257 {approx = true} : vector<15x1xf32> -> vector<15x1xf32>
    %259 = vector.broadcast %258 : vector<15x1xf32> to vector<15x15xf32>
    %260 = arith.mulf %255, %259 : vector<15x15xf32>
    %cst_178 = arith.constant dense<0.000000e+00> : vector<15x8xf32>
    %261 = tpu.matmul %260, %249, %cst_178 {dimension_numbers = #tpu.dot_dimension_numbers<[1], [0], [0], [1], [0, 0, 1, 1], [], []>} : vector<15x15xf32>, vector<15x8xf32>, vector<15x8xf32> -> vector<15x8xf32>
    %c0_179 = arith.constant 0 : index
    %c8_180 = arith.constant 8 : index
    %c0_181 = arith.constant 0 : index
    %262 = vector.load %arg16[%c0_179, %c8_180, %c0_181] : memref<2x32x32xf32, #tpu.memory_space<vmem>>, vector<1x8x32xf32>
    %263 = vector.shape_cast %262 : vector<1x8x32xf32> to vector<8x32xf32>
    %cst_182 = arith.constant dense<0.000000e+00> : vector<15x32xf32>
    %264 = tpu.matmul %261, %263, %cst_182 {dimension_numbers = #tpu.dot_dimension_numbers<[1], [0], [0], [1], [0, 0, 1, 1], [], []>} : vector<15x8xf32>, vector<8x32xf32>, vector<15x32xf32> -> vector<15x32xf32>
    %265 = arith.addf %246, %264 : vector<15x32xf32>
    %266 = vector.extract_strided_slice %220 {offsets = [0, 16], sizes = [15, 8], strides = [1, 1]} : vector<15x32xf32> to vector<15x8xf32>
    %267 = vector.extract_strided_slice %221 {offsets = [0, 16], sizes = [15, 8], strides = [1, 1]} : vector<15x32xf32> to vector<15x8xf32>
    %268 = vector.extract_strided_slice %222 {offsets = [0, 16], sizes = [15, 8], strides = [1, 1]} : vector<15x32xf32> to vector<15x8xf32>
    %cst_183 = arith.constant dense<0.000000e+00> : vector<15x15xf32>
    %269 = tpu.matmul %266, %267, %cst_183 {dimension_numbers = #tpu.dot_dimension_numbers<[1], [1], [0], [0], [0, 0, 1, 0], [], []>} : vector<15x8xf32>, vector<15x8xf32>, vector<15x15xf32> -> vector<15x15xf32>
    %cst_184 = arith.constant dense<0xFF800000> : vector<15xf32>
    %270 = vector.multi_reduction <maximumf>, %269, %cst_184 [1] : vector<15x15xf32> to vector<15xf32>
    %271 = vector.shape_cast %270 : vector<15xf32> to vector<15x1xf32>
    %272 = vector.broadcast %271 : vector<15x1xf32> to vector<15x15xf32>
    %273 = arith.subf %269, %272 : vector<15x15xf32>
    %274 = math.exp %273 : vector<15x15xf32>
    %cst_185 = arith.constant dense<0.000000e+00> : vector<15xf32>
    %275 = vector.multi_reduction <add>, %274, %cst_185 [1] : vector<15x15xf32> to vector<15xf32>
    %276 = vector.shape_cast %275 : vector<15xf32> to vector<15x1xf32>
    %277 = tpu.reciprocal %276 {approx = true} : vector<15x1xf32> -> vector<15x1xf32>
    %278 = vector.broadcast %277 : vector<15x1xf32> to vector<15x15xf32>
    %279 = arith.mulf %274, %278 : vector<15x15xf32>
    %cst_186 = arith.constant dense<0.000000e+00> : vector<15x8xf32>
    %280 = tpu.matmul %279, %268, %cst_186 {dimension_numbers = #tpu.dot_dimension_numbers<[1], [0], [0], [1], [0, 0, 1, 1], [], []>} : vector<15x15xf32>, vector<15x8xf32>, vector<15x8xf32> -> vector<15x8xf32>
    %c0_187 = arith.constant 0 : index
    %c16_188 = arith.constant 16 : index
    %c0_189 = arith.constant 0 : index
    %281 = vector.load %arg16[%c0_187, %c16_188, %c0_189] : memref<2x32x32xf32, #tpu.memory_space<vmem>>, vector<1x8x32xf32>
    %282 = vector.shape_cast %281 : vector<1x8x32xf32> to vector<8x32xf32>
    %cst_190 = arith.constant dense<0.000000e+00> : vector<15x32xf32>
    %283 = tpu.matmul %280, %282, %cst_190 {dimension_numbers = #tpu.dot_dimension_numbers<[1], [0], [0], [1], [0, 0, 1, 1], [], []>} : vector<15x8xf32>, vector<8x32xf32>, vector<15x32xf32> -> vector<15x32xf32>
    %284 = arith.addf %265, %283 : vector<15x32xf32>
    %285 = vector.extract_strided_slice %220 {offsets = [0, 24], sizes = [15, 8], strides = [1, 1]} : vector<15x32xf32> to vector<15x8xf32>
    %286 = vector.extract_strided_slice %221 {offsets = [0, 24], sizes = [15, 8], strides = [1, 1]} : vector<15x32xf32> to vector<15x8xf32>
    %287 = vector.extract_strided_slice %222 {offsets = [0, 24], sizes = [15, 8], strides = [1, 1]} : vector<15x32xf32> to vector<15x8xf32>
    %cst_191 = arith.constant dense<0.000000e+00> : vector<15x15xf32>
    %288 = tpu.matmul %285, %286, %cst_191 {dimension_numbers = #tpu.dot_dimension_numbers<[1], [1], [0], [0], [0, 0, 1, 0], [], []>} : vector<15x8xf32>, vector<15x8xf32>, vector<15x15xf32> -> vector<15x15xf32>
    %cst_192 = arith.constant dense<0xFF800000> : vector<15xf32>
    %289 = vector.multi_reduction <maximumf>, %288, %cst_192 [1] : vector<15x15xf32> to vector<15xf32>
    %290 = vector.shape_cast %289 : vector<15xf32> to vector<15x1xf32>
    %291 = vector.broadcast %290 : vector<15x1xf32> to vector<15x15xf32>
    %292 = arith.subf %288, %291 : vector<15x15xf32>
    %293 = math.exp %292 : vector<15x15xf32>
    %cst_193 = arith.constant dense<0.000000e+00> : vector<15xf32>
    %294 = vector.multi_reduction <add>, %293, %cst_193 [1] : vector<15x15xf32> to vector<15xf32>
    %295 = vector.shape_cast %294 : vector<15xf32> to vector<15x1xf32>
    %296 = tpu.reciprocal %295 {approx = true} : vector<15x1xf32> -> vector<15x1xf32>
    %297 = vector.broadcast %296 : vector<15x1xf32> to vector<15x15xf32>
    %298 = arith.mulf %293, %297 : vector<15x15xf32>
    %cst_194 = arith.constant dense<0.000000e+00> : vector<15x8xf32>
    %299 = tpu.matmul %298, %287, %cst_194 {dimension_numbers = #tpu.dot_dimension_numbers<[1], [0], [0], [1], [0, 0, 1, 1], [], []>} : vector<15x15xf32>, vector<15x8xf32>, vector<15x8xf32> -> vector<15x8xf32>
    %c0_195 = arith.constant 0 : index
    %c24 = arith.constant 24 : index
    %c0_196 = arith.constant 0 : index
    %300 = vector.load %arg16[%c0_195, %c24, %c0_196] : memref<2x32x32xf32, #tpu.memory_space<vmem>>, vector<1x8x32xf32>
    %301 = vector.shape_cast %300 : vector<1x8x32xf32> to vector<8x32xf32>
    %cst_197 = arith.constant dense<0.000000e+00> : vector<15x32xf32>
    %302 = tpu.matmul %299, %301, %cst_197 {dimension_numbers = #tpu.dot_dimension_numbers<[1], [0], [0], [1], [0, 0, 1, 1], [], []>} : vector<15x8xf32>, vector<8x32xf32>, vector<15x32xf32> -> vector<15x32xf32>
    %303 = arith.addf %284, %302 : vector<15x32xf32>
    %304 = arith.addf %210, %303 : vector<15x32xf32>
    %c0_198 = arith.constant 0 : index
    %c0_199 = arith.constant 0 : index
    %c0_200 = arith.constant 0 : index
    %305 = vector.load %arg18[%c0_198, %c0_199, %c0_200] : memref<2x1x32xf32, #tpu.memory_space<vmem>>, vector<1x1x32xf32>
    %306 = vector.shape_cast %305 : vector<1x1x32xf32> to vector<1x32xf32>
    %c0_201 = arith.constant 0 : index
    %c0_202 = arith.constant 0 : index
    %c0_203 = arith.constant 0 : index
    %307 = vector.load %arg19[%c0_201, %c0_202, %c0_203] : memref<2x1x32xf32, #tpu.memory_space<vmem>>, vector<1x1x32xf32>
    %308 = vector.shape_cast %307 : vector<1x1x32xf32> to vector<1x32xf32>
    %cst_204 = arith.constant dense<0.000000e+00> : vector<15xf32>
    %309 = vector.multi_reduction <add>, %304, %cst_204 [1] : vector<15x32xf32> to vector<15xf32>
    %310 = vector.shape_cast %309 : vector<15xf32> to vector<15x1xf32>
    %cst_205 = arith.constant 3.200000e+01 : f32
    %311 = vector.broadcast %cst_205 : f32 to vector<15x1xf32>
    %312 = arith.divf %310, %311 : vector<15x1xf32>
    %313 = vector.broadcast %312 : vector<15x1xf32> to vector<15x32xf32>
    %314 = arith.subf %304, %313 : vector<15x32xf32>
    %315 = arith.mulf %314, %314 : vector<15x32xf32>
    %cst_206 = arith.constant dense<0.000000e+00> : vector<15xf32>
    %316 = vector.multi_reduction <add>, %315, %cst_206 [1] : vector<15x32xf32> to vector<15xf32>
    %317 = vector.shape_cast %316 : vector<15xf32> to vector<15x1xf32>
    %cst_207 = arith.constant 3.200000e+01 : f32
    %318 = vector.broadcast %cst_207 : f32 to vector<15x1xf32>
    %319 = arith.divf %317, %318 : vector<15x1xf32>
    %320 = vector.broadcast %312 : vector<15x1xf32> to vector<15x32xf32>
    %321 = arith.subf %304, %320 : vector<15x32xf32>
    %cst_208 = arith.constant 9.99999974E-6 : f32
    %322 = vector.broadcast %cst_208 : f32 to vector<15x1xf32>
    %323 = arith.addf %319, %322 : vector<15x1xf32>
    %324 = math.rsqrt %323 : vector<15x1xf32>
    %325 = vector.broadcast %324 : vector<15x1xf32> to vector<15x32xf32>
    %326 = arith.mulf %321, %325 : vector<15x32xf32>
    %327 = vector.broadcast %306 : vector<1x32xf32> to vector<15x32xf32>
    %328 = arith.mulf %326, %327 : vector<15x32xf32>
    %329 = vector.broadcast %308 : vector<1x32xf32> to vector<15x32xf32>
    %330 = arith.addf %328, %329 : vector<15x32xf32>
    %c0_209 = arith.constant 0 : index
    %c0_210 = arith.constant 0 : index
    %c0_211 = arith.constant 0 : index
    %331 = vector.load %arg20[%c0_209, %c0_210, %c0_211] : memref<2x32x64xf32, #tpu.memory_space<vmem>>, vector<1x32x64xf32>
    %332 = vector.shape_cast %331 : vector<1x32x64xf32> to vector<32x64xf32>
    %cst_212 = arith.constant dense<0.000000e+00> : vector<15x64xf32>
    %333 = tpu.matmul %330, %332, %cst_212 {dimension_numbers = #tpu.dot_dimension_numbers<[1], [0], [0], [1], [0, 0, 1, 1], [], []>} : vector<15x32xf32>, vector<32x64xf32>, vector<15x64xf32> -> vector<15x64xf32>
    %c0_213 = arith.constant 0 : index
    %c0_214 = arith.constant 0 : index
    %c0_215 = arith.constant 0 : index
    %334 = vector.load %arg21[%c0_213, %c0_214, %c0_215] : memref<2x1x64xf32, #tpu.memory_space<vmem>>, vector<1x1x64xf32>
    %335 = vector.shape_cast %334 : vector<1x1x64xf32> to vector<1x64xf32>
    %336 = vector.broadcast %335 : vector<1x64xf32> to vector<15x64xf32>
    %337 = arith.addf %333, %336 : vector<15x64xf32>
    %cst_216 = arith.constant 5.000000e-01 : f32
    %338 = vector.broadcast %cst_216 : f32 to vector<15x64xf32>
    %339 = arith.mulf %338, %337 : vector<15x64xf32>
    %cst_217 = arith.constant 4.471500e-02 : f32
    %340 = vector.broadcast %cst_217 : f32 to vector<15x64xf32>
    %341 = arith.mulf %340, %337 : vector<15x64xf32>
    %342 = arith.mulf %341, %337 : vector<15x64xf32>
    %343 = arith.mulf %342, %337 : vector<15x64xf32>
    %344 = arith.addf %337, %343 : vector<15x64xf32>
    %cst_218 = arith.constant 0.797884583 : f32
    %345 = vector.broadcast %cst_218 : f32 to vector<15x64xf32>
    %346 = arith.mulf %345, %344 : vector<15x64xf32>
    %347 = math.tanh %346 : vector<15x64xf32>
    %cst_219 = arith.constant 1.000000e+00 : f32
    %348 = vector.broadcast %cst_219 : f32 to vector<15x64xf32>
    %349 = arith.addf %348, %347 : vector<15x64xf32>
    %350 = arith.mulf %339, %349 : vector<15x64xf32>
    %c0_220 = arith.constant 0 : index
    %c0_221 = arith.constant 0 : index
    %c0_222 = arith.constant 0 : index
    %351 = vector.load %arg22[%c0_220, %c0_221, %c0_222] : memref<2x64x32xf32, #tpu.memory_space<vmem>>, vector<1x64x32xf32>
    %352 = vector.shape_cast %351 : vector<1x64x32xf32> to vector<64x32xf32>
    %cst_223 = arith.constant dense<0.000000e+00> : vector<15x32xf32>
    %353 = tpu.matmul %350, %352, %cst_223 {dimension_numbers = #tpu.dot_dimension_numbers<[1], [0], [0], [1], [0, 0, 1, 1], [], []>} : vector<15x64xf32>, vector<64x32xf32>, vector<15x32xf32> -> vector<15x32xf32>
    %c0_224 = arith.constant 0 : index
    %c0_225 = arith.constant 0 : index
    %c0_226 = arith.constant 0 : index
    %354 = vector.load %arg23[%c0_224, %c0_225, %c0_226] : memref<2x1x32xf32, #tpu.memory_space<vmem>>, vector<1x1x32xf32>
    %355 = vector.shape_cast %354 : vector<1x1x32xf32> to vector<1x32xf32>
    %356 = vector.broadcast %355 : vector<1x32xf32> to vector<15x32xf32>
    %357 = arith.addf %353, %356 : vector<15x32xf32>
    %358 = arith.addf %330, %357 : vector<15x32xf32>
    %c0_227 = arith.constant 0 : index
    %c0_228 = arith.constant 0 : index
    %c0_229 = arith.constant 0 : index
    %359 = vector.load %arg24[%c0_227, %c0_228, %c0_229] : memref<2x1x32xf32, #tpu.memory_space<vmem>>, vector<1x1x32xf32>
    %360 = vector.shape_cast %359 : vector<1x1x32xf32> to vector<1x32xf32>
    %c0_230 = arith.constant 0 : index
    %c0_231 = arith.constant 0 : index
    %c0_232 = arith.constant 0 : index
    %361 = vector.load %arg25[%c0_230, %c0_231, %c0_232] : memref<2x1x32xf32, #tpu.memory_space<vmem>>, vector<1x1x32xf32>
    %362 = vector.shape_cast %361 : vector<1x1x32xf32> to vector<1x32xf32>
    %cst_233 = arith.constant dense<0.000000e+00> : vector<15xf32>
    %363 = vector.multi_reduction <add>, %358, %cst_233 [1] : vector<15x32xf32> to vector<15xf32>
    %364 = vector.shape_cast %363 : vector<15xf32> to vector<15x1xf32>
    %cst_234 = arith.constant 3.200000e+01 : f32
    %365 = vector.broadcast %cst_234 : f32 to vector<15x1xf32>
    %366 = arith.divf %364, %365 : vector<15x1xf32>
    %367 = vector.broadcast %366 : vector<15x1xf32> to vector<15x32xf32>
    %368 = arith.subf %358, %367 : vector<15x32xf32>
    %369 = arith.mulf %368, %368 : vector<15x32xf32>
    %cst_235 = arith.constant dense<0.000000e+00> : vector<15xf32>
    %370 = vector.multi_reduction <add>, %369, %cst_235 [1] : vector<15x32xf32> to vector<15xf32>
    %371 = vector.shape_cast %370 : vector<15xf32> to vector<15x1xf32>
    %cst_236 = arith.constant 3.200000e+01 : f32
    %372 = vector.broadcast %cst_236 : f32 to vector<15x1xf32>
    %373 = arith.divf %371, %372 : vector<15x1xf32>
    %374 = vector.broadcast %366 : vector<15x1xf32> to vector<15x32xf32>
    %375 = arith.subf %358, %374 : vector<15x32xf32>
    %cst_237 = arith.constant 9.99999974E-6 : f32
    %376 = vector.broadcast %cst_237 : f32 to vector<15x1xf32>
    %377 = arith.addf %373, %376 : vector<15x1xf32>
    %378 = math.rsqrt %377 : vector<15x1xf32>
    %379 = vector.broadcast %378 : vector<15x1xf32> to vector<15x32xf32>
    %380 = arith.mulf %375, %379 : vector<15x32xf32>
    %381 = vector.broadcast %360 : vector<1x32xf32> to vector<15x32xf32>
    %382 = arith.mulf %380, %381 : vector<15x32xf32>
    %383 = vector.broadcast %362 : vector<1x32xf32> to vector<15x32xf32>
    %384 = arith.addf %382, %383 : vector<15x32xf32>
    %c1_238 = arith.constant 1 : index
    %c0_239 = arith.constant 0 : index
    %c0_240 = arith.constant 0 : index
    %385 = vector.load %arg14[%c1_238, %c0_239, %c0_240] : memref<2x32x96xf32, #tpu.memory_space<vmem>>, vector<1x32x96xf32>
    %386 = vector.shape_cast %385 : vector<1x32x96xf32> to vector<32x96xf32>
    %cst_241 = arith.constant dense<0.000000e+00> : vector<15x96xf32>
    %387 = tpu.matmul %384, %386, %cst_241 {dimension_numbers = #tpu.dot_dimension_numbers<[1], [0], [0], [1], [0, 0, 1, 1], [], []>} : vector<15x32xf32>, vector<32x96xf32>, vector<15x96xf32> -> vector<15x96xf32>
    %c1_242 = arith.constant 1 : index
    %c0_243 = arith.constant 0 : index
    %c0_244 = arith.constant 0 : index
    %388 = vector.load %arg15[%c1_242, %c0_243, %c0_244] : memref<2x1x96xf32, #tpu.memory_space<vmem>>, vector<1x1x96xf32>
    %389 = vector.shape_cast %388 : vector<1x1x96xf32> to vector<1x96xf32>
    %390 = vector.broadcast %389 : vector<1x96xf32> to vector<15x96xf32>
    %391 = arith.addf %387, %390 : vector<15x96xf32>
    %392 = vector.extract_strided_slice %391 {offsets = [0, 0], sizes = [15, 32], strides = [1, 1]} : vector<15x96xf32> to vector<15x32xf32>
    %cst_245 = arith.constant 0.353553385 : f32
    %393 = vector.broadcast %cst_245 : f32 to vector<15x32xf32>
    %394 = arith.mulf %392, %393 : vector<15x32xf32>
    %395 = vector.extract_strided_slice %391 {offsets = [0, 32], sizes = [15, 32], strides = [1, 1]} : vector<15x96xf32> to vector<15x32xf32>
    %396 = vector.extract_strided_slice %391 {offsets = [0, 64], sizes = [15, 32], strides = [1, 1]} : vector<15x96xf32> to vector<15x32xf32>
    %cst_246 = arith.constant 0.000000e+00 : f32
    %397 = vector.broadcast %cst_246 : f32 to vector<15x32xf32>
    %c1_247 = arith.constant 1 : index
    %c0_248 = arith.constant 0 : index
    %c0_249 = arith.constant 0 : index
    %398 = vector.load %arg17[%c1_247, %c0_248, %c0_249] : memref<2x1x32xf32, #tpu.memory_space<vmem>>, vector<1x1x32xf32>
    %399 = vector.shape_cast %398 : vector<1x1x32xf32> to vector<1x32xf32>
    %400 = vector.broadcast %399 : vector<1x32xf32> to vector<15x32xf32>
    %401 = arith.addf %397, %400 : vector<15x32xf32>
    %402 = vector.extract_strided_slice %394 {offsets = [0, 0], sizes = [15, 8], strides = [1, 1]} : vector<15x32xf32> to vector<15x8xf32>
    %403 = vector.extract_strided_slice %395 {offsets = [0, 0], sizes = [15, 8], strides = [1, 1]} : vector<15x32xf32> to vector<15x8xf32>
    %404 = vector.extract_strided_slice %396 {offsets = [0, 0], sizes = [15, 8], strides = [1, 1]} : vector<15x32xf32> to vector<15x8xf32>
    %cst_250 = arith.constant dense<0.000000e+00> : vector<15x15xf32>
    %405 = tpu.matmul %402, %403, %cst_250 {dimension_numbers = #tpu.dot_dimension_numbers<[1], [1], [0], [0], [0, 0, 1, 0], [], []>} : vector<15x8xf32>, vector<15x8xf32>, vector<15x15xf32> -> vector<15x15xf32>
    %cst_251 = arith.constant dense<0xFF800000> : vector<15xf32>
    %406 = vector.multi_reduction <maximumf>, %405, %cst_251 [1] : vector<15x15xf32> to vector<15xf32>
    %407 = vector.shape_cast %406 : vector<15xf32> to vector<15x1xf32>
    %408 = vector.broadcast %407 : vector<15x1xf32> to vector<15x15xf32>
    %409 = arith.subf %405, %408 : vector<15x15xf32>
    %410 = math.exp %409 : vector<15x15xf32>
    %cst_252 = arith.constant dense<0.000000e+00> : vector<15xf32>
    %411 = vector.multi_reduction <add>, %410, %cst_252 [1] : vector<15x15xf32> to vector<15xf32>
    %412 = vector.shape_cast %411 : vector<15xf32> to vector<15x1xf32>
    %413 = tpu.reciprocal %412 {approx = true} : vector<15x1xf32> -> vector<15x1xf32>
    %414 = vector.broadcast %413 : vector<15x1xf32> to vector<15x15xf32>
    %415 = arith.mulf %410, %414 : vector<15x15xf32>
    %cst_253 = arith.constant dense<0.000000e+00> : vector<15x8xf32>
    %416 = tpu.matmul %415, %404, %cst_253 {dimension_numbers = #tpu.dot_dimension_numbers<[1], [0], [0], [1], [0, 0, 1, 1], [], []>} : vector<15x15xf32>, vector<15x8xf32>, vector<15x8xf32> -> vector<15x8xf32>
    %c1_254 = arith.constant 1 : index
    %c0_255 = arith.constant 0 : index
    %c0_256 = arith.constant 0 : index
    %417 = vector.load %arg16[%c1_254, %c0_255, %c0_256] : memref<2x32x32xf32, #tpu.memory_space<vmem>>, vector<1x8x32xf32>
    %418 = vector.shape_cast %417 : vector<1x8x32xf32> to vector<8x32xf32>
    %cst_257 = arith.constant dense<0.000000e+00> : vector<15x32xf32>
    %419 = tpu.matmul %416, %418, %cst_257 {dimension_numbers = #tpu.dot_dimension_numbers<[1], [0], [0], [1], [0, 0, 1, 1], [], []>} : vector<15x8xf32>, vector<8x32xf32>, vector<15x32xf32> -> vector<15x32xf32>
    %420 = arith.addf %401, %419 : vector<15x32xf32>
    %421 = vector.extract_strided_slice %394 {offsets = [0, 8], sizes = [15, 8], strides = [1, 1]} : vector<15x32xf32> to vector<15x8xf32>
    %422 = vector.extract_strided_slice %395 {offsets = [0, 8], sizes = [15, 8], strides = [1, 1]} : vector<15x32xf32> to vector<15x8xf32>
    %423 = vector.extract_strided_slice %396 {offsets = [0, 8], sizes = [15, 8], strides = [1, 1]} : vector<15x32xf32> to vector<15x8xf32>
    %cst_258 = arith.constant dense<0.000000e+00> : vector<15x15xf32>
    %424 = tpu.matmul %421, %422, %cst_258 {dimension_numbers = #tpu.dot_dimension_numbers<[1], [1], [0], [0], [0, 0, 1, 0], [], []>} : vector<15x8xf32>, vector<15x8xf32>, vector<15x15xf32> -> vector<15x15xf32>
    %cst_259 = arith.constant dense<0xFF800000> : vector<15xf32>
    %425 = vector.multi_reduction <maximumf>, %424, %cst_259 [1] : vector<15x15xf32> to vector<15xf32>
    %426 = vector.shape_cast %425 : vector<15xf32> to vector<15x1xf32>
    %427 = vector.broadcast %426 : vector<15x1xf32> to vector<15x15xf32>
    %428 = arith.subf %424, %427 : vector<15x15xf32>
    %429 = math.exp %428 : vector<15x15xf32>
    %cst_260 = arith.constant dense<0.000000e+00> : vector<15xf32>
    %430 = vector.multi_reduction <add>, %429, %cst_260 [1] : vector<15x15xf32> to vector<15xf32>
    %431 = vector.shape_cast %430 : vector<15xf32> to vector<15x1xf32>
    %432 = tpu.reciprocal %431 {approx = true} : vector<15x1xf32> -> vector<15x1xf32>
    %433 = vector.broadcast %432 : vector<15x1xf32> to vector<15x15xf32>
    %434 = arith.mulf %429, %433 : vector<15x15xf32>
    %cst_261 = arith.constant dense<0.000000e+00> : vector<15x8xf32>
    %435 = tpu.matmul %434, %423, %cst_261 {dimension_numbers = #tpu.dot_dimension_numbers<[1], [0], [0], [1], [0, 0, 1, 1], [], []>} : vector<15x15xf32>, vector<15x8xf32>, vector<15x8xf32> -> vector<15x8xf32>
    %c1_262 = arith.constant 1 : index
    %c8_263 = arith.constant 8 : index
    %c0_264 = arith.constant 0 : index
    %436 = vector.load %arg16[%c1_262, %c8_263, %c0_264] : memref<2x32x32xf32, #tpu.memory_space<vmem>>, vector<1x8x32xf32>
    %437 = vector.shape_cast %436 : vector<1x8x32xf32> to vector<8x32xf32>
    %cst_265 = arith.constant dense<0.000000e+00> : vector<15x32xf32>
    %438 = tpu.matmul %435, %437, %cst_265 {dimension_numbers = #tpu.dot_dimension_numbers<[1], [0], [0], [1], [0, 0, 1, 1], [], []>} : vector<15x8xf32>, vector<8x32xf32>, vector<15x32xf32> -> vector<15x32xf32>
    %439 = arith.addf %420, %438 : vector<15x32xf32>
    %440 = vector.extract_strided_slice %394 {offsets = [0, 16], sizes = [15, 8], strides = [1, 1]} : vector<15x32xf32> to vector<15x8xf32>
    %441 = vector.extract_strided_slice %395 {offsets = [0, 16], sizes = [15, 8], strides = [1, 1]} : vector<15x32xf32> to vector<15x8xf32>
    %442 = vector.extract_strided_slice %396 {offsets = [0, 16], sizes = [15, 8], strides = [1, 1]} : vector<15x32xf32> to vector<15x8xf32>
    %cst_266 = arith.constant dense<0.000000e+00> : vector<15x15xf32>
    %443 = tpu.matmul %440, %441, %cst_266 {dimension_numbers = #tpu.dot_dimension_numbers<[1], [1], [0], [0], [0, 0, 1, 0], [], []>} : vector<15x8xf32>, vector<15x8xf32>, vector<15x15xf32> -> vector<15x15xf32>
    %cst_267 = arith.constant dense<0xFF800000> : vector<15xf32>
    %444 = vector.multi_reduction <maximumf>, %443, %cst_267 [1] : vector<15x15xf32> to vector<15xf32>
    %445 = vector.shape_cast %444 : vector<15xf32> to vector<15x1xf32>
    %446 = vector.broadcast %445 : vector<15x1xf32> to vector<15x15xf32>
    %447 = arith.subf %443, %446 : vector<15x15xf32>
    %448 = math.exp %447 : vector<15x15xf32>
    %cst_268 = arith.constant dense<0.000000e+00> : vector<15xf32>
    %449 = vector.multi_reduction <add>, %448, %cst_268 [1] : vector<15x15xf32> to vector<15xf32>
    %450 = vector.shape_cast %449 : vector<15xf32> to vector<15x1xf32>
    %451 = tpu.reciprocal %450 {approx = true} : vector<15x1xf32> -> vector<15x1xf32>
    %452 = vector.broadcast %451 : vector<15x1xf32> to vector<15x15xf32>
    %453 = arith.mulf %448, %452 : vector<15x15xf32>
    %cst_269 = arith.constant dense<0.000000e+00> : vector<15x8xf32>
    %454 = tpu.matmul %453, %442, %cst_269 {dimension_numbers = #tpu.dot_dimension_numbers<[1], [0], [0], [1], [0, 0, 1, 1], [], []>} : vector<15x15xf32>, vector<15x8xf32>, vector<15x8xf32> -> vector<15x8xf32>
    %c1_270 = arith.constant 1 : index
    %c16_271 = arith.constant 16 : index
    %c0_272 = arith.constant 0 : index
    %455 = vector.load %arg16[%c1_270, %c16_271, %c0_272] : memref<2x32x32xf32, #tpu.memory_space<vmem>>, vector<1x8x32xf32>
    %456 = vector.shape_cast %455 : vector<1x8x32xf32> to vector<8x32xf32>
    %cst_273 = arith.constant dense<0.000000e+00> : vector<15x32xf32>
    %457 = tpu.matmul %454, %456, %cst_273 {dimension_numbers = #tpu.dot_dimension_numbers<[1], [0], [0], [1], [0, 0, 1, 1], [], []>} : vector<15x8xf32>, vector<8x32xf32>, vector<15x32xf32> -> vector<15x32xf32>
    %458 = arith.addf %439, %457 : vector<15x32xf32>
    %459 = vector.extract_strided_slice %394 {offsets = [0, 24], sizes = [15, 8], strides = [1, 1]} : vector<15x32xf32> to vector<15x8xf32>
    %460 = vector.extract_strided_slice %395 {offsets = [0, 24], sizes = [15, 8], strides = [1, 1]} : vector<15x32xf32> to vector<15x8xf32>
    %461 = vector.extract_strided_slice %396 {offsets = [0, 24], sizes = [15, 8], strides = [1, 1]} : vector<15x32xf32> to vector<15x8xf32>
    %cst_274 = arith.constant dense<0.000000e+00> : vector<15x15xf32>
    %462 = tpu.matmul %459, %460, %cst_274 {dimension_numbers = #tpu.dot_dimension_numbers<[1], [1], [0], [0], [0, 0, 1, 0], [], []>} : vector<15x8xf32>, vector<15x8xf32>, vector<15x15xf32> -> vector<15x15xf32>
    %cst_275 = arith.constant dense<0xFF800000> : vector<15xf32>
    %463 = vector.multi_reduction <maximumf>, %462, %cst_275 [1] : vector<15x15xf32> to vector<15xf32>
    %464 = vector.shape_cast %463 : vector<15xf32> to vector<15x1xf32>
    %465 = vector.broadcast %464 : vector<15x1xf32> to vector<15x15xf32>
    %466 = arith.subf %462, %465 : vector<15x15xf32>
    %467 = math.exp %466 : vector<15x15xf32>
    %cst_276 = arith.constant dense<0.000000e+00> : vector<15xf32>
    %468 = vector.multi_reduction <add>, %467, %cst_276 [1] : vector<15x15xf32> to vector<15xf32>
    %469 = vector.shape_cast %468 : vector<15xf32> to vector<15x1xf32>
    %470 = tpu.reciprocal %469 {approx = true} : vector<15x1xf32> -> vector<15x1xf32>
    %471 = vector.broadcast %470 : vector<15x1xf32> to vector<15x15xf32>
    %472 = arith.mulf %467, %471 : vector<15x15xf32>
    %cst_277 = arith.constant dense<0.000000e+00> : vector<15x8xf32>
    %473 = tpu.matmul %472, %461, %cst_277 {dimension_numbers = #tpu.dot_dimension_numbers<[1], [0], [0], [1], [0, 0, 1, 1], [], []>} : vector<15x15xf32>, vector<15x8xf32>, vector<15x8xf32> -> vector<15x8xf32>
    %c1_278 = arith.constant 1 : index
    %c24_279 = arith.constant 24 : index
    %c0_280 = arith.constant 0 : index
    %474 = vector.load %arg16[%c1_278, %c24_279, %c0_280] : memref<2x32x32xf32, #tpu.memory_space<vmem>>, vector<1x8x32xf32>
    %475 = vector.shape_cast %474 : vector<1x8x32xf32> to vector<8x32xf32>
    %cst_281 = arith.constant dense<0.000000e+00> : vector<15x32xf32>
    %476 = tpu.matmul %473, %475, %cst_281 {dimension_numbers = #tpu.dot_dimension_numbers<[1], [0], [0], [1], [0, 0, 1, 1], [], []>} : vector<15x8xf32>, vector<8x32xf32>, vector<15x32xf32> -> vector<15x32xf32>
    %477 = arith.addf %458, %476 : vector<15x32xf32>
    %478 = arith.addf %384, %477 : vector<15x32xf32>
    %c1_282 = arith.constant 1 : index
    %c0_283 = arith.constant 0 : index
    %c0_284 = arith.constant 0 : index
    %479 = vector.load %arg18[%c1_282, %c0_283, %c0_284] : memref<2x1x32xf32, #tpu.memory_space<vmem>>, vector<1x1x32xf32>
    %480 = vector.shape_cast %479 : vector<1x1x32xf32> to vector<1x32xf32>
    %c1_285 = arith.constant 1 : index
    %c0_286 = arith.constant 0 : index
    %c0_287 = arith.constant 0 : index
    %481 = vector.load %arg19[%c1_285, %c0_286, %c0_287] : memref<2x1x32xf32, #tpu.memory_space<vmem>>, vector<1x1x32xf32>
    %482 = vector.shape_cast %481 : vector<1x1x32xf32> to vector<1x32xf32>
    %cst_288 = arith.constant dense<0.000000e+00> : vector<15xf32>
    %483 = vector.multi_reduction <add>, %478, %cst_288 [1] : vector<15x32xf32> to vector<15xf32>
    %484 = vector.shape_cast %483 : vector<15xf32> to vector<15x1xf32>
    %cst_289 = arith.constant 3.200000e+01 : f32
    %485 = vector.broadcast %cst_289 : f32 to vector<15x1xf32>
    %486 = arith.divf %484, %485 : vector<15x1xf32>
    %487 = vector.broadcast %486 : vector<15x1xf32> to vector<15x32xf32>
    %488 = arith.subf %478, %487 : vector<15x32xf32>
    %489 = arith.mulf %488, %488 : vector<15x32xf32>
    %cst_290 = arith.constant dense<0.000000e+00> : vector<15xf32>
    %490 = vector.multi_reduction <add>, %489, %cst_290 [1] : vector<15x32xf32> to vector<15xf32>
    %491 = vector.shape_cast %490 : vector<15xf32> to vector<15x1xf32>
    %cst_291 = arith.constant 3.200000e+01 : f32
    %492 = vector.broadcast %cst_291 : f32 to vector<15x1xf32>
    %493 = arith.divf %491, %492 : vector<15x1xf32>
    %494 = vector.broadcast %486 : vector<15x1xf32> to vector<15x32xf32>
    %495 = arith.subf %478, %494 : vector<15x32xf32>
    %cst_292 = arith.constant 9.99999974E-6 : f32
    %496 = vector.broadcast %cst_292 : f32 to vector<15x1xf32>
    %497 = arith.addf %493, %496 : vector<15x1xf32>
    %498 = math.rsqrt %497 : vector<15x1xf32>
    %499 = vector.broadcast %498 : vector<15x1xf32> to vector<15x32xf32>
    %500 = arith.mulf %495, %499 : vector<15x32xf32>
    %501 = vector.broadcast %480 : vector<1x32xf32> to vector<15x32xf32>
    %502 = arith.mulf %500, %501 : vector<15x32xf32>
    %503 = vector.broadcast %482 : vector<1x32xf32> to vector<15x32xf32>
    %504 = arith.addf %502, %503 : vector<15x32xf32>
    %c1_293 = arith.constant 1 : index
    %c0_294 = arith.constant 0 : index
    %c0_295 = arith.constant 0 : index
    %505 = vector.load %arg20[%c1_293, %c0_294, %c0_295] : memref<2x32x64xf32, #tpu.memory_space<vmem>>, vector<1x32x64xf32>
    %506 = vector.shape_cast %505 : vector<1x32x64xf32> to vector<32x64xf32>
    %cst_296 = arith.constant dense<0.000000e+00> : vector<15x64xf32>
    %507 = tpu.matmul %504, %506, %cst_296 {dimension_numbers = #tpu.dot_dimension_numbers<[1], [0], [0], [1], [0, 0, 1, 1], [], []>} : vector<15x32xf32>, vector<32x64xf32>, vector<15x64xf32> -> vector<15x64xf32>
    %c1_297 = arith.constant 1 : index
    %c0_298 = arith.constant 0 : index
    %c0_299 = arith.constant 0 : index
    %508 = vector.load %arg21[%c1_297, %c0_298, %c0_299] : memref<2x1x64xf32, #tpu.memory_space<vmem>>, vector<1x1x64xf32>
    %509 = vector.shape_cast %508 : vector<1x1x64xf32> to vector<1x64xf32>
    %510 = vector.broadcast %509 : vector<1x64xf32> to vector<15x64xf32>
    %511 = arith.addf %507, %510 : vector<15x64xf32>
    %cst_300 = arith.constant 5.000000e-01 : f32
    %512 = vector.broadcast %cst_300 : f32 to vector<15x64xf32>
    %513 = arith.mulf %512, %511 : vector<15x64xf32>
    %cst_301 = arith.constant 4.471500e-02 : f32
    %514 = vector.broadcast %cst_301 : f32 to vector<15x64xf32>
    %515 = arith.mulf %514, %511 : vector<15x64xf32>
    %516 = arith.mulf %515, %511 : vector<15x64xf32>
    %517 = arith.mulf %516, %511 : vector<15x64xf32>
    %518 = arith.addf %511, %517 : vector<15x64xf32>
    %cst_302 = arith.constant 0.797884583 : f32
    %519 = vector.broadcast %cst_302 : f32 to vector<15x64xf32>
    %520 = arith.mulf %519, %518 : vector<15x64xf32>
    %521 = math.tanh %520 : vector<15x64xf32>
    %cst_303 = arith.constant 1.000000e+00 : f32
    %522 = vector.broadcast %cst_303 : f32 to vector<15x64xf32>
    %523 = arith.addf %522, %521 : vector<15x64xf32>
    %524 = arith.mulf %513, %523 : vector<15x64xf32>
    %c1_304 = arith.constant 1 : index
    %c0_305 = arith.constant 0 : index
    %c0_306 = arith.constant 0 : index
    %525 = vector.load %arg22[%c1_304, %c0_305, %c0_306] : memref<2x64x32xf32, #tpu.memory_space<vmem>>, vector<1x64x32xf32>
    %526 = vector.shape_cast %525 : vector<1x64x32xf32> to vector<64x32xf32>
    %cst_307 = arith.constant dense<0.000000e+00> : vector<15x32xf32>
    %527 = tpu.matmul %524, %526, %cst_307 {dimension_numbers = #tpu.dot_dimension_numbers<[1], [0], [0], [1], [0, 0, 1, 1], [], []>} : vector<15x64xf32>, vector<64x32xf32>, vector<15x32xf32> -> vector<15x32xf32>
    %c1_308 = arith.constant 1 : index
    %c0_309 = arith.constant 0 : index
    %c0_310 = arith.constant 0 : index
    %528 = vector.load %arg23[%c1_308, %c0_309, %c0_310] : memref<2x1x32xf32, #tpu.memory_space<vmem>>, vector<1x1x32xf32>
    %529 = vector.shape_cast %528 : vector<1x1x32xf32> to vector<1x32xf32>
    %530 = vector.broadcast %529 : vector<1x32xf32> to vector<15x32xf32>
    %531 = arith.addf %527, %530 : vector<15x32xf32>
    %532 = arith.addf %504, %531 : vector<15x32xf32>
    %c1_311 = arith.constant 1 : index
    %c0_312 = arith.constant 0 : index
    %c0_313 = arith.constant 0 : index
    %533 = vector.load %arg24[%c1_311, %c0_312, %c0_313] : memref<2x1x32xf32, #tpu.memory_space<vmem>>, vector<1x1x32xf32>
    %534 = vector.shape_cast %533 : vector<1x1x32xf32> to vector<1x32xf32>
    %c1_314 = arith.constant 1 : index
    %c0_315 = arith.constant 0 : index
    %c0_316 = arith.constant 0 : index
    %535 = vector.load %arg25[%c1_314, %c0_315, %c0_316] : memref<2x1x32xf32, #tpu.memory_space<vmem>>, vector<1x1x32xf32>
    %536 = vector.shape_cast %535 : vector<1x1x32xf32> to vector<1x32xf32>
    %cst_317 = arith.constant dense<0.000000e+00> : vector<15xf32>
    %537 = vector.multi_reduction <add>, %532, %cst_317 [1] : vector<15x32xf32> to vector<15xf32>
    %538 = vector.shape_cast %537 : vector<15xf32> to vector<15x1xf32>
    %cst_318 = arith.constant 3.200000e+01 : f32
    %539 = vector.broadcast %cst_318 : f32 to vector<15x1xf32>
    %540 = arith.divf %538, %539 : vector<15x1xf32>
    %541 = vector.broadcast %540 : vector<15x1xf32> to vector<15x32xf32>
    %542 = arith.subf %532, %541 : vector<15x32xf32>
    %543 = arith.mulf %542, %542 : vector<15x32xf32>
    %cst_319 = arith.constant dense<0.000000e+00> : vector<15xf32>
    %544 = vector.multi_reduction <add>, %543, %cst_319 [1] : vector<15x32xf32> to vector<15xf32>
    %545 = vector.shape_cast %544 : vector<15xf32> to vector<15x1xf32>
    %cst_320 = arith.constant 3.200000e+01 : f32
    %546 = vector.broadcast %cst_320 : f32 to vector<15x1xf32>
    %547 = arith.divf %545, %546 : vector<15x1xf32>
    %548 = vector.broadcast %540 : vector<15x1xf32> to vector<15x32xf32>
    %549 = arith.subf %532, %548 : vector<15x32xf32>
    %cst_321 = arith.constant 9.99999974E-6 : f32
    %550 = vector.broadcast %cst_321 : f32 to vector<15x1xf32>
    %551 = arith.addf %547, %550 : vector<15x1xf32>
    %552 = math.rsqrt %551 : vector<15x1xf32>
    %553 = vector.broadcast %552 : vector<15x1xf32> to vector<15x32xf32>
    %554 = arith.mulf %549, %553 : vector<15x32xf32>
    %555 = vector.broadcast %534 : vector<1x32xf32> to vector<15x32xf32>
    %556 = arith.mulf %554, %555 : vector<15x32xf32>
    %557 = vector.broadcast %536 : vector<1x32xf32> to vector<15x32xf32>
    %558 = arith.addf %556, %557 : vector<15x32xf32>
    %c0_322 = arith.constant 0 : index
    %c0_323 = arith.constant 0 : index
    %c0_324 = arith.constant 0 : index
    %559 = vector.load %arg26[%c0_322, %c0_323, %c0_324] : memref<1x15x32xf32, #tpu.memory_space<vmem>>, vector<1x15x32xf32>
    %560 = vector.shape_cast %559 : vector<1x15x32xf32> to vector<15x32xf32>
    %561 = vector.shape_cast %558 : vector<15x32xf32> to vector<1x15x32xf32>
    tpu.vector_store %arg26[%c0_322, %c0_323, %c0_324], %561 {strides = array<i32>} : memref<1x15x32xf32, #tpu.memory_space<vmem>>, vector<1x15x32xf32>,
    return
  }
  func.func @transform_0(%arg0: i32) -> (i32, i32, i32) {
    %c0_i32 = arith.constant 0 : i32
    %c0_i32_0 = arith.constant 0 : i32
    %c0_i32_1 = arith.constant 0 : i32
    return %arg0, %c0_i32, %c0_i32_0 : i32, i32, i32
  }
  func.func @transform_1(%arg0: i32) -> (i32, i32) {
    %c0_i32 = arith.constant 0 : i32
    %c0_i32_0 = arith.constant 0 : i32
    %c0_i32_1 = arith.constant 0 : i32
    return %c0_i32, %c0_i32_0 : i32, i32
  }
  func.func @transform_2(%arg0: i32) -> (i32, i32) {
    %c0_i32 = arith.constant 0 : i32
    %c0_i32_0 = arith.constant 0 : i32
    %c0_i32_1 = arith.constant 0 : i32
    return %c0_i32, %c0_i32_0 : i32, i32
  }
  func.func @transform_3(%arg0: i32) -> (i32, i32, i32) {
    %c0_i32 = arith.constant 0 : i32
    %c0_i32_0 = arith.constant 0 : i32
    %c0_i32_1 = arith.constant 0 : i32
    %c0_i32_2 = arith.constant 0 : i32
    return %c0_i32, %c0_i32_0, %c0_i32_1 : i32, i32, i32
  }
  func.func @transform_4(%arg0: i32) -> (i32, i32) {
    %c0_i32 = arith.constant 0 : i32
    %c0_i32_0 = arith.constant 0 : i32
    %c0_i32_1 = arith.constant 0 : i32
    return %c0_i32, %c0_i32_0 : i32, i32
  }
  func.func @transform_5(%arg0: i32) -> (i32, i32) {
    %c0_i32 = arith.constant 0 : i32
    %c0_i32_0 = arith.constant 0 : i32
    %c0_i32_1 = arith.constant 0 : i32
    return %c0_i32, %c0_i32_0 : i32, i32
  }
  func.func @transform_6(%arg0: i32) -> (i32, i32) {
    %c0_i32 = arith.constant 0 : i32
    %c0_i32_0 = arith.constant 0 : i32
    %c0_i32_1 = arith.constant 0 : i32
    return %c0_i32, %c0_i32_0 : i32, i32
  }
  func.func @transform_7(%arg0: i32) -> (i32, i32) {
    %c0_i32 = arith.constant 0 : i32
    %c0_i32_0 = arith.constant 0 : i32
    %c0_i32_1 = arith.constant 0 : i32
    return %c0_i32, %c0_i32_0 : i32, i32
  }
  func.func @transform_8(%arg0: i32) -> (i32, i32) {
    %c0_i32 = arith.constant 0 : i32
    %c0_i32_0 = arith.constant 0 : i32
    %c0_i32_1 = arith.constant 0 : i32
    return %c0_i32, %c0_i32_0 : i32, i32
  }
  func.func @transform_9(%arg0: i32) -> (i32, i32, i32) {
    %c0_i32 = arith.constant 0 : i32
    %c0_i32_0 = arith.constant 0 : i32
    %c0_i32_1 = arith.constant 0 : i32
    %c0_i32_2 = arith.constant 0 : i32
    return %c0_i32, %c0_i32_0, %c0_i32_1 : i32, i32, i32
  }
  func.func @transform_10(%arg0: i32) -> (i32, i32) {
    %c0_i32 = arith.constant 0 : i32
    %c0_i32_0 = arith.constant 0 : i32
    %c0_i32_1 = arith.constant 0 : i32
    return %c0_i32, %c0_i32_0 : i32, i32
  }
  func.func @transform_11(%arg0: i32) -> (i32, i32) {
    %c0_i32 = arith.constant 0 : i32
    %c0_i32_0 = arith.constant 0 : i32
    %c0_i32_1 = arith.constant 0 : i32
    return %c0_i32, %c0_i32_0 : i32, i32
  }
  func.func @transform_12(%arg0: i32) -> (i32, i32) {
    %c0_i32 = arith.constant 0 : i32
    %c0_i32_0 = arith.constant 0 : i32
    %c0_i32_1 = arith.constant 0 : i32
    return %c0_i32, %c0_i32_0 : i32, i32
  }
  func.func @transform_13(%arg0: i32) -> (i32, i32, i32) {
    %c0_i32 = arith.constant 0 : i32
    %c0_i32_0 = arith.constant 0 : i32
    %c0_i32_1 = arith.constant 0 : i32
    %c0_i32_2 = arith.constant 0 : i32
    return %c0_i32, %c0_i32_0, %c0_i32_1 : i32, i32, i32
  }
  func.func @transform_14(%arg0: i32) -> (i32, i32, i32) {
    %c0_i32 = arith.constant 0 : i32
    %c0_i32_0 = arith.constant 0 : i32
    %c0_i32_1 = arith.constant 0 : i32
    %c0_i32_2 = arith.constant 0 : i32
    return %c0_i32, %c0_i32_0, %c0_i32_1 : i32, i32, i32
  }
  func.func @transform_15(%arg0: i32) -> (i32, i32, i32) {
    %c0_i32 = arith.constant 0 : i32
    %c0_i32_0 = arith.constant 0 : i32
    %c0_i32_1 = arith.constant 0 : i32
    %c0_i32_2 = arith.constant 0 : i32
    return %c0_i32, %c0_i32_0, %c0_i32_1 : i32, i32, i32
  }
  func.func @transform_16(%arg0: i32) -> (i32, i32, i32) {
    %c0_i32 = arith.constant 0 : i32
    %c0_i32_0 = arith.constant 0 : i32
    %c0_i32_1 = arith.constant 0 : i32
    %c0_i32_2 = arith.constant 0 : i32
    return %c0_i32, %c0_i32_0, %c0_i32_1 : i32, i32, i32
  }
  func.func @transform_17(%arg0: i32) -> (i32, i32, i32) {
    %c0_i32 = arith.constant 0 : i32
    %c0_i32_0 = arith.constant 0 : i32
    %c0_i32_1 = arith.constant 0 : i32
    %c0_i32_2 = arith.constant 0 : i32
    return %c0_i32, %c0_i32_0, %c0_i32_1 : i32, i32, i32
  }
  func.func @transform_18(%arg0: i32) -> (i32, i32, i32) {
    %c0_i32 = arith.constant 0 : i32
    %c0_i32_0 = arith.constant 0 : i32
    %c0_i32_1 = arith.constant 0 : i32
    %c0_i32_2 = arith.constant 0 : i32
    return %c0_i32, %c0_i32_0, %c0_i32_1 : i32, i32, i32
  }
  func.func @transform_19(%arg0: i32) -> (i32, i32, i32) {
    %c0_i32 = arith.constant 0 : i32
    %c0_i32_0 = arith.constant 0 : i32
    %c0_i32_1 = arith.constant 0 : i32
    %c0_i32_2 = arith.constant 0 : i32
    return %c0_i32, %c0_i32_0, %c0_i32_1 : i32, i32, i32
  }
  func.func @transform_20(%arg0: i32) -> (i32, i32, i32) {
    %c0_i32 = arith.constant 0 : i32
    %c0_i32_0 = arith.constant 0 : i32
    %c0_i32_1 = arith.constant 0 : i32
    %c0_i32_2 = arith.constant 0 : i32
    return %c0_i32, %c0_i32_0, %c0_i32_1 : i32, i32, i32
  }
  func.func @transform_21(%arg0: i32) -> (i32, i32, i32) {
    %c0_i32 = arith.constant 0 : i32
    %c0_i32_0 = arith.constant 0 : i32
    %c0_i32_1 = arith.constant 0 : i32
    %c0_i32_2 = arith.constant 0 : i32
    return %c0_i32, %c0_i32_0, %c0_i32_1 : i32, i32, i32
  }
  func.func @transform_22(%arg0: i32) -> (i32, i32, i32) {
    %c0_i32 = arith.constant 0 : i32
    %c0_i32_0 = arith.constant 0 : i32
    %c0_i32_1 = arith.constant 0 : i32
    %c0_i32_2 = arith.constant 0 : i32
    return %c0_i32, %c0_i32_0, %c0_i32_1 : i32, i32, i32
  }
  func.func @transform_23(%arg0: i32) -> (i32, i32, i32) {
    %c0_i32 = arith.constant 0 : i32
    %c0_i32_0 = arith.constant 0 : i32
    %c0_i32_1 = arith.constant 0 : i32
    %c0_i32_2 = arith.constant 0 : i32
    return %c0_i32, %c0_i32_0, %c0_i32_1 : i32, i32, i32
  }
  func.func @transform_24(%arg0: i32) -> (i32, i32, i32) {
    %c0_i32 = arith.constant 0 : i32
    %c0_i32_0 = arith.constant 0 : i32
    %c0_i32_1 = arith.constant 0 : i32
    %c0_i32_2 = arith.constant 0 : i32
    return %c0_i32, %c0_i32_0, %c0_i32_1 : i32, i32, i32
  }
  func.func @transform_25(%arg0: i32) -> (i32, i32, i32) {
    %c0_i32 = arith.constant 0 : i32
    %c0_i32_0 = arith.constant 0 : i32
    %c0_i32_1 = arith.constant 0 : i32
    return %arg0, %c0_i32, %c0_i32_0 : i32, i32, i32
  }
  func.func @transform_26(%arg0: i32) -> (i32, i32, i32) {
    %c0_i32 = arith.constant 0 : i32
    %c0_i32_0 = arith.constant 0 : i32
    %c0_i32_1 = arith.constant 0 : i32
    return %arg0, %c0_i32, %c0_i32_0 : i32, i32, i32
  }
}

</mosaic_0001>

<bundles_post_ra>
// kernel: _lambda_.1
= control target key start
LH: loop header
LB: loop body
LE: loop exit
PB: predicated region body
PF: predicated region fallthrough
CT: control target
= control target key end

     0   :  { %s7798_s27 = smov 0   ;;  %s8623_s0 = inlined_call_operand.vmem [shape: f32[2,31,12], index: 0, kind: input, shape index: {}]   ;;  %s8624_s1 = inlined_call_operand.vmem [shape: f32[12,16], index: 1, kind: input, shape index: {}]   ;;  %s8625_s2 = inlined_call_operand.vmem [shape: f32[1,16], index: 2, kind: input, shape index: {}]   ;;  %s8626_s3 = inlined_call_operand.vmem [shape: f32[3,16,32], index: 3, kind: input, shape index: {}]   ;;  %s8627_s4 = inlined_call_operand.vmem [shape: f32[1,32], index: 4, kind: input, shape index: {}]   ;;  %s8628_s5 = inlined_call_operand.vmem [shape: f32[1,32], index: 5, kind: input, shape index: {}]   ;;  %s8629_s6 = inlined_call_operand.vmem [shape: f32[1,32], index: 6, kind: input, shape index: {}]   ;;  %s8630_s7 = inlined_call_operand.vmem [shape: f32[32,32], index: 7, kind: input, shape index: {}]   ;;  %s8631_s8 = inlined_call_operand.vmem [shape: f32[1,32], index: 8, kind: input, shape index: {}]   ;;  %s8632_s9 = inlined_call_operand.vmem [shape: f32[16,32,32], index: 9, kind: input, shape index: {}]   ;;  %s8633_s10 = inlined_call_operand.vmem [shape: f32[1,32], index: 10, kind: input, shape index: {}]   ;;  %s8634_s11 = inlined_call_operand.vmem [shape: f32[1,32], index: 11, kind: input, shape index: {}]   ;;  %s8635_s12 = inlined_call_operand.vmem [shape: f32[1,32], index: 12, kind: input, shape index: {}]   ;;  %s8636_s13 = inlined_call_operand.vmem [shape: f32[2,32,96], index: 13, kind: input, shape index: {}]   ;;  %s8637_s14 = inlined_call_operand.vmem [shape: f32[2,1,96], index: 14, kind: input, shape index: {}]   ;;  %s8638_s15 = inlined_call_operand.vmem [shape: f32[2,32,32], index: 15, kind: input, shape index: {}]   ;;  %s8639_s16 = inlined_call_operand.vmem [shape: f32[2,1,32], index: 16, kind: input, shape index: {}]   ;;  %s8640_s17 = inlined_call_operand.vmem [shape: f32[2,1,32], index: 17, kind: input, shape index: {}]   ;;  %s8641_s18 = inlined_call_operand.vmem [shape: f32[2,1,32], index: 18, kind: input, shape index: {}]   ;;  %s8642_s19 = inlined_call_operand.vmem [shape: f32[2,32,64], index: 19, kind: input, shape index: {}]   ;;  %s8643_s20 = inlined_call_operand.vmem [shape: f32[2,1,64], index: 20, kind: input, shape index: {}]   ;;  %s8644_s21 = inlined_call_operand.vmem [shape: f32[2,64,32], index: 21, kind: input, shape index: {}]   ;;  %s8645_s22 = inlined_call_operand.vmem [shape: f32[2,1,32], index: 22, kind: input, shape index: {}]   ;;  %s8646_s23 = inlined_call_operand.vmem [shape: f32[2,1,32], index: 23, kind: input, shape index: {}]   ;;  %s8647_s24 = inlined_call_operand.vmem [shape: f32[2,1,32], index: 24, kind: input, shape index: {}]   ;;  %s8648_s25 = inlined_call_operand.vmem [shape: f32[2,15,32], index: 25, kind: output, shape index: {0}]   ;;  %s8649_s26 = inlined_call_operand.vmem [shape: f32[2,15,32], index: 26, kind: output, shape index: {1}]  }
   0x1   :  { %8670 = sst [smem:[#allocation4_spill]] %s8623_s0 }
   0x2   :  { %8671 = sst [smem:[#allocation5_spill]] %s8624_s1 }
   0x3   :  { %8672 = sst [smem:[#allocation6_spill]] %s8625_s2 }
   0x4   :  { %8673 = sst [smem:[#allocation7_spill]] %s8626_s3 }
   0x5   :  { %8674 = sst [smem:[#allocation8_spill]] %s8627_s4 }
   0x6   :  { %8675 = sst [smem:[#allocation9_spill]] %s8628_s5 }
   0x7   :  { %8676 = sst [smem:[#allocation10_spill]] %s8629_s6 }
   0x8   :  { %8677 = sst [smem:[#allocation11_spill]] %s8630_s7 }
   0x9   :  { %8678 = sst [smem:[#allocation12_spill]] %s8631_s8 }
   0xa   :  { %8679 = sst [smem:[#allocation13_spill]] %s8632_s9 }
   0xb   :  { %8680 = sst [smem:[#allocation14_spill]] %s8633_s10 }
   0xc LB: > { %s6096_s3 = sadd.s32 4294967295, %s7648_s27   ;;  %p6100_p0 = scmp.ge.s32.totalorder %s7648_s27, 1  ;;  %s7648_s27 = sphi %s7798_s27, %s37_s27  }
   0xd   : > { %p715_p1 = scmp.lt.s32.totalorder %s7648_s27, 3 }
   0xf   : > { %p716_p2 = pnand %p6100_p0, %p715_p1 }
  0x10   : > { %s8681_s8 = sld [smem:[#allocation5_spill]] (!%p716_p2)  ;;  %vm831_vm0 = vcmask (!%p716_p2), 1043456   ;;  %vm7650_vm1 = vmmov (!%p716_p2), 1   ;;  %p790_p3 = scmp.lt.s32.totalorder (!%p716_p2), %s6096_s3, 1  ;;  %vm818_vm3 = vcmask (!%p716_p2), 97280   ;;  %vm956_vm4 = vcmask (!%p716_p2), 130048  }
  0x11   : > { %719 = sbr.rel (%p716_p2) target bundleno = 10321 (0x2851), region = 120  ;;  %vm7062_vm2 = vmpackc.low (!%p716_p2), %vm831_vm0, %vm7650_vm1  ;;  %s8682_s2 = sld [smem:[#allocation4_spill]] (!%p716_p2)  ;;  %vm960_vm5 = vcmask (!%p716_p2), 129024   ;;  %vm1253_vm6 = vcmask (!%p716_p2), 261120   ;;  %vm1257_vm7 = vcmask (!%p716_p2), 260096   ;;  %vm3017_vm8 = vcmask (!%p716_p2), 64512  }
  0x12   : > { %s8683_s1 = sld [smem:[#allocation7_spill]] (!%p716_p2)  ;;  %s8687_s9 = sld [smem:[#allocation9_spill]] (!%p716_p2)  ;;  %vm8215_vm9 = vmpackc.low (!%p716_p2), %vm3017_vm8, %vm3017_vm8  ;;  %vm3103_vm10 = vcmask (!%p716_p2), 121856   ;;  %vm3107_vm11 = vcmask (!%p716_p2), 120832   ;;  %vm3138_vm12 = vcmask (!%p716_p2), 1046528   ;;  %vm4326_vm14 = vcmask (!%p716_p2), 523264  }
  0x13   : > { %s8688_s6 = sld [smem:[#allocation10_spill]] (!%p716_p2)  ;;  %s8690_s28 = sld [smem:[#allocation12_spill]] (!%p716_p2)  ;;  %vm8237_vm13 = vmpackc.low (!%p716_p2), %vm3138_vm12, %vm7650_vm1 }
  0x14   : > { %s8691_s7 = sld [smem:[#allocation14_spill]] (!%p716_p2)  ;;  %s8658_s10 = smov (!%p716_p2), 112  }
  0x15   : > { %s8656_s29 = smov (!%p716_p2), 104  }
  0x16   : > { %v809_v0 = vld [vmem:[%s8681_s8] sm:$0xff] (!%p716_p2)  ;;  %v810_v1 = vld [vmem:[%s8681_s8 + $0x8] sm:$0xf] (!%p716_p2) }
  0x17   : > { %v7061_v2 = vpack.c.bf16 (!%p716_p2), %v810_v1, %v809_v0 }
  0x18   : > { %s8709_s3 = smov (!%p790_p3, %s6096_s3), 1  ;;  %v972_v7 = vld [vmem:[%s8683_s1] sm:$0xff]  ;;  %v973_v8 = vld [vmem:[%s8683_s1 + $0x8] sm:$0xff]  ;;  %v6116_v10 = vld [vmem:[%s8683_s1 + $0x10] sm:$0xff] }
  0x19   : > { %7063 = vmatprep.subr.msk.bf16.mxu0 %vm7062_vm2, %v7061_v2  ;;  %s6354_s0 = sshll.u32 %s8709_s3, 5  ;;  %v7067_v9 = vpack.c.bf16 %v973_v8, %v972_v7  ;;  %v6117_v11 = vld [vmem:[%s8683_s1 + $0x18] sm:$0xff]  ;;  %v6120_v58 = vld [vmem:[%s8683_s1 + $0x20] sm:$0xff]  ;;  %v6121_v59 = vld [vmem:[%s8683_s1 + $0x28] sm:$0xff]  ;;  %s8654_s30 = sshll.u32 %s8709_s3, 4 }
  0x1a   : > { %7066 = vmatpush3.bf16.msk.msra.mxu0 %vm7062_vm2, %v7061_v2  ;;  %s794_s5 = scalar_lea.vmem %s8682_s2, %s6354_s0  ;;  %v7831_v12 = vpack.c.bf16 %v6117_v11, %v6116_v10  ;;  %v7075_v61 = vpack.c.bf16 %v6121_v59, %v6120_v58  ;;  %s8685_s0 = sld [smem:[#allocation8_spill]] }
  0x1b   : > { %v805_v3 = vld [vmem:[%s794_s5] sm:$0xff]  ;;  %v806_v4 = vld [vmem:[%s794_s5 + $0x8] sm:$0xff]  ;;  %v807_v5 = vld [vmem:[%s794_s5 + $0x10] sm:$0xff]  ;;  %7068 = vmatprep.subr.bf16.mxu1 %v7067_v9  ;;  %s8686_s2 = sld [smem:[#allocation11_spill]]  ;;  %s804_s4 = scalar_lea.vmem %s8649_s26, %s8654_s30 }
  0x1c   : > { %6613 = vmatprep.mubr.msk.f32.mxu0 %vm818_vm3, %v805_v3  ;;  %v808_v6 = vld [vmem:[%s794_s5 + $0x18] sm:$0x7f]  ;;  %7070 = vmatpush3.bf16.msra.mxu1 %v7067_v9  ;;  %s8684_s5 = sld [smem:[#allocation6_spill]]  ;;  %s8655_s30 = smov 48  }
  0x1d   : > { %6614 = vmatmul.mubr.msk.f32.vlgmr.msra.gmra.mrb[0].mxu0 %vm818_vm3, %v806_v4  ;;  %7072 = vmatprep.subr.bf16.mxu1 %v7831_v12  ;;  %s8698_s1 = smov 64  }
  0x1e   : > { %6616 = vmatprep.mubr.msk.f32.mxu0 %vm818_vm3, %v807_v5 }
  0x20   : > { %v6113_v3 = vld [vmem:[%s8685_s0] ss:$0 sm:$0xff]  ;;  %s8665_s0 = smov 64  }
  0x21   : > { %6617 = vmatmul.mubr.msk.f32.gmra.mrb[2].mxu0 %vm818_vm3, %v808_v6 }
  0x22   : > { %v6107_v13 = vld [vmem:[%s8684_s5] ss:$0 sm:$0xff]  ;;  %s8663_s5 = smov 56  }
  0xf0   : > { %v6615_v14 = vpop.f32.mrb[0].mxu0 }
  0xf1   : > { %v907_v15 = vadd.f32 %v6615_v14, %v6107_v13  ;;  %v901_v16 = vpop.f32.mrb[1].mxu0 }
  0xf2   : > { %v902_v17 = vadd.f32 %v6107_v13, %v901_v16 }
  0xf3   : > { %v925_v18 = vmul.f32 0.044715, %v907_v15  ;;  %v921_v44 = vmul.f32 0.5, %v907_v15 }
  0xf4   : > { %v924_v19 = vmul.f32 0.044715, %v902_v17  ;;  %v6618_v20 = vpop.f32.mrb[2].mxu0  ;;  %v920_v46 = vmul.f32 0.5, %v902_v17 }
  0xf5   : > { %v929_v21 = vmul.f32 %v925_v18, %v907_v15  ;;  %v917_v22 = vadd.f32 %v6618_v20, %v6107_v13  ;;  %v911_v23 = vpop.f32.mrb[3].mxu0 }
  0xf6   : > { %v928_v24 = vmul.f32 %v924_v19, %v902_v17  ;;  %v912_v25 = vadd.f32 %v6107_v13, %v911_v23 }
  0xf7   : > { %v933_v26 = vmul.f32 %v929_v21, %v907_v15  ;;  %v927_v27 = vmul.f32 0.044715, %v917_v22  ;;  %v923_v52 = vmul.f32 0.5, %v917_v22 }
  0xf8   : > { %v932_v28 = vmul.f32 %v928_v24, %v902_v17  ;;  %v926_v29 = vmul.f32 0.044715, %v912_v25  ;;  %v922_v54 = vmul.f32 0.5, %v912_v25 }
  0xf9   : > { %v937_v30 = vadd.f32 %v933_v26, %v907_v15  ;;  %v931_v31 = vmul.f32 %v927_v27, %v917_v22 }
  0xfa   : > { %v936_v32 = vadd.f32 %v932_v28, %v902_v17  ;;  %v930_v33 = vmul.f32 %v926_v29, %v912_v25 }
  0xfb   : > { %v941_v34 = vmul.f32 0.7978846, %v937_v30  ;;  %v935_v35 = vmul.f32 %v931_v31, %v917_v22 }
  0xfc   : > { %v940_v36 = vmul.f32 0.7978846, %v936_v32  ;;  %v934_v37 = vmul.f32 %v930_v33, %v912_v25 }
  0xfd   : > { %7530 = vtanh.f32 %v941_v34  ;;  %v939_v38 = vadd.f32 %v935_v35, %v917_v22 }
  0xfe   : > { %7532 = vtanh.f32 %v940_v36  ;;  %v938_v39 = vadd.f32 %v934_v37, %v912_v25 }
  0xff   : > { %v943_v40 = vmul.f32 0.7978846, %v939_v38  ;;  %v1300_v38 = vld [vmem:[%s8686_s2] sm:$0xff] }
 0x100   : > { %v942_v41 = vmul.f32 0.7978846, %v938_v39  ;;  %v1301_v39 = vld [vmem:[%s8686_s2 + $0x8] sm:$0xff] }
 0x101   : > { %7534 = vtanh.f32 %v943_v40  ;;  %v7079_v40 = vpack.c.bf16 %v1301_v39, %v1300_v38 }
 0x102   : > { %7536 = vtanh.f32 %v942_v41  ;;  %v1302_v41 = vld [vmem:[%s8686_s2 + $0x10] sm:$0xff] }
 0x103   : > { %7080 = vmatprep.subr.bf16.mxu0 %v7079_v40 }
 0x104   : > { %7082 = vmatpush3.bf16.msra.mxu0 %v7079_v40 }
 0x107   : > { %v7531_v42 = vpop.eup %7530 }
 0x108   : > { %v7533_v43 = vpop.eup %7532  ;;  %v949_v45 = vadd.f32 1.0, %v7531_v42  ;;  %v1303_v42 = vld [vmem:[%s8686_s2 + $0x18] sm:$0xff] }
 0x109   : > { %v948_v47 = vadd.f32 1.0, %v7533_v43  ;;  %v7083_v43 = vpack.c.bf16 %v1303_v42, %v1302_v41 }
 0x10a   : > { %v953_v48 = vmul.f32 %v949_v45, %v921_v44 }
 0x10b   : > { %v7535_v49 = vpop.eup %7534  ;;  %v952_v50 = vmul.f32 %v948_v47, %v920_v46  ;;  %7084 = vmatprep.subr.bf16.mxu0 %v7083_v43 }
 0x10c   : > { %v7537_v51 = vpop.eup %7536  ;;  %958 = vst.msk [vmem:[#allocation2 + $0x8] sm:$0xff] %vm956_vm4, %v953_v48  ;;  %v951_v53 = vadd.f32 1.0, %v7535_v49  ;;  %7086 = vmatpush3.bf16.msra.mxu0 %v7083_v43 }
 0x10d   : > { %957 = vst.msk [vmem:[#allocation2] sm:$0xff] %vm956_vm4, %v952_v50  ;;  %v950_v55 = vadd.f32 1.0, %v7537_v51  ;;  %v6124_v51 = vld [vmem:[%s8687_s9] ss:$0 sm:$0xff]  ;;  %s8689_s9 = sld [smem:[#allocation13_spill]] }
 0x10e   : > { %v955_v56 = vmul.f32 %v951_v53, %v923_v52  ;;  %v6125_v53 = vld [vmem:[%s8688_s6] ss:$0 sm:$0xff]  ;;  %s8668_s6 = smov 96  }
 0x10f   : > { %v954_v57 = vmul.f32 %v950_v55, %v922_v54 }
 0x110   : > { %961 = vst.msk [vmem:[#allocation2 + $0x18] sm:$0x7f] %vm960_vm5, %v955_v56 }
 0x111   : > { %959 = vst.msk [vmem:[#allocation2 + $0x10] sm:$0xff] %vm956_vm4, %v954_v57 }
 0x113   : > { %v971_v62 = vld [vmem:[#allocation2 + $0x8] sm:$0x7f]  ;;  %v6156_v40 = vld [vmem:[%s8689_s9 + $0xa0] sm:$0xff] }
 0x114   : > { %v970_v60 = vld [vmem:[#allocation2] sm:$0xff]  ;;  %v1146_v2 = vld [vmem:[#allocation2 + $0x9] sm:$0x7f] }
 0x115   : > { %6623 = vmatprep.mubr.msk.f32.mxu1 %vm956_vm4, %v970_v60  ;;  %v1145_v1 = vld [vmem:[#allocation2 + $0x1] sm:$0xff] }
 0x116   : > { %6624 = vmatmul.mubr.msk.f32.vlgmr.msra.gmra.mrb[0].mxu1 %vm956_vm4, %v971_v62  ;;  %v1408_v60 = vld [vmem:[%s8689_s9] sm:$0xff]  ;;  %v7651_v62 = vmov 0.0   ;;  %v6157_v41 = vld [vmem:[%s8689_s9 + $0xa8] sm:$0xff] }
 0x117   : > { %7074 = vmatpush3.bf16.msra.mxu1 %v7831_v12  ;;  %v1058_v0 = vld [vmem:[#allocation2 + $0x18] sm:$0x7f]  ;;  %1392 = vst.msk [vmem:[#allocation3] sm:$0xff] %vm1253_vm6, %v7651_v62  ;;  %1394 = vst.msk [vmem:[#allocation3 + $0x10] sm:$0xff] %vm1253_vm6, %v7651_v62  ;;  %v7127_v43 = vpack.c.bf16 %v6157_v41, %v6156_v40  ;;  %v6206_v41 = vld [vmem:[%s8689_s9 + $0x1b0] sm:$0xff] }
 0x118   : > { %v1057_v63 = vld [vmem:[#allocation2 + $0x10] sm:$0xff]  ;;  %7076 = vmatprep.subr.bf16.mxu1 %v7075_v61  ;;  %1395 = vst.msk [vmem:[#allocation3 + $0x18] sm:$0x7f] %vm1257_vm7, %v7651_v62 }
 0x119   : > { %6630 = vmatprep.mubr.msk.f32.mxu1 %vm956_vm4, %v1057_v63  ;;  %1393 = vst.msk [vmem:[#allocation3 + $0x8] sm:$0xff] %vm1253_vm6, %v7651_v62 }
 0x11e   : > { %6631 = vmatmul.mubr.msk.f32.vlgmr.msra.gmra.mrb[0].mxu1 %vm956_vm4, %v1058_v0  ;;  %v1410_v0 = vld [vmem:[%s8689_s9 + $0x10] sm:$0xff] }
 0x11f   : > { %7078 = vmatpush3.bf16.msra.mxu1 %v7075_v61  ;;  %6637 = vmatprep.mubr.msk.f32.mxu1 %vm956_vm4, %v1145_v1  ;;  %v1409_v61 = vld [vmem:[%s8689_s9 + $0x8] sm:$0xff]  ;;  %v1411_v1 = vld [vmem:[%s8689_s9 + $0x18] sm:$0xff] }
 0x120   : > { %v7087_v63 = vpack.c.bf16 %v1409_v61, %v1408_v60  ;;  %v6170_v60 = vld [vmem:[%s8689_s9 + $0xf0] sm:$0xff]  ;;  %v6171_v61 = vld [vmem:[%s8689_s9 + $0xf8] sm:$0xff] }
 0x121   : > { %v7147_v62 = vpack.c.bf16 %v6171_v61, %v6170_v60  ;;  %v6129_v60 = vld [vmem:[%s8691_s7] ss:$0 sm:$0xff]  ;;  %s8664_s7 = smov 88  }
 0x122   : > { %7088 = vmatprep.subr.bf16.mxu0 %v7087_v63 }
 0x126   : > { %6638 = vmatmul.mubr.msk.f32.vlgmr.msra.gmra.mrb[0].mxu1 %vm956_vm4, %v1146_v2  ;;  %v6132_v2 = vld [vmem:[%s8689_s9 + $0x20] sm:$0xff] }
 0x1f9   : > { %v6639_v4 = vpop.f32.mrb[0].mxu1 }
 0x1fa   : > { %v7375_v5 = vadd.f32 %v6639_v4, %v6113_v3  ;;  %v1222_v6 = vpop.f32.mrb[1].mxu1  ;;  %v6133_v4 = vld [vmem:[%s8689_s9 + $0x28] sm:$0xff] }
 0x1fb   : > { %v7376_v7 = vadd.f32 %v6113_v3, %v1222_v6  ;;  %v7091_v3 = vpack.c.bf16 %v1411_v1, %v1410_v0  ;;  %v1406_v6 = vld [vmem:[#allocation3] sm:$0xff]  ;;  %v6175_v1 = vld [vmem:[%s8689_s9 + $0x108] sm:$0xff] }
 0x1fc   : > { %v1236_v8 = vmul.f32 0.044715, %v7375_v5  ;;  %v1234_v24 = vmul.f32 0.5, %v7375_v5  ;;  %v6174_v0 = vld [vmem:[%s8689_s9 + $0x100] sm:$0xff] }
 0x1fd   : > { %v1235_v9 = vmul.f32 0.044715, %v7376_v7  ;;  %v1233_v20 = vmul.f32 0.5, %v7376_v7 }
 0x1fe   : > { %v1238_v10 = vmul.f32 %v7375_v5, %v1236_v8 }
 0x1ff   : > { %v1237_v11 = vmul.f32 %v7376_v7, %v1235_v9 }
 0x200   : > { %v1240_v12 = vmul.f32 %v7375_v5, %v1238_v10 }
 0x201   : > { %v1239_v13 = vmul.f32 %v7376_v7, %v1237_v11 }
 0x202   : > { %v1242_v14 = vadd.f32 %v7375_v5, %v1240_v12  ;;  %v7095_v5 = vpack.c.bf16 %v6133_v4, %v6132_v2  ;;  %v6134_v12 = vld [vmem:[%s8689_s9 + $0x30] sm:$0xff] }
 0x203   : > { %v1241_v15 = vadd.f32 %v7376_v7, %v1239_v13  ;;  %v6126_v7 = vld [vmem:[%s8690_s28] ss:$0 sm:$0xff]  ;;  %v6135_v13 = vld [vmem:[%s8689_s9 + $0x38] sm:$0xff]  ;;  %v6176_v4 = vld [vmem:[%s8689_s9 + $0x110] sm:$0xff]  ;;  %s8666_s28 = smov 120  }
 0x204   : > { %v1244_v16 = vmul.f32 0.7978846, %v1242_v14  ;;  %v7099_v14 = vpack.c.bf16 %v6135_v13, %v6134_v12  ;;  %v6182_v13 = vld [vmem:[%s8689_s9 + $0x130] sm:$0xff] }
 0x205   : > { %v1243_v17 = vmul.f32 0.7978846, %v1241_v15  ;;  %v6138_v15 = vld [vmem:[%s8689_s9 + $0x40] sm:$0xff] }
 0x206   : > { %7538 = vtanh.f32 %v1244_v16 }
 0x207   : > { %7540 = vtanh.f32 %v1243_v17 }
 0x210   : > { %v7539_v18 = vpop.eup %7538 }
 0x211   : > { %v7541_v19 = vpop.eup %7540  ;;  %v1248_v22 = vadd.f32 1.0, %v7539_v18  ;;  %v6139_v18 = vld [vmem:[%s8689_s9 + $0x48] sm:$0xff] }
 0x212   : > { %v1247_v21 = vadd.f32 1.0, %v7541_v19  ;;  %v7103_v19 = vpack.c.bf16 %v6139_v18, %v6138_v15  ;;  %v6186_v18 = vld [vmem:[%s8689_s9 + $0x140] sm:$0xff] }
 0x213   : > { %v1250_v26 = vmul.f32 %v1248_v22, %v1234_v24  ;;  %v6144_v24 = vld [vmem:[%s8689_s9 + $0x60] sm:$0xff] }
 0x214   : > { %v1249_v23 = vmul.f32 %v1247_v21, %v1233_v20  ;;  %v6140_v20 = vld [vmem:[%s8689_s9 + $0x50] sm:$0xff]  ;;  %v6141_v21 = vld [vmem:[%s8689_s9 + $0x58] sm:$0xff] }
 0x215   : > { %v1258_v27 = vsel %vm1257_vm7, %v1250_v26, 0.0  ;;  %v7107_v22 = vpack.c.bf16 %v6141_v21, %v6140_v20  ;;  %v6188_v20 = vld [vmem:[%s8689_s9 + $0x150] sm:$0xff]  ;;  %v6189_v21 = vld [vmem:[%s8689_s9 + $0x158] sm:$0xff] }
 0x216   : > { %v1254_v25 = vsel %vm1253_vm6, %v1249_v23, 0.0 }
 0x217   : > { %1255 = vadd.xlane.f32.xlu0 %v1254_v25  ;;  %v6145_v25 = vld [vmem:[%s8689_s9 + $0x68] sm:$0xff] }
 0x21b   : > { %1259 = vadd.xlane.f32.xlu0 %v1258_v27  ;;  %v7111_v27 = vpack.c.bf16 %v6145_v25, %v6144_v24  ;;  %v6192_v25 = vld [vmem:[%s8689_s9 + $0x160] sm:$0xff] }
 0x2a4   : > { %v1256_v28 = vpop.xlane.xlu0 %1255 }
 0x2a5   : > { %v1262_v29 = vmul.f32 0.03125, %v1256_v28  ;;  %v6146_v28 = vld [vmem:[%s8689_s9 + $0x70] sm:$0xff] }
 0x2a7   : > { %v1264_v30 = vsub.f32 %v1249_v23, %v1262_v29  ;;  %v6147_v29 = vld [vmem:[%s8689_s9 + $0x78] sm:$0xff] }
 0x2a8   : > { %v1260_v31 = vpop.xlane.xlu0 %1259 }
 0x2a9   : > { %v1263_v32 = vmul.f32 0.03125, %v1260_v31  ;;  %v1266_v33 = vmul.f32 %v1264_v30, %v1264_v30 }
 0x2ab   : > { %v1265_v34 = vsub.f32 %v1250_v26, %v1263_v32  ;;  %v1268_v35 = vsel %vm1253_vm6, %v1266_v33, 0.0  ;;  %v6150_v32 = vld [vmem:[%s8689_s9 + $0x80] sm:$0xff]  ;;  %v6151_v33 = vld [vmem:[%s8689_s9 + $0x88] sm:$0xff] }
 0x2ac   : > { %1269 = vadd.xlane.f32.xlu1 %v1268_v35  ;;  %v7119_v35 = vpack.c.bf16 %v6151_v33, %v6150_v32  ;;  %v6198_v32 = vld [vmem:[%s8689_s9 + $0x180] sm:$0xff] }
 0x2ad   : > { %v1267_v36 = vmul.f32 %v1265_v34, %v1265_v34 }
 0x2af   : > { %v1271_v37 = vsel %vm1257_vm7, %v1267_v36, 0.0  ;;  %v6152_v36 = vld [vmem:[%s8689_s9 + $0x90] sm:$0xff] }
 0x2b0   : > { %1272 = vadd.xlane.f32.xlu1 %v1271_v37  ;;  %v6153_v37 = vld [vmem:[%s8689_s9 + $0x98] sm:$0xff] }
 0x2b1   : > { %v7123_v38 = vpack.c.bf16 %v6153_v37, %v6152_v36 }
 0x339   : > { %v1270_v44 = vpop.xlane.xlu1 %1269 }
 0x33a   : > { %v1274_v45 = vmul.f32 0.03125, %v1270_v44  ;;  %v6158_v44 = vld [vmem:[%s8689_s9 + $0xb0] sm:$0xff] }
 0x33c   : > { %v1276_v46 = vadd.f32 1e-05, %v1274_v45  ;;  %v6159_v45 = vld [vmem:[%s8689_s9 + $0xb8] sm:$0xff] }
 0x33d   : > { %v1273_v47 = vpop.xlane.xlu1 %1272 }
 0x33e   : > { %7542 = vrsqrt.f32 %v1276_v46  ;;  %v1275_v48 = vmul.f32 0.03125, %v1273_v47  ;;  %v7131_v46 = vpack.c.bf16 %v6159_v45, %v6158_v44  ;;  %v6210_v45 = vld [vmem:[%s8689_s9 + $0x1c0] sm:$0xff] }
 0x340   : > { %v1277_v49 = vadd.f32 1e-05, %v1275_v48  ;;  %v6162_v48 = vld [vmem:[%s8689_s9 + $0xc0] sm:$0xff] }
 0x342   : > { %7544 = vrsqrt.f32 %v1277_v49  ;;  %v6163_v49 = vld [vmem:[%s8689_s9 + $0xc8] sm:$0xff] }
 0x348   : > { %v7543_v50 = vpop.eup %7542 }
 0x349   : > { %v1280_v52 = vmul.f32 %v7543_v50, %v1264_v30  ;;  %v7115_v30 = vpack.c.bf16 %v6147_v29, %v6146_v28  ;;  %v6195_v28 = vld [vmem:[%s8689_s9 + $0x178] sm:$0xff] }
 0x34b   : > { %v1288_v54 = vmul.f32 %v6124_v51, %v1280_v52  ;;  %v6164_v52 = vld [vmem:[%s8689_s9 + $0xd0] sm:$0xff] }
 0x34c   : > { %v7545_v55 = vpop.eup %7544 }
 0x34d   : > { %v1281_v56 = vmul.f32 %v7545_v55, %v1265_v34  ;;  %v1296_v57 = vadd.f32 %v6125_v53, %v1288_v54 }
 0x34f   : > { %v1289_v58 = vmul.f32 %v6124_v51, %v1281_v56  ;;  %1298 = vst.msk [vmem:[%s804_s4] sm:$0xff] %vm1253_vm6, %v1296_v57  ;;  %6648 = vmatprep.mubr.msk.f32.mxu0 %vm1253_vm6, %v1296_v57  ;;  %v7135_v51 = vpack.c.bf16 %v6163_v49, %v6162_v48  ;;  %v6168_v56 = vld [vmem:[%s8689_s9 + $0xe0] sm:$0xff]  ;;  %v6169_v57 = vld [vmem:[%s8689_s9 + $0xe8] sm:$0xff]  ;;  %v6212_v48 = vld [vmem:[%s8689_s9 + $0x1d0] sm:$0xff] }
 0x350   : > { %v6213_v49 = vld [vmem:[%s8689_s9 + $0x1d8] sm:$0xff] }
 0x351   : > { %v1297_v59 = vadd.f32 %v6125_v53, %v1289_v58  ;;  %v6165_v53 = vld [vmem:[%s8689_s9 + $0xd8] sm:$0xff] }
 0x352   : > { %v7139_v54 = vpack.c.bf16 %v6165_v53, %v6164_v52  ;;  %v6216_v52 = vld [vmem:[%s8689_s9 + $0x1e0] sm:$0xff]  ;;  %v6217_v53 = vld [vmem:[%s8689_s9 + $0x1e8] sm:$0xff] }
 0x353   : > { %1299 = vst.msk [vmem:[%s804_s4 + $0x8] sm:$0x7f] %vm1257_vm7, %v1297_v59  ;;  %6649 = vmatmul.mubr.msk.f32.vlgmr.msra.gmra.mrb[4].mxu0 %vm1253_vm6, %v1297_v59  ;;  %v7143_v59 = vpack.c.bf16 %v6169_v57, %v6168_v56  ;;  %v6219_v56 = vld [vmem:[%s8689_s9 + $0x1f8] sm:$0xff]  ;;  %s8662_s4 = smov 80  }
 0x354   : > { %7090 = vmatpush3.bf16.msra.mxu0 %v7087_v63  ;;  %6659 = vmatprep.mubr.msk.f32.mxu0 %vm1253_vm6, %v1406_v6 }
 0x355   : > { %7092 = vmatprep.subr.bf16.mxu0 %v7091_v3 }
 0x358   : > { %7094 = vmatpush3.bf16.msra.mxu0 %v7091_v3  ;;  %v7151_v3 = vpack.c.bf16 %v6175_v1, %v6174_v0 }
 0x359   : > { %7096 = vmatprep.subr.bf16.mxu0 %v7095_v5 }
 0x426   : > { %v6650_v8 = vpop.f32.mrb[4].mxu0 }
 0x427   : > { %v7914_v9 = vadd.f32 %v6650_v8, %v6126_v7  ;;  %v1383_v10 = vpop.f32.mrb[5].mxu0  ;;  %v6180_v8 = vld [vmem:[%s8689_s9 + $0x120] sm:$0xff] }
 0x428   : > { %v7916_v11 = vadd.f32 %v6126_v7, %v1383_v10  ;;  %v6181_v10 = vld [vmem:[%s8689_s9 + $0x128] sm:$0xff] }
 0x429   : > { %1397 = vst.msk [vmem:[#allocation3 + $0x10] sm:$0x7f] %vm1257_vm7, %v7914_v9  ;;  %v7159_v12 = vpack.c.bf16 %v6181_v10, %v6180_v8 }
 0x42a   : > { %1396 = vst.msk [vmem:[#allocation3 + $0x8] sm:$0xff] %vm1253_vm6, %v7916_v11 }
 0x430   : > { %v2216_v24 = vld [vmem:[#allocation3 + $0x11] sm:$0xff] }
 0x431   : > { %v7931_v16 = vld [vmem:[#allocation3 + $0x8] sm:$0xff]  ;;  %v2396_v37 = vld [vmem:[#allocation3 + $0x13] sm:$0xff] }
 0x432   : > { %v1495_v17 = vld [vmem:[#allocation3 + $0x1] sm:$0xff]  ;;  %6660 = vmatmul.mubr.msk.f32.vlgmr.msra.gmra.mrb[6].mxu0 %vm1253_vm6, %v7931_v16  ;;  %v7945_v23 = vld [vmem:[#allocation3 + $0x9] sm:$0xff]  ;;  %v2486_v44 = vld [vmem:[#allocation3 + $0x14] sm:$0xff] }
 0x433   : > { %7098 = vmatpush3.bf16.msra.mxu0 %v7095_v5  ;;  %6670 = vmatprep.mubr.msk.f32.mxu0 %vm1253_vm6, %v1495_v17  ;;  %v1585_v26 = vld [vmem:[#allocation3 + $0x2] sm:$0xff]  ;;  %v7962_v31 = vld [vmem:[#allocation3 + $0xa] sm:$0xff]  ;;  %v6177_v5 = vld [vmem:[%s8689_s9 + $0x118] sm:$0xff] }
 0x434   : > { %7100 = vmatprep.subr.bf16.mxu0 %v7099_v14  ;;  %v1675_v34 = vld [vmem:[#allocation3 + $0x3] sm:$0xff]  ;;  %v7979_v39 = vld [vmem:[#allocation3 + $0xb] sm:$0xff]  ;;  %v7155_v6 = vpack.c.bf16 %v6177_v5, %v6176_v4 }
 0x435   : > { %v1765_v42 = vld [vmem:[#allocation3 + $0x4] sm:$0xff]  ;;  %v7996_v47 = vld [vmem:[#allocation3 + $0xc] sm:$0xff] }
 0x436   : > { %v1855_v50 = vld [vmem:[#allocation3 + $0x5] sm:$0xff]  ;;  %v8013_v55 = vld [vmem:[#allocation3 + $0xd] sm:$0xff] }
 0x437   : > { %7102 = vmatpush3.bf16.msra.mxu0 %v7099_v14  ;;  %v1945_v58 = vld [vmem:[#allocation3 + $0x6] sm:$0xff]  ;;  %v8030_v63 = vld [vmem:[#allocation3 + $0xe] sm:$0xff]  ;;  %v6183_v14 = vld [vmem:[%s8689_s9 + $0x138] sm:$0xff] }
 0x438   : > { %7104 = vmatprep.subr.bf16.mxu0 %v7103_v19  ;;  %v2035_v2 = vld [vmem:[#allocation3 + $0x7] sm:$0xff]  ;;  %v8047_v7 = vld [vmem:[#allocation3 + $0xf] sm:$0xff]  ;;  %v7163_v15 = vpack.c.bf16 %v6183_v14, %v6182_v13 }
 0x439   : > { %v2126_v17 = vld [vmem:[#allocation3 + $0x10] sm:$0xff] }
 0x43a   : > { %6671 = vmatmul.mubr.msk.f32.vlgmr.msra.gmra.mrb[6].mxu0 %vm1253_vm6, %v7945_v23 }
 0x43b   : > { %7106 = vmatpush3.bf16.msra.mxu0 %v7103_v19  ;;  %6681 = vmatprep.mubr.msk.f32.mxu0 %vm1253_vm6, %v1585_v26 }
 0x43c   : > { %7108 = vmatprep.subr.bf16.mxu0 %v7107_v22 }
 0x43f   : > { %7110 = vmatpush3.bf16.msra.mxu0 %v7107_v22  ;;  %v7171_v22 = vpack.c.bf16 %v6189_v21, %v6188_v20 }
 0x440   : > { %7112 = vmatprep.subr.bf16.mxu0 %v7111_v27 }
 0x442   : > { %6682 = vmatmul.mubr.msk.f32.vlgmr.msra.gmra.mrb[6].mxu0 %vm1253_vm6, %v7962_v31 }
 0x443   : > { %7114 = vmatpush3.bf16.msra.mxu0 %v7111_v27  ;;  %6692 = vmatprep.mubr.msk.f32.mxu0 %vm1253_vm6, %v1675_v34  ;;  %v6194_v27 = vld [vmem:[%s8689_s9 + $0x170] sm:$0xff] }
 0x444   : > { %7116 = vmatprep.subr.bf16.mxu0 %v7115_v30  ;;  %v7179_v29 = vpack.c.bf16 %v6195_v28, %v6194_v27  ;;  %v6200_v34 = vld [vmem:[%s8689_s9 + $0x190] sm:$0xff] }
 0x447   : > { %7118 = vmatpush3.bf16.msra.mxu0 %v7115_v30  ;;  %v2306_v30 = vld [vmem:[#allocation3 + $0x12] sm:$0xff] }
 0x448   : > { %7120 = vmatprep.subr.bf16.mxu0 %v7119_v35 }
 0x44a   : > { %6693 = vmatmul.mubr.msk.f32.vlgmr.msra.gmra.mrb[6].mxu0 %vm1253_vm6, %v7979_v39 }
 0x44b   : > { %7122 = vmatpush3.bf16.msra.mxu0 %v7119_v35  ;;  %6703 = vmatprep.mubr.msk.f32.mxu0 %vm1253_vm6, %v1765_v42  ;;  %v6201_v35 = vld [vmem:[%s8689_s9 + $0x198] sm:$0xff] }
 0x44c   : > { %7124 = vmatprep.subr.bf16.mxu0 %v7123_v38  ;;  %v7187_v36 = vpack.c.bf16 %v6201_v35, %v6200_v34  ;;  %v6207_v42 = vld [vmem:[%s8689_s9 + $0x1b8] sm:$0xff]  ;;  %v2910_v34 = vld [vmem:[%s8636_s13 + $0x8] sm:$0xff]  ;;  %v2911_v35 = vld [vmem:[%s8636_s13 + $0x10] sm:$0xff] }
 0x44f   : > { %7126 = vmatpush3.bf16.msra.mxu0 %v7123_v38  ;;  %v6204_v38 = vld [vmem:[%s8689_s9 + $0x1a0] sm:$0xff] }
 0x450   : > { %7128 = vmatprep.subr.bf16.mxu0 %v7127_v43 }
 0x452   : > { %6704 = vmatmul.mubr.msk.f32.vlgmr.msra.gmra.mrb[6].mxu0 %vm1253_vm6, %v7996_v47 }
 0x453   : > { %7130 = vmatpush3.bf16.msra.mxu0 %v7127_v43  ;;  %6714 = vmatprep.mubr.msk.f32.mxu0 %vm1253_vm6, %v1855_v50  ;;  %v7195_v43 = vpack.c.bf16 %v6207_v42, %v6206_v41  ;;  %v7203_v50 = vpack.c.bf16 %v6213_v49, %v6212_v48 }
 0x454   : > { %7132 = vmatprep.subr.bf16.mxu0 %v7131_v46 }
 0x457   : > { %7134 = vmatpush3.bf16.msra.mxu0 %v7131_v46  ;;  %v6211_v46 = vld [vmem:[%s8689_s9 + $0x1c8] sm:$0xff] }
 0x458   : > { %7136 = vmatprep.subr.bf16.mxu0 %v7135_v51 }
 0x45a   : > { %6715 = vmatmul.mubr.msk.f32.vlgmr.msra.gmra.mrb[6].mxu0 %vm1253_vm6, %v8013_v55 }
 0x45b   : > { %7138 = vmatpush3.bf16.msra.mxu0 %v7135_v51  ;;  %6725 = vmatprep.mubr.msk.f32.mxu0 %vm1253_vm6, %v1945_v58  ;;  %v2576_v51 = vld [vmem:[#allocation3 + $0x15] sm:$0xff] }
 0x45c   : > { %7140 = vmatprep.subr.bf16.mxu0 %v7139_v54  ;;  %v2666_v58 = vld [vmem:[#allocation3 + $0x16] sm:$0xff] }
 0x45f   : > { %7142 = vmatpush3.bf16.msra.mxu0 %v7139_v54  ;;  %v7207_v54 = vpack.c.bf16 %v6217_v53, %v6216_v52 }
 0x460   : > { %7144 = vmatprep.subr.bf16.mxu0 %v7143_v59 }
 0x462   : > { %6726 = vmatmul.mubr.msk.f32.vlgmr.msra.gmra.mrb[6].mxu0 %vm1253_vm6, %v8030_v63 }
 0x463   : > { %7146 = vmatpush3.bf16.msra.mxu0 %v7143_v59  ;;  %6736 = vmatprep.mubr.msk.f32.mxu0 %vm1253_vm6, %v2035_v2  ;;  %v2756_v59 = vld [vmem:[#allocation3 + $0x17] sm:$0xff] }
 0x464   : > { %7148 = vmatprep.subr.bf16.mxu0 %v7147_v62 }
 0x467   : > { %7150 = vmatpush3.bf16.msra.mxu0 %v7147_v62 }
 0x468   : > { %7152 = vmatprep.subr.bf16.mxu0 %v7151_v3 }
 0x46a   : > { %6737 = vmatmul.mubr.msk.f32.vlgmr.msra.gmra.mrb[6].mxu0 %vm1253_vm6, %v8047_v7 }
 0x46b   : > { %7154 = vmatpush3.bf16.msra.mxu0 %v7151_v3  ;;  %6747 = vmatprep.mubr.msk.f32.mxu0 %vm1253_vm6, %v7931_v16  ;;  %v6187_v16 = vld [vmem:[%s8689_s9 + $0x148] sm:$0xff] }
 0x46c   : > { %7156 = vmatprep.subr.bf16.mxu0 %v7155_v6  ;;  %v7167_v19 = vpack.c.bf16 %v6187_v16, %v6186_v18 }
 0x46f   : > { %7158 = vmatpush3.bf16.msra.mxu0 %v7155_v6 }
 0x470   : > { %7160 = vmatprep.subr.bf16.mxu0 %v7159_v12 }
 0x472   : > { %6748 = vmatmul.mubr.msk.f32.vlgmr.msra.gmra.mrb[6].mxu0 %vm1253_vm6, %v2126_v17 }
 0x473   : > { %7162 = vmatpush3.bf16.msra.mxu0 %v7159_v12  ;;  %6758 = vmatprep.mubr.msk.f32.mxu0 %vm1253_vm6, %v7945_v23  ;;  %v6193_v23 = vld [vmem:[%s8689_s9 + $0x168] sm:$0xff] }
 0x474   : > { %7164 = vmatprep.subr.bf16.mxu0 %v7163_v15  ;;  %v7175_v26 = vpack.c.bf16 %v6193_v23, %v6192_v25 }
 0x477   : > { %7166 = vmatpush3.bf16.msra.mxu0 %v7163_v15 }
 0x478   : > { %7168 = vmatprep.subr.bf16.mxu0 %v7167_v19 }
 0x47a   : > { %6759 = vmatmul.mubr.msk.f32.vlgmr.msra.gmra.mrb[6].mxu0 %vm1253_vm6, %v2216_v24 }
 0x47b   : > { %7170 = vmatpush3.bf16.msra.mxu0 %v7167_v19  ;;  %6769 = vmatprep.mubr.msk.f32.mxu0 %vm1253_vm6, %v7962_v31  ;;  %v6199_v31 = vld [vmem:[%s8689_s9 + $0x188] sm:$0xff] }
 0x47c   : > { %7172 = vmatprep.subr.bf16.mxu0 %v7171_v22  ;;  %v7183_v33 = vpack.c.bf16 %v6199_v31, %v6198_v32 }
 0x47f   : > { %7174 = vmatpush3.bf16.msra.mxu0 %v7171_v22 }
 0x480   : > { %7176 = vmatprep.subr.bf16.mxu0 %v7175_v26 }
 0x482   : > { %6770 = vmatmul.mubr.msk.f32.vlgmr.msra.gmra.mrb[6].mxu0 %vm1253_vm6, %v2306_v30 }
 0x483   : > { %7178 = vmatpush3.bf16.msra.mxu0 %v7175_v26  ;;  %6780 = vmatprep.mubr.msk.f32.mxu0 %vm1253_vm6, %v7979_v39  ;;  %v6205_v39 = vld [vmem:[%s8689_s9 + $0x1a8] sm:$0xff] }
 0x484   : > { %7180 = vmatprep.subr.bf16.mxu0 %v7179_v29  ;;  %v7191_v40 = vpack.c.bf16 %v6205_v39, %v6204_v38 }
 0x487   : > { %7182 = vmatpush3.bf16.msra.mxu0 %v7179_v29 }
 0x488   : > { %7184 = vmatprep.subr.bf16.mxu0 %v7183_v33 }
 0x48a   : > { %6781 = vmatmul.mubr.msk.f32.vlgmr.msra.gmra.mrb[6].mxu0 %vm1253_vm6, %v2396_v37  ;;  %v2912_v37 = vld [vmem:[%s8636_s13 + $0x18] sm:$0xff] }
 0x48b   : > { %7186 = vmatpush3.bf16.msra.mxu0 %v7183_v33  ;;  %6791 = vmatprep.mubr.msk.f32.mxu0 %vm1253_vm6, %v7996_v47  ;;  %v7199_v47 = vpack.c.bf16 %v6211_v46, %v6210_v45  ;;  %v7219_v38 = vpack.c.bf16 %v2912_v37, %v2911_v35  ;;  %v6222_v46 = vld [vmem:[%s8634_s11] ss:$0 sm:$0xff] }
 0x48c   : > { %7188 = vmatprep.subr.bf16.mxu0 %v7187_v36 }
 0x48f   : > { %7190 = vmatpush3.bf16.msra.mxu0 %v7187_v36 }
 0x490   : > { %7192 = vmatprep.subr.bf16.mxu0 %v7191_v40 }
 0x492   : > { %6792 = vmatmul.mubr.msk.f32.vlgmr.msra.gmra.mrb[6].mxu0 %vm1253_vm6, %v2486_v44 }
 0x493   : > { %7194 = vmatpush3.bf16.msra.mxu0 %v7191_v40  ;;  %6802 = vmatprep.mubr.msk.f32.mxu0 %vm1253_vm6, %v8013_v55  ;;  %v6218_v55 = vld [vmem:[%s8689_s9 + $0x1f0] sm:$0xff] }
 0x494   : > { %7196 = vmatprep.subr.bf16.mxu0 %v7195_v43  ;;  %v7211_v57 = vpack.c.bf16 %v6219_v56, %v6218_v55  ;;  %v6224_v55 = vld [vmem:[%s8637_s14] ss:$0 sm:$0xff] }
 0x497   : > { %7198 = vmatpush3.bf16.msra.mxu0 %v7195_v43 }
 0x498   : > { %7200 = vmatprep.subr.bf16.mxu0 %v7199_v47 }
 0x49a   : > { %6803 = vmatmul.mubr.msk.f32.vlgmr.msra.gmra.mrb[6].mxu0 %vm1253_vm6, %v2576_v51 }
 0x49b   : > { %7202 = vmatpush3.bf16.msra.mxu0 %v7199_v47  ;;  %6813 = vmatprep.mubr.msk.f32.mxu0 %vm1253_vm6, %v8030_v63 }
 0x49c   : > { %7204 = vmatprep.subr.bf16.mxu0 %v7203_v50 }
 0x49f   : > { %7206 = vmatpush3.bf16.msra.mxu0 %v7203_v50  ;;  %v6223_v50 = vld [vmem:[%s8635_s12] ss:$0 sm:$0xff] }
 0x4a0   : > { %7208 = vmatprep.subr.bf16.mxu0 %v7207_v54 }
 0x4a2   : > { %6814 = vmatmul.mubr.msk.f32.vlgmr.msra.gmra.mrb[6].mxu0 %vm1253_vm6, %v2666_v58 }
 0x4a3   : > { %7210 = vmatpush3.bf16.msra.mxu0 %v7207_v54  ;;  %6824 = vmatprep.mubr.msk.f32.mxu0 %vm1253_vm6, %v8047_v7 }
 0x4a4   : > { %7212 = vmatprep.subr.bf16.mxu0 %v7211_v57 }
 0x4a7   : > { %7214 = vmatpush3.bf16.msra.mxu0 %v7211_v57 }
 0x4aa   : > { %6825 = vmatmul.mubr.msk.f32.vlgmr.msra.gmra.mrb[6].mxu0 %vm1253_vm6, %v2756_v59 }
 0x57d   : > { %v6826_v61 = vpop.f32.mrb[6].mxu0 }
 0x57e   : > { %v7377_v62 = vadd.f32 %v6826_v61, %v6129_v60  ;;  %v2834_v63 = vpop.f32.mrb[7].mxu0 }
 0x57f   : > { %v7378_v0 = vadd.f32 %v6129_v60, %v2834_v63 }
 0x580   : > { %v2848_v1 = vmul.f32 0.044715, %v7377_v62  ;;  %v2846_v15 = vmul.f32 0.5, %v7377_v62 }
 0x581   : > { %v2847_v2 = vmul.f32 0.044715, %v7378_v0  ;;  %v2845_v18 = vmul.f32 0.5, %v7378_v0 }
 0x582   : > { %v2850_v3 = vmul.f32 %v7377_v62, %v2848_v1 }
 0x583   : > { %v2849_v4 = vmul.f32 %v7378_v0, %v2847_v2 }
 0x584   : > { %v2852_v5 = vmul.f32 %v7377_v62, %v2850_v3 }
 0x585   : > { %v2851_v6 = vmul.f32 %v7378_v0, %v2849_v4  ;;  %v3216_v4 = vld [vmem:[%s8638_s15] sm:$0xff] }
 0x586   : > { %v2854_v7 = vadd.f32 %v7377_v62, %v2852_v5 }
 0x587   : > { %v2853_v8 = vadd.f32 %v7378_v0, %v2851_v6 }
 0x588   : > { %v2856_v10 = vmul.f32 0.7978846, %v2854_v7 }
 0x589   : > { %v2855_v12 = vmul.f32 0.7978846, %v2853_v8 }
 0x58a   : > { %7546 = vtanh.f32 %v2856_v10 }
 0x58b   : > { %7548 = vtanh.f32 %v2855_v12 }
 0x594   : > { %v7547_v13 = vpop.eup %7546 }
 0x595   : > { %v7549_v14 = vpop.eup %7548  ;;  %v2860_v17 = vadd.f32 1.0, %v7547_v13 }
 0x596   : > { %v2859_v16 = vadd.f32 1.0, %v7549_v14 }
 0x597   : > { %v2862_v19 = vmul.f32 %v2860_v17, %v2846_v15 }
 0x598   : > { %v2861_v20 = vmul.f32 %v2859_v16, %v2845_v18 }
 0x599   : > { %v2864_v21 = vadd.f32 %v2862_v19, %v7914_v9 }
 0x59a   : > { %v2863_v22 = vadd.f32 %v2861_v20, %v7916_v11  ;;  %v2909_v11 = vld [vmem:[%s8636_s13] sm:$0xff] }
 0x59b   : > { %v2870_v24 = vsel %vm1257_vm7, %v2864_v21, 0.0  ;;  %v7215_v36 = vpack.c.bf16 %v2910_v34, %v2909_v11 }
 0x59c   : > { %2871 = vadd.xlane.f32.xlu1 %v2870_v24  ;;  %v2867_v25 = vsel %vm1253_vm6, %v2863_v22, 0.0 }
 0x59d   : > { %2868 = vadd.xlane.f32.xlu0 %v2867_v25  ;;  %7216 = vmatprep.subr.bf16.mxu1 %v7215_v36 }
 0x59e   : > { %7218 = vmatpush3.bf16.msra.mxu1 %v7215_v36 }
 0x59f   : > { %7220 = vmatprep.subr.bf16.mxu1 %v7219_v38 }
 0x5a2   : > { %7222 = vmatpush3.bf16.msra.mxu1 %v7219_v38 }
 0x629   : > { %v2872_v23 = vpop.xlane.xlu1 %2871 }
 0x62a   : > { %v2874_v26 = vmul.f32 0.03125, %v2872_v23  ;;  %v2869_v27 = vpop.xlane.xlu0 %2868 }
 0x62b   : > { %v2873_v28 = vmul.f32 0.03125, %v2869_v27 }
 0x62c   : > { %v2876_v29 = vsub.f32 %v2864_v21, %v2874_v26 }
 0x62d   : > { %v2875_v30 = vsub.f32 %v2863_v22, %v2873_v28 }
 0x62e   : > { %v2878_v32 = vmul.f32 %v2876_v29, %v2876_v29 }
 0x62f   : > { %v2877_v31 = vmul.f32 %v2875_v30, %v2875_v30 }
 0x630   : > { %v2882_v33 = vsel %vm1257_vm7, %v2878_v32, 0.0 }
 0x631   : > { %2883 = vadd.xlane.f32.xlu1 %v2882_v33  ;;  %v2879_v9 = vsel %vm1253_vm6, %v2877_v31, 0.0 }
 0x632   : > { %2880 = vadd.xlane.f32.xlu0 %v2879_v9 }
 0x6be   : > { %v2884_v39 = vpop.xlane.xlu1 %2883 }
 0x6bf   : > { %v2886_v40 = vmul.f32 0.03125, %v2884_v39  ;;  %v2881_v41 = vpop.xlane.xlu0 %2880 }
 0x6c0   : > { %v2885_v42 = vmul.f32 0.03125, %v2881_v41 }
 0x6c1   : > { %v2888_v43 = vadd.f32 1e-05, %v2886_v40 }
 0x6c2   : > { %v2887_v44 = vadd.f32 1e-05, %v2885_v42 }
 0x6c3   : > { %7550 = vrsqrt.f32 %v2888_v43 }
 0x6c4   : > { %7552 = vrsqrt.f32 %v2887_v44 }
 0x6cd   : > { %v7551_v45 = vpop.eup %7550 }
 0x6ce   : > { %v7553_v47 = vpop.eup %7552  ;;  %v2892_v48 = vmul.f32 %v7551_v45, %v2876_v29 }
 0x6cf   : > { %v2891_v49 = vmul.f32 %v7553_v47, %v2875_v30 }
 0x6d0   : > { %v2900_v51 = vmul.f32 %v6222_v46, %v2892_v48 }
 0x6d1   : > { %v2899_v52 = vmul.f32 %v6222_v46, %v2891_v49 }
 0x6d2   : > { %v8188_v54 = vadd.f32 %v6223_v50, %v2900_v51 }
 0x6d3   : > { %v8186_v53 = vadd.f32 %v6223_v50, %v2899_v52 }
 0x6d5   : > { %6835 = vmatprep.mubr.msk.f32.mxu1 %vm1253_vm6, %v8186_v53 }
 0x6d6   : > { %6836 = vmatmul.mubr.msk.f32.vlgmr.msra.gmra.mrb[2].mxu1 %vm1253_vm6, %v8188_v54 }
 0x7a9   : > { %v6837_v56 = vpop.f32.mrb[2].mxu1 }
 0x7aa   : > { %v2998_v57 = vadd.f32 %v6837_v56, %v6224_v55  ;;  %v2992_v58 = vpop.f32.mrb[3].mxu1 }
 0x7ab   : > { %v2993_v59 = vadd.f32 %v6224_v55, %v2992_v58  ;;  %v3501_v58 = vld [vmem:[%s8638_s15 + $0x8] sm:$0xff] }
 0x7ac   : > { %v8209_v62 = vmul.f32 0.35355338, %v2998_v57 }
 0x7ad   : > { %v8197_v60 = vpack.i.bf16 %v2998_v57, %v2993_v59  ;;  %v8199_v61 = vmul.f32 0.35355338, %v2993_v59 }
 0x7af   : > { %7451 = vrot.lane.b32.xlu0 %v8197_v60, %s8668_s6  ;;  %6842 = vmatprep.mubr.msk.f32.mxu1 %vm3017_vm8, %v8199_v61  ;;  %s8699_s6 = smov 88  }
 0x7b3   : > { %7461 = vrot.lane.b32.xlu0 %v8197_v60, %s8664_s7  ;;  %s8696_s7 = smov 96  }
 0x7b7   : > { %3300 = vrot.lane.b32.xlu0 %v8199_v61, %s8666_s28 }
 0x7bb   : > { %3302 = vrot.lane.b32.xlu0 %v8209_v62, %s8666_s28  ;;  %s8706_s28 = smov 40  }
 0x821   : > { %v7452_v63 = vpop.permute.xlu0 %7451 }
 0x822   : > { %v7454_v0 = vunpack.i.h.bf16 %v7452_v63  ;;  %v7453_v1 = vunpack.i.l.bf16 %v7452_v63 }
 0x824   : > { %v7223_v3 = vpack.c.bf16 %v7454_v0, %v7453_v1 }
 0x825   : > { %v7462_v5 = vpop.permute.xlu0 %7461 }
 0x826   : > { %7225 = vmatprep.subr.msk.bf16.mxu1 %vm8215_vm9, %v7223_v3  ;;  %v7464_v6 = vunpack.i.h.bf16 %v7462_v5  ;;  %v7463_v7 = vunpack.i.l.bf16 %v7462_v5 }
 0x827   : > { %7228 = vmatpush3.bf16.xpose.msk.msra.mxu1 %vm8215_vm9, %v7223_v3 }
 0x828   : > { %6852 = vmatprep.subr.mxu1 %v3216_v4  ;;  %v7235_v8 = vpack.c.bf16 %v7464_v6, %v7463_v7 }
 0x829   : > { %v3301_v36 = vpop.permute.xlu0 %3300 }
 0x82d   : > { %v3303_v37 = vpop.permute.xlu0 %3302 }
 0x82e   : > { %6843 = vmatmul.mubr.msk.f32.vlgmr.msra.gmra.mrb[4].mxu1 %vm3017_vm8, %v8209_v62 }
 0x82f   : > { %6853 = vmatpush3.msra.mxu1 %v3216_v4 }
 0x830   : > { %7237 = vmatprep.subr.msk.bf16.mxu1 %vm8215_vm9, %v7235_v8 }
 0x901   : > { %v6844_v10 = vpop.f32.mrb[4].mxu1 }
 0x902   : > { %v3094_v12 = vpop.f32.mrb[5].mxu1  ;;  %v3108_v14 = vsel %vm3107_vm11, %v6844_v10, -inf }
 0x903   : > { %v3104_v13 = vsel %vm3103_vm10, %v3094_v12, -inf }
 0x904   : > { %3105 = vmax.xlane.f32.xlu1 %v3104_v13 }
 0x908   : > { %3109 = vmax.xlane.f32.xlu1 %v3108_v14 }
 0x991   : > { %v3106_v15 = vpop.xlane.xlu1 %3105 }
 0x992   : > { %v3111_v17 = vsub.f32 %v3094_v12, %v3106_v15 }
 0x994   : > { %v3113_v19 = vmul.f32 1.442695, %v3111_v17 }
 0x995   : > { %v3110_v18 = vpop.xlane.xlu1 %3109 }
 0x996   : > { %v3112_v16 = vsub.f32 %v6844_v10, %v3110_v18 }
 0x998   : > { %v3115_v20 = vmul.f32 1.442695, %v3112_v16 }
 0x99a   : > { %7554 = vpow2.f32 %v3115_v20 }
 0x99b   : > { %7556 = vpow2.f32 %v3113_v19 }
 0x9a4   : > { %v7555_v21 = vpop.eup %7554 }
 0x9a5   : > { %v3120_v22 = vsel %vm3107_vm11, %v7555_v21, 0.0  ;;  %v7557_v24 = vpop.eup %7556 }
 0x9a6   : > { %3121 = vadd.xlane.f32.xlu1 %v3120_v22  ;;  %v3117_v25 = vsel %vm3103_vm10, %v7557_v24, 0.0 }
 0x9aa   : > { %3118 = vadd.xlane.f32.xlu1 %v3117_v25 }
 0x9bb   : > { %7456 = vrot.lane.b32.xlu1 %v8197_v60, %s8665_s0 }
 0xa33   : > { %v3122_v23 = vpop.xlane.xlu1 %3121 }
 0xa34   : > { %7558 = vrcp.f32 %v3122_v23 }
 0xa37   : > { %v3119_v26 = vpop.xlane.xlu1 %3118 }
 0xa38   : > { %7560 = vrcp.f32 %v3119_v26 }
 0xa3b   : > { %v7457_v27 = vpop.permute.xlu1 %7456 }
 0xa3c   : > { %v7459_v28 = vunpack.i.h.bf16 %v7457_v27  ;;  %v7458_v29 = vunpack.i.l.bf16 %v7457_v27 }
 0xa3e   : > { %v7229_v32 = vpack.c.bf16 %v7459_v28, %v7458_v29  ;;  %v7559_v31 = vpop.eup %7558 }
 0xa3f   : > { %v3126_v11 = vmul.f32 %v7559_v31, %v7555_v21  ;;  %v3786_v31 = vld [vmem:[%s8638_s15 + $0x10] sm:$0xff] }
 0xa40   : > { %7231 = vmatprep.subr.msk.bf16.mxu0 %vm8237_vm13, %v7229_v32 }
 0xa41   : > { %7234 = vmatpush3.bf16.msk.msra.mxu0 %vm8237_vm13, %v7229_v32 }
 0xa42   : > { %v7561_v33 = vpop.eup %7560 }
 0xa43   : > { %v3125_v9 = vmul.f32 %v7561_v33, %v7557_v24 }
 0xa45   : > { %6849 = vmatprep.mubr.msk.f32.mxu0 %vm3103_vm10, %v3125_v9 }
 0xa46   : > { %6850 = vmatmul.mubr.msk.f32.vlgmr.msra.gmra.mrb[8].mxu0 %vm3103_vm10, %v3126_v11 }
 0xb19   : > { %v6851_v34 = vpop.f32.mrb[8].mxu0 }
 0xb1a   : > { %v3207_v35 = vpop.f32.mrb[9].mxu0 }
 0xb1b   : > { %6854 = vmatprep.mubr.msk.f32.mxu1 %vm3017_vm8, %v3207_v35 }
 0xb1c   : > { %6855 = vmatmul.mubr.msk.f32.vlgmr.msra.gmra.mrb[6].mxu1 %vm3017_vm8, %v6851_v34 }
 0xb1d   : > { %7240 = vmatpush3.bf16.xpose.msk.msra.mxu1 %vm8215_vm9, %v7235_v8  ;;  %6861 = vmatprep.mubr.msk.f32.mxu1 %vm3017_vm8, %v3301_v36 }
 0xb24   : > { %6862 = vmatmul.mubr.msk.f32.vlgmr.msra.gmra.mrb[8].mxu1 %vm3017_vm8, %v3303_v37 }
 0xbf7   : > { %v6863_v38 = vpop.f32.mrb[8].mxu1 }
 0xbf8   : > { %v3382_v39 = vpop.f32.mrb[9].mxu1  ;;  %v3394_v40 = vsel %vm3107_vm11, %v6863_v38, -inf }
 0xbf9   : > { %3395 = vmax.xlane.f32.xlu0 %v3394_v40  ;;  %v3391_v41 = vsel %vm3103_vm10, %v3382_v39, -inf }
 0xbfa   : > { %3392 = vmax.xlane.f32.xlu1 %v3391_v41 }
 0xc0b   : > { %7466 = vrot.lane.b32.xlu1 %v8197_v60, %s8663_s5  ;;  %s8697_s5 = smov 120  }
 0xc0f   : > { %3585 = vrot.lane.b32.xlu1 %v8199_v61, %s8658_s10 }
 0xc13   : > { %3587 = vrot.lane.b32.xlu1 %v8209_v62, %s8658_s10  ;;  %s8660_s10 = smov 40  }
 0xc86   : > { %v3396_v42 = vpop.xlane.xlu0 %3395 }
 0xc87   : > { %v3398_v43 = vsub.f32 %v6863_v38, %v3396_v42  ;;  %v3393_v44 = vpop.xlane.xlu1 %3392 }
 0xc88   : > { %v3397_v45 = vsub.f32 %v3382_v39, %v3393_v44 }
 0xc89   : > { %v3401_v46 = vmul.f32 1.442695, %v3398_v43 }
 0xc8a   : > { %v3399_v47 = vmul.f32 1.442695, %v3397_v45 }
 0xc8b   : > { %v7467_v48 = vpop.permute.xlu1 %7466 }
 0xc8c   : > { %7562 = vpow2.f32 %v3399_v47  ;;  %v7469_v49 = vunpack.i.h.bf16 %v7467_v48  ;;  %v7468_v50 = vunpack.i.l.bf16 %v7467_v48 }
 0xc8d   : > { %7564 = vpow2.f32 %v3401_v46 }
 0xc8e   : > { %v7241_v51 = vpack.c.bf16 %v7469_v49, %v7468_v50 }
 0xc8f   : > { %v3586_v13 = vpop.permute.xlu1 %3585 }
 0xc90   : > { %7243 = vmatprep.subr.msk.bf16.mxu1 %vm8237_vm13, %v7241_v51 }
 0xc91   : > { %7246 = vmatpush3.bf16.msk.msra.mxu1 %vm8237_vm13, %v7241_v51 }
 0xc92   : > { %6871 = vmatprep.subr.mxu1 %v3501_v58 }
 0xc93   : > { %v3588_v14 = vpop.permute.xlu1 %3587 }
 0xc96   : > { %v7563_v52 = vpop.eup %7562 }
 0xc97   : > { %v3403_v55 = vsel %vm3103_vm10, %v7563_v52, 0.0  ;;  %v7565_v56 = vpop.eup %7564 }
 0xc98   : > { %3404 = vadd.xlane.f32.xlu0 %v3403_v55  ;;  %v3406_v57 = vsel %vm3107_vm11, %v7565_v56, 0.0 }
 0xc9c   : > { %3407 = vadd.xlane.f32.xlu0 %v3406_v57 }
 0xcb2   : > { %7471 = vrot.lane.b32.xlu0 %v8197_v60, %s8662_s4  ;;  %s8700_s4 = smov 56  }
 0xd25   : > { %v3405_v59 = vpop.xlane.xlu0 %3404 }
 0xd26   : > { %7566 = vrcp.f32 %v3405_v59 }
 0xd29   : > { %v3408_v63 = vpop.xlane.xlu0 %3407 }
 0xd2a   : > { %7568 = vrcp.f32 %v3408_v63 }
 0xd2d   : > { %v7472_v1 = vpop.permute.xlu0 %7471 }
 0xd2e   : > { %v7474_v4 = vunpack.i.h.bf16 %v7472_v1  ;;  %v7473_v5 = vunpack.i.l.bf16 %v7472_v1 }
 0xd30   : > { %v7567_v0 = vpop.eup %7566  ;;  %v7247_v8 = vpack.c.bf16 %v7474_v4, %v7473_v5  ;;  %v4071_v4 = vld [vmem:[%s8638_s15 + $0x18] sm:$0xff] }
 0xd31   : > { %v3411_v3 = vmul.f32 %v7567_v0, %v7563_v52 }
 0xd33   : > { %6868 = vmatprep.mubr.msk.f32.mxu1 %vm3103_vm10, %v3411_v3 }
 0xd34   : > { %v7569_v6 = vpop.eup %7568 }
 0xd35   : > { %v3412_v7 = vmul.f32 %v7569_v6, %v7565_v56 }
 0xd37   : > { %6869 = vmatmul.mubr.msk.f32.vlgmr.msra.gmra.mrb[10].mxu1 %vm3103_vm10, %v3412_v7 }
 0xd38   : > { %6872 = vmatpush3.msra.mxu1 %v3501_v58 }
 0xd39   : > { %7249 = vmatprep.subr.msk.bf16.mxu1 %vm8215_vm9, %v7247_v8 }
 0xe0a   : > { %v6870_v10 = vpop.f32.mrb[10].mxu1 }
 0xe0b   : > { %v3492_v12 = vpop.f32.mrb[11].mxu1 }
 0xe0c   : > { %6873 = vmatprep.mubr.msk.f32.mxu1 %vm3017_vm8, %v3492_v12 }
 0xe0d   : > { %6874 = vmatmul.mubr.msk.f32.vlgmr.msra.gmra.mrb[6].mxu1 %vm3017_vm8, %v6870_v10 }
 0xe0e   : > { %7252 = vmatpush3.bf16.xpose.msk.msra.mxu1 %vm8215_vm9, %v7247_v8  ;;  %6880 = vmatprep.mubr.msk.f32.mxu1 %vm3017_vm8, %v3586_v13 }
 0xe15   : > { %6881 = vmatmul.mubr.msk.f32.vlgmr.msra.gmra.mrb[12].mxu1 %vm3017_vm8, %v3588_v14 }
 0xee8   : > { %v6882_v15 = vpop.f32.mrb[12].mxu1 }
 0xee9   : > { %v3667_v17 = vpop.f32.mrb[13].mxu1  ;;  %v3679_v18 = vsel %vm3107_vm11, %v6882_v15, -inf }
 0xeea   : > { %3680 = vmax.xlane.f32.xlu0 %v3679_v18  ;;  %v3676_v16 = vsel %vm3103_vm10, %v3667_v17, -inf }
 0xeeb   : > { %3677 = vmax.xlane.f32.xlu1 %v3676_v16 }
 0xefc   : > { %7476 = vrot.lane.b32.xlu1 %v8197_v60, %s8655_s30  ;;  %s8661_s30 = smov 72  }
 0xf00   : > { %3870 = vrot.lane.b32.xlu1 %v8199_v61, %s8656_s29 }
 0xf04   : > { %3872 = vrot.lane.b32.xlu1 %v8209_v62, %s8656_s29  ;;  %s8703_s29 = smov 104  }
 0xf77   : > { %v3681_v19 = vpop.xlane.xlu0 %3680 }
 0xf78   : > { %v3683_v20 = vsub.f32 %v6882_v15, %v3681_v19  ;;  %v3678_v21 = vpop.xlane.xlu1 %3677  ;;  %v6227_v15 = vld [vmem:[%s8639_s16] ss:$0 sm:$0xff] }
 0xf79   : > { %v3682_v22 = vsub.f32 %v3667_v17, %v3678_v21 }
 0xf7a   : > { %v3686_v24 = vmul.f32 1.442695, %v3683_v20 }
 0xf7b   : > { %v3684_v25 = vmul.f32 1.442695, %v3682_v22 }
 0xf7c   : > { %v7477_v23 = vpop.permute.xlu1 %7476 }
 0xf7d   : > { %7570 = vpow2.f32 %v3684_v25  ;;  %v7479_v26 = vunpack.i.h.bf16 %v7477_v23  ;;  %v7478_v27 = vunpack.i.l.bf16 %v7477_v23 }
 0xf7e   : > { %7572 = vpow2.f32 %v3686_v24 }
 0xf7f   : > { %v7253_v28 = vpack.c.bf16 %v7479_v26, %v7478_v27 }
 0xf80   : > { %v3871_v43 = vpop.permute.xlu1 %3870 }
 0xf81   : > { %7255 = vmatprep.subr.msk.bf16.mxu1 %vm8237_vm13, %v7253_v28 }
 0xf82   : > { %7258 = vmatpush3.bf16.msk.msra.mxu1 %vm8237_vm13, %v7253_v28 }
 0xf83   : > { %6890 = vmatprep.subr.mxu1 %v3786_v31 }
 0xf84   : > { %v3873_v44 = vpop.permute.xlu1 %3872 }
 0xf87   : > { %v7571_v61 = vpop.eup %7570 }
 0xf88   : > { %v3688_v62 = vsel %vm3103_vm10, %v7571_v61, 0.0  ;;  %v7573_v29 = vpop.eup %7572 }
 0xf89   : > { %3689 = vadd.xlane.f32.xlu0 %v3688_v62  ;;  %v3691_v32 = vsel %vm3107_vm11, %v7573_v29, 0.0 }
 0xf8d   : > { %3692 = vadd.xlane.f32.xlu0 %v3691_v32 }
 0xfa3   : > { %7481 = vrot.lane.b32.xlu0 %v8197_v60, %s8661_s30  ;;  %s8701_s30 = smov 80  }
0x1016   : > { %v3690_v33 = vpop.xlane.xlu0 %3689 }
0x1017   : > { %7574 = vrcp.f32 %v3690_v33 }
0x101a   : > { %v3693_v9 = vpop.xlane.xlu0 %3692 }
0x101b   : > { %7576 = vrcp.f32 %v3693_v9  ;;  %v4203_v9 = vld [vmem:[%s8642_s19 + $0x10] sm:$0xff] }
0x101e   : > { %v7482_v34 = vpop.permute.xlu0 %7481 }
0x101f   : > { %v7484_v36 = vunpack.i.h.bf16 %v7482_v34  ;;  %v7483_v37 = vunpack.i.l.bf16 %v7482_v34 }
0x1021   : > { %v7575_v11 = vpop.eup %7574  ;;  %v7259_v40 = vpack.c.bf16 %v7484_v36, %v7483_v37 }
0x1022   : > { %v3696_v35 = vmul.f32 %v7575_v11, %v7571_v61  ;;  %v4204_v11 = vld [vmem:[%s8642_s19 + $0x18] sm:$0xff] }
0x1023   : > { %v7275_v34 = vpack.c.bf16 %v4204_v11, %v4203_v9 }
0x1024   : > { %6887 = vmatprep.mubr.msk.f32.mxu1 %vm3103_vm10, %v3696_v35 }
0x1025   : > { %v7577_v38 = vpop.eup %7576 }
0x1026   : > { %v3697_v39 = vmul.f32 %v7577_v38, %v7573_v29 }
0x1028   : > { %6888 = vmatmul.mubr.msk.f32.vlgmr.msra.gmra.mrb[14].mxu1 %vm3103_vm10, %v3697_v39 }
0x1029   : > { %6891 = vmatpush3.msra.mxu1 %v3786_v31  ;;  %v4202_v31 = vld [vmem:[%s8642_s19 + $0x8] sm:$0xff] }
0x102a   : > { %7261 = vmatprep.subr.msk.bf16.mxu1 %vm8215_vm9, %v7259_v40 }
0x10fb   : > { %v6889_v41 = vpop.f32.mrb[14].mxu1 }
0x10fc   : > { %v3777_v42 = vpop.f32.mrb[15].mxu1 }
0x10fd   : > { %6892 = vmatprep.mubr.msk.f32.mxu1 %vm3017_vm8, %v3777_v42  ;;  %v6264_v42 = vld [vmem:[%s8640_s17] ss:$0 sm:$0xff] }
0x10fe   : > { %6893 = vmatmul.mubr.msk.f32.vlgmr.msra.gmra.mrb[6].mxu1 %vm3017_vm8, %v6889_v41 }
0x10ff   : > { %7264 = vmatpush3.bf16.xpose.msk.msra.mxu1 %vm8215_vm9, %v7259_v40  ;;  %6899 = vmatprep.mubr.msk.f32.mxu1 %vm3017_vm8, %v3871_v43 }
0x1106   : > { %6900 = vmatmul.mubr.msk.f32.vlgmr.msra.gmra.mrb[16].mxu1 %vm3017_vm8, %v3873_v44  ;;  %v6265_v44 = vld [vmem:[%s8641_s18] ss:$0 sm:$0xff] }
0x11d9   : > { %v6901_v45 = vpop.f32.mrb[16].mxu1 }
0x11da   : > { %v3952_v46 = vpop.f32.mrb[17].mxu1  ;;  %v3964_v47 = vsel %vm3107_vm11, %v6901_v45, -inf }
0x11db   : > { %3965 = vmax.xlane.f32.xlu0 %v3964_v47  ;;  %v3961_v48 = vsel %vm3103_vm10, %v3952_v46, -inf }
0x11dc   : > { %3962 = vmax.xlane.f32.xlu1 %v3961_v48 }
0x11ed   : > { %7486 = vrot.lane.b32.xlu1 %v8197_v60, %s8660_s10  ;;  %s8702_s10 = smov 112  }
0x1268   : > { %v3966_v49 = vpop.xlane.xlu0 %3965 }
0x1269   : > { %v3968_v50 = vsub.f32 %v6901_v45, %v3966_v49  ;;  %v3963_v51 = vpop.xlane.xlu1 %3962 }
0x126a   : > { %v3967_v52 = vsub.f32 %v3952_v46, %v3963_v51  ;;  %v4311_v51 = vld [vmem:[%s8644_s21] sm:$0xff] }
0x126b   : > { %v3971_v55 = vmul.f32 1.442695, %v3968_v50 }
0x126c   : > { %v3969_v56 = vmul.f32 1.442695, %v3967_v52  ;;  %v4312_v52 = vld [vmem:[%s8644_s21 + $0x8] sm:$0xff] }
0x126d   : > { %v7487_v57 = vpop.permute.xlu1 %7486 }
0x126e   : > { %7578 = vpow2.f32 %v3969_v56  ;;  %v7489_v58 = vunpack.i.h.bf16 %v7487_v57  ;;  %v7488_v59 = vunpack.i.l.bf16 %v7487_v57  ;;  %v7279_v56 = vpack.c.bf16 %v4312_v52, %v4311_v51  ;;  %v4314_v57 = vld [vmem:[%s8644_s21 + $0x18] sm:$0xff] }
0x126f   : > { %7580 = vpow2.f32 %v3971_v55  ;;  %v4313_v55 = vld [vmem:[%s8644_s21 + $0x10] sm:$0xff] }
0x1270   : > { %v7265_v63 = vpack.c.bf16 %v7489_v58, %v7488_v59  ;;  %v7283_v58 = vpack.c.bf16 %v4314_v57, %v4313_v55  ;;  %v4315_v59 = vld [vmem:[%s8644_s21 + $0x20] sm:$0xff] }
0x1272   : > { %7267 = vmatprep.subr.msk.bf16.mxu1 %vm8237_vm13, %v7265_v63 }
0x1273   : > { %7270 = vmatpush3.bf16.msk.msra.mxu1 %vm8237_vm13, %v7265_v63  ;;  %v4316_v63 = vld [vmem:[%s8644_s21 + $0x28] sm:$0xff] }
0x1274   : > { %6909 = vmatprep.subr.mxu1 %v4071_v4 }
0x1278   : > { %v7579_v0 = vpop.eup %7578 }
0x1279   : > { %v3973_v60 = vsel %vm3103_vm10, %v7579_v0, 0.0  ;;  %v7581_v1 = vpop.eup %7580 }
0x127a   : > { %3974 = vadd.xlane.f32.xlu0 %v3973_v60  ;;  %v3976_v3 = vsel %vm3107_vm11, %v7581_v1, 0.0  ;;  %v4317_v60 = vld [vmem:[%s8644_s21 + $0x30] sm:$0xff] }
0x127e   : > { %3977 = vadd.xlane.f32.xlu0 %v3976_v3 }
0x1307   : > { %v3975_v5 = vpop.xlane.xlu0 %3974 }
0x1308   : > { %7582 = vrcp.f32 %v3975_v5 }
0x130b   : > { %v3978_v6 = vpop.xlane.xlu0 %3977 }
0x130c   : > { %7584 = vrcp.f32 %v3978_v6 }
0x1312   : > { %v7583_v7 = vpop.eup %7582 }
0x1313   : > { %v3981_v8 = vmul.f32 %v7583_v7, %v7579_v0  ;;  %v7287_v0 = vpack.c.bf16 %v4316_v63, %v4315_v59  ;;  %v6273_v63 = vld [vmem:[%s8647_s24] ss:$0 sm:$0xff] }
0x1315   : > { %6906 = vmatprep.mubr.msk.f32.mxu1 %vm3103_vm10, %v3981_v8 }
0x1316   : > { %v7585_v10 = vpop.eup %7584 }
0x1317   : > { %v3982_v12 = vmul.f32 %v7585_v10, %v7581_v1  ;;  %v4318_v1 = vld [vmem:[%s8644_s21 + $0x38] sm:$0xff] }
0x1318   : > { %v7291_v3 = vpack.c.bf16 %v4318_v1, %v4317_v60 }
0x1319   : > { %6907 = vmatmul.mubr.msk.f32.vlgmr.msra.gmra.mrb[18].mxu1 %vm3103_vm10, %v3982_v12 }
0x131a   : > { %6910 = vmatpush3.msra.mxu1 %v4071_v4  ;;  %v6266_v4 = vld [vmem:[%s8643_s20] ss:$0 sm:$0xff] }
0x13ec   : > { %v6908_v13 = vpop.f32.mrb[18].mxu1 }
0x13ed   : > { %v4062_v14 = vpop.f32.mrb[19].mxu1 }
0x13ee   : > { %6911 = vmatprep.mubr.msk.f32.mxu1 %vm3017_vm8, %v4062_v14 }
0x13ef   : > { %6912 = vmatmul.mubr.msk.f32.vlgmr.msra.gmra.mrb[6].mxu1 %vm3017_vm8, %v6908_v13 }
0x14c2   : > { %v6913_v17 = vpop.f32.mrb[6].mxu1 }
0x14c3   : > { %v4144_v18 = vpop.f32.mrb[7].mxu1  ;;  %v7379_v16 = vadd.f32 %v6913_v17, %v6227_v15 }
0x14c4   : > { %v7380_v19 = vadd.f32 %v6227_v15, %v4144_v18 }
0x14c5   : > { %v4156_v22 = vadd.f32 %v7379_v16, %v8188_v54  ;;  %v4201_v54 = vld [vmem:[%s8642_s19] sm:$0xff] }
0x14c6   : > { %v4155_v20 = vadd.f32 %v7380_v19, %v8186_v53  ;;  %v7271_v33 = vpack.c.bf16 %v4202_v31, %v4201_v54 }
0x14c7   : > { %v4162_v24 = vsel %vm1257_vm7, %v4156_v22, 0.0 }
0x14c8   : > { %v4159_v21 = vsel %vm1253_vm6, %v4155_v20, 0.0  ;;  %7272 = vmatprep.subr.bf16.mxu1 %v7271_v33 }
0x14c9   : > { %4160 = vadd.xlane.f32.xlu0 %v4159_v21  ;;  %7274 = vmatpush3.bf16.msra.mxu1 %v7271_v33 }
0x14ca   : > { %7276 = vmatprep.subr.bf16.mxu1 %v7275_v34 }
0x14cd   : > { %4163 = vadd.xlane.f32.xlu0 %v4162_v24  ;;  %7278 = vmatpush3.bf16.msra.mxu1 %v7275_v34 }
0x14ce   : > { %7280 = vmatprep.subr.bf16.mxu1 %v7279_v56 }
0x1556   : > { %v4161_v25 = vpop.xlane.xlu0 %4160 }
0x1557   : > { %v4165_v23 = vmul.f32 0.03125, %v4161_v25 }
0x1559   : > { %v4167_v26 = vsub.f32 %v4155_v20, %v4165_v23 }
0x155a   : > { %v4164_v27 = vpop.xlane.xlu0 %4163 }
0x155b   : > { %v4166_v28 = vmul.f32 0.03125, %v4164_v27  ;;  %v4169_v61 = vmul.f32 %v4167_v26, %v4167_v26 }
0x155d   : > { %v4168_v62 = vsub.f32 %v4156_v22, %v4166_v28  ;;  %v4171_v29 = vsel %vm1253_vm6, %v4169_v61, 0.0  ;;  %v6269_v61 = vld [vmem:[%s8645_s22] ss:$0 sm:$0xff] }
0x155e   : > { %4172 = vadd.xlane.f32.xlu0 %v4171_v29 }
0x155f   : > { %v4170_v32 = vmul.f32 %v4168_v62, %v4168_v62 }
0x1561   : > { %v4174_v53 = vsel %vm1257_vm7, %v4170_v32, 0.0 }
0x1562   : > { %4175 = vadd.xlane.f32.xlu0 %v4174_v53 }
0x15eb   : > { %v4173_v35 = vpop.xlane.xlu0 %4172 }
0x15ec   : > { %v4177_v36 = vmul.f32 0.03125, %v4173_v35 }
0x15ee   : > { %v4179_v37 = vadd.f32 1e-05, %v4177_v36 }
0x15ef   : > { %v4176_v38 = vpop.xlane.xlu0 %4175 }
0x15f0   : > { %7586 = vrsqrt.f32 %v4179_v37  ;;  %v4178_v39 = vmul.f32 0.03125, %v4176_v38 }
0x15f2   : > { %v4180_v40 = vadd.f32 1e-05, %v4178_v39 }
0x15f4   : > { %7588 = vrsqrt.f32 %v4180_v40 }
0x15fa   : > { %v7587_v41 = vpop.eup %7586 }
0x15fb   : > { %v4183_v43 = vmul.f32 %v7587_v41, %v4167_v26 }
0x15fd   : > { %v4191_v45 = vmul.f32 %v6264_v42, %v4183_v43  ;;  %v6274_v43 = vld [vmem:[%s8636_s13 + $0x20] sm:$0xff] }
0x15fe   : > { %v7589_v46 = vpop.eup %7588 }
0x15ff   : > { %v4184_v47 = vmul.f32 %v7589_v46, %v4168_v62  ;;  %v4199_v48 = vadd.f32 %v6265_v44, %v4191_v45  ;;  %v6276_v46 = vld [vmem:[%s8636_s13 + $0x30] sm:$0xff] }
0x1601   : > { %v4192_v49 = vmul.f32 %v6264_v42, %v4184_v47  ;;  %6922 = vmatprep.mubr.msk.f32.mxu1 %vm1253_vm6, %v4199_v48  ;;  %v6277_v47 = vld [vmem:[%s8636_s13 + $0x38] sm:$0xff] }
0x1603   : > { %v4200_v50 = vadd.f32 %v6265_v44, %v4192_v49  ;;  %v6275_v44 = vld [vmem:[%s8636_s13 + $0x28] sm:$0xff] }
0x1604   : > { %v7295_v45 = vpack.c.bf16 %v6275_v44, %v6274_v43 }
0x1605   : > { %6923 = vmatmul.mubr.msk.f32.vlgmr.msra.gmra.mrb[20].mxu1 %vm1253_vm6, %v4200_v50 }
0x1606   : > { %7282 = vmatpush3.bf16.msra.mxu1 %v7279_v56 }
0x1607   : > { %7284 = vmatprep.subr.bf16.mxu1 %v7283_v58 }
0x160a   : > { %7286 = vmatpush3.bf16.msra.mxu1 %v7283_v58  ;;  %v6272_v58 = vld [vmem:[%s8646_s23] ss:$0 sm:$0xff] }
0x160b   : > { %7288 = vmatprep.subr.bf16.mxu1 %v7287_v0 }
0x160e   : > { %7290 = vmatpush3.bf16.msra.mxu1 %v7287_v0 }
0x160f   : > { %7292 = vmatprep.subr.bf16.mxu1 %v7291_v3 }
0x1612   : > { %7294 = vmatpush3.bf16.msra.mxu1 %v7291_v3 }
0x1613   : > { %7296 = vmatprep.subr.bf16.mxu1 %v7295_v45 }
0x16d8   : > { %v6924_v5 = vpop.f32.mrb[20].mxu1 }
0x16d9   : > { %v4290_v6 = vadd.f32 %v6924_v5, %v6266_v4  ;;  %v4284_v7 = vpop.f32.mrb[21].mxu1 }
0x16da   : > { %v4285_v8 = vadd.f32 %v6266_v4, %v4284_v7 }
0x16db   : > { %v4296_v10 = vmul.f32 0.044715, %v4290_v6  ;;  %v4294_v26 = vmul.f32 0.5, %v4290_v6 }
0x16dc   : > { %v4295_v12 = vmul.f32 0.044715, %v4285_v8  ;;  %v4293_v25 = vmul.f32 0.5, %v4285_v8 }
0x16dd   : > { %v4298_v13 = vmul.f32 %v4296_v10, %v4290_v6 }
0x16de   : > { %v4297_v14 = vmul.f32 %v4295_v12, %v4285_v8 }
0x16df   : > { %v4300_v15 = vmul.f32 %v4298_v13, %v4290_v6 }
0x16e0   : > { %v4299_v17 = vmul.f32 %v4297_v14, %v4285_v8 }
0x16e1   : > { %v4302_v18 = vadd.f32 %v4300_v15, %v4290_v6  ;;  %v6279_v6 = vld [vmem:[%s8637_s14 + $0x1] ss:$0 sm:$0xff] }
0x16e2   : > { %v4301_v16 = vadd.f32 %v4299_v17, %v4285_v8 }
0x16e3   : > { %v4304_v19 = vmul.f32 0.7978846, %v4302_v18 }
0x16e4   : > { %v4303_v20 = vmul.f32 0.7978846, %v4301_v16 }
0x16e5   : > { %7590 = vtanh.f32 %v4304_v19 }
0x16e6   : > { %7592 = vtanh.f32 %v4303_v20 }
0x16ef   : > { %v7591_v21 = vpop.eup %7590 }
0x16f0   : > { %v7593_v22 = vpop.eup %7592  ;;  %v4308_v24 = vadd.f32 1.0, %v7591_v21 }
0x16f1   : > { %v4307_v23 = vadd.f32 1.0, %v7593_v22 }
0x16f2   : > { %v4310_v28 = vmul.f32 %v4308_v24, %v4294_v26 }
0x16f3   : > { %v4309_v27 = vmul.f32 %v4307_v23, %v4293_v25 }
0x16f5   : > { %6941 = vmatprep.mubr.msk.f32.mxu1 %vm4326_vm14, %v4309_v27 }
0x16f6   : > { %6942 = vmatmul.mubr.msk.f32.vlgmr.msra.gmra.mrb[22].mxu1 %vm4326_vm14, %v4310_v28 }
0x16f7   : > { %7298 = vmatpush3.bf16.msra.mxu1 %v7295_v45 }
0x17c9   : > { %v6943_v62 = vpop.f32.mrb[22].mxu1 }
0x17ca   : > { %v4405_v29 = vadd.f32 %v6943_v62, %v6269_v61  ;;  %v4399_v32 = vpop.f32.mrb[23].mxu1 }
0x17cb   : > { %v4400_v53 = vadd.f32 %v6269_v61, %v4399_v32 }
0x17cc   : > { %v4409_v54 = vadd.f32 %v4405_v29, %v4200_v50 }
0x17cd   : > { %v4408_v31 = vadd.f32 %v4400_v53, %v4199_v48  ;;  %v7299_v48 = vpack.c.bf16 %v6277_v47, %v6276_v46 }
0x17ce   : > { %v4415_v33 = vsel %vm1257_vm7, %v4409_v54, 0.0 }
0x17cf   : > { %4416 = vadd.xlane.f32.xlu0 %v4415_v33  ;;  %v4412_v9 = vsel %vm1253_vm6, %v4408_v31, 0.0  ;;  %7300 = vmatprep.subr.bf16.mxu1 %v7299_v48 }
0x17d0   : > { %4413 = vadd.xlane.f32.xlu1 %v4412_v9  ;;  %7302 = vmatpush3.bf16.msra.mxu1 %v7299_v48 }
0x185c   : > { %v4417_v11 = vpop.xlane.xlu0 %4416 }
0x185d   : > { %v4419_v34 = vmul.f32 0.03125, %v4417_v11  ;;  %v4414_v35 = vpop.xlane.xlu1 %4413 }
0x185e   : > { %v4418_v36 = vmul.f32 0.03125, %v4414_v35 }
0x185f   : > { %v4421_v37 = vsub.f32 %v4409_v54, %v4419_v34 }
0x1860   : > { %v4420_v38 = vsub.f32 %v4408_v31, %v4418_v36  ;;  %v6291_v36 = vld [vmem:[%s8638_s15 + $0x20] sm:$0xff] }
0x1861   : > { %v4423_v41 = vmul.f32 %v4421_v37, %v4421_v37 }
0x1862   : > { %v4422_v39 = vmul.f32 %v4420_v38, %v4420_v38 }
0x1863   : > { %v4427_v42 = vsel %vm1257_vm7, %v4423_v41, 0.0 }
0x1864   : > { %v4424_v40 = vsel %vm1253_vm6, %v4422_v39, 0.0 }
0x1865   : > { %4425 = vadd.xlane.f32.xlu0 %v4424_v40 }
0x1869   : > { %4428 = vadd.xlane.f32.xlu0 %v4427_v42 }
0x18f2   : > { %v4426_v49 = vpop.xlane.xlu0 %4425 }
0x18f3   : > { %v4430_v50 = vmul.f32 0.03125, %v4426_v49 }
0x18f5   : > { %v4432_v51 = vadd.f32 1e-05, %v4430_v50 }
0x18f6   : > { %v4429_v52 = vpop.xlane.xlu0 %4428 }
0x18f7   : > { %7594 = vrsqrt.f32 %v4432_v51  ;;  %v4431_v55 = vmul.f32 0.03125, %v4429_v52 }
0x18f9   : > { %v4433_v56 = vadd.f32 1e-05, %v4431_v55 }
0x18fb   : > { %7596 = vrsqrt.f32 %v4433_v56 }
0x1901   : > { %v7595_v57 = vpop.eup %7594 }
0x1902   : > { %v4436_v59 = vmul.f32 %v7595_v57, %v4420_v38 }
0x1904   : > { %v4444_v0 = vmul.f32 %v6272_v58, %v4436_v59 }
0x1905   : > { %v7597_v60 = vpop.eup %7596 }
0x1906   : > { %v4437_v1 = vmul.f32 %v7597_v60, %v4421_v37  ;;  %v8411_v3 = vadd.f32 %v6273_v63, %v4444_v0 }
0x1908   : > { %v4445_v4 = vmul.f32 %v6272_v58, %v4437_v1  ;;  %6952 = vmatprep.mubr.msk.f32.mxu1 %vm1253_vm6, %v8411_v3 }
0x190a   : > { %v8415_v5 = vadd.f32 %v6273_v63, %v4445_v4 }
0x190c   : > { %6953 = vmatmul.mubr.msk.f32.vlgmr.msra.gmra.mrb[24].mxu1 %vm1253_vm6, %v8415_v5 }
0x19df   : > { %v6954_v7 = vpop.f32.mrb[24].mxu1 }
0x19e0   : > { %v4545_v8 = vadd.f32 %v6954_v7, %v6279_v6  ;;  %v4539_v10 = vpop.f32.mrb[25].mxu1 }
0x19e1   : > { %v4540_v12 = vadd.f32 %v6279_v6, %v4539_v10 }
0x19e2   : > { %v8434_v19 = vmul.f32 0.35355338, %v4545_v8 }
0x19e3   : > { %v8422_v13 = vpack.i.bf16 %v4545_v8, %v4540_v12  ;;  %v8424_v14 = vmul.f32 0.35355338, %v4540_v12 }
0x19e5   : > { %7491 = vrot.lane.b32.xlu0 %v8422_v13, %s8696_s7  ;;  %6959 = vmatprep.mubr.msk.f32.mxu1 %vm3017_vm8, %v8424_v14  ;;  %s8704_s7 = smov 72  }
0x1a57   : > { %v7492_v15 = vpop.permute.xlu0 %7491 }
0x1a58   : > { %v7494_v17 = vunpack.i.h.bf16 %v7492_v15  ;;  %v7493_v18 = vunpack.i.l.bf16 %v7492_v15 }
0x1a5a   : > { %v7303_v16 = vpack.c.bf16 %v7494_v17, %v7493_v18 }
0x1a5c   : > { %7305 = vmatprep.subr.msk.bf16.mxu1 %vm8215_vm9, %v7303_v16 }
0x1a5d   : > { %7308 = vmatpush3.bf16.xpose.msk.msra.mxu1 %vm8215_vm9, %v7303_v16 }
0x1a64   : > { %6960 = vmatmul.mubr.msk.f32.vlgmr.msra.gmra.mrb[26].mxu1 %vm3017_vm8, %v8434_v19 }
0x1b37   : > { %v6961_v20 = vpop.f32.mrb[26].mxu1 }
0x1b38   : > { %v4641_v21 = vpop.f32.mrb[27].mxu1  ;;  %v4653_v22 = vsel %vm3107_vm11, %v6961_v20, -inf }
0x1b39   : > { %4654 = vmax.xlane.f32.xlu0 %v4653_v22  ;;  %v4650_v24 = vsel %vm3103_vm10, %v4641_v21, -inf }
0x1b3a   : > { %4651 = vmax.xlane.f32.xlu1 %v4650_v24 }
0x1b4f   : > { %4845 = vrot.lane.b32.xlu0 %v8424_v14, %s8697_s5 }
0x1bc6   : > { %v4655_v25 = vpop.xlane.xlu0 %4654 }
0x1bc7   : > { %v4657_v23 = vsub.f32 %v6961_v20, %v4655_v25  ;;  %v4652_v26 = vpop.xlane.xlu1 %4651 }
0x1bc8   : > { %v4656_v27 = vsub.f32 %v4641_v21, %v4652_v26 }
0x1bc9   : > { %v4660_v28 = vmul.f32 1.442695, %v4657_v23 }
0x1bca   : > { %v4658_v61 = vmul.f32 1.442695, %v4656_v27  ;;  %v4846_v46 = vpop.permute.xlu0 %4845 }
0x1bcb   : > { %7598 = vpow2.f32 %v4660_v28 }
0x1bcc   : > { %7600 = vpow2.f32 %v4658_v61 }
0x1bd5   : > { %v7599_v62 = vpop.eup %7598 }
0x1bd6   : > { %v4665_v29 = vsel %vm3107_vm11, %v7599_v62, 0.0  ;;  %v7601_v32 = vpop.eup %7600 }
0x1bd7   : > { %4666 = vadd.xlane.f32.xlu1 %v4665_v29  ;;  %v4662_v53 = vsel %vm3103_vm10, %v7601_v32, 0.0 }
0x1bdb   : > { %4663 = vadd.xlane.f32.xlu1 %v4662_v53 }
0x1bec   : > { %7496 = vrot.lane.b32.xlu1 %v8422_v13, %s8698_s1 }
0x1bf0   : > { %7501 = vrot.lane.b32.xlu1 %v8422_v13, %s8699_s6  ;;  %s8705_s6 = smov 48  }
0x1bf4   : > { %4847 = vrot.lane.b32.xlu1 %v8434_v19, %s8697_s5 }
0x1c64   : > { %v4667_v54 = vpop.xlane.xlu1 %4666 }
0x1c65   : > { %7602 = vrcp.f32 %v4667_v54 }
0x1c68   : > { %v4664_v31 = vpop.xlane.xlu1 %4663 }
0x1c69   : > { %7604 = vrcp.f32 %v4664_v31 }
0x1c6c   : > { %v7497_v33 = vpop.permute.xlu1 %7496 }
0x1c6d   : > { %v7499_v9 = vunpack.i.h.bf16 %v7497_v33  ;;  %v7498_v11 = vunpack.i.l.bf16 %v7497_v33 }
0x1c6f   : > { %v7309_v34 = vpack.c.bf16 %v7499_v9, %v7498_v11  ;;  %v7603_v37 = vpop.eup %7602 }
0x1c70   : > { %v7502_v35 = vpop.permute.xlu1 %7501  ;;  %v4671_v42 = vmul.f32 %v7603_v37, %v7599_v62  ;;  %v6301_v62 = vld [vmem:[%s8638_s15 + $0x28] sm:$0xff] }
0x1c71   : > { %7311 = vmatprep.subr.msk.bf16.mxu1 %vm8237_vm13, %v7309_v34  ;;  %v7504_v39 = vunpack.i.h.bf16 %v7502_v35  ;;  %v7503_v40 = vunpack.i.l.bf16 %v7502_v35 }
0x1c72   : > { %7314 = vmatpush3.bf16.msk.msra.mxu1 %vm8237_vm13, %v7309_v34 }
0x1c73   : > { %v7605_v38 = vpop.eup %7604  ;;  %6969 = vmatprep.subr.mxu1 %v6291_v36  ;;  %v7315_v43 = vpack.c.bf16 %v7504_v39, %v7503_v40 }
0x1c74   : > { %v4670_v41 = vmul.f32 %v7605_v38, %v7601_v32  ;;  %v4848_v47 = vpop.permute.xlu1 %4847 }
0x1c76   : > { %6966 = vmatprep.mubr.msk.f32.mxu1 %vm3103_vm10, %v4670_v41 }
0x1c77   : > { %6967 = vmatmul.mubr.msk.f32.vlgmr.msra.gmra.mrb[28].mxu1 %vm3103_vm10, %v4671_v42 }
0x1c78   : > { %6970 = vmatpush3.msra.mxu1 %v6291_v36 }
0x1c79   : > { %7317 = vmatprep.subr.msk.bf16.mxu1 %vm8215_vm9, %v7315_v43 }
0x1d4a   : > { %v6968_v44 = vpop.f32.mrb[28].mxu1 }
0x1d4b   : > { %v4751_v45 = vpop.f32.mrb[29].mxu1 }
0x1d4c   : > { %6971 = vmatprep.mubr.msk.f32.mxu1 %vm3017_vm8, %v4751_v45 }
0x1d4d   : > { %6972 = vmatmul.mubr.msk.f32.vlgmr.msra.gmra.mrb[30].mxu1 %vm3017_vm8, %v6968_v44 }
0x1d4e   : > { %7320 = vmatpush3.bf16.xpose.msk.msra.mxu1 %vm8215_vm9, %v7315_v43  ;;  %6978 = vmatprep.mubr.msk.f32.mxu1 %vm3017_vm8, %v4846_v46 }
0x1d4f   : > { %6988 = vmatprep.subr.mxu1 %v6301_v62 }
0x1d55   : > { %6979 = vmatmul.mubr.msk.f32.vlgmr.msra.gmra.mrb[32].mxu1 %vm3017_vm8, %v4848_v47 }
0x1d56   : > { %6989 = vmatpush3.msra.mxu1 %v6301_v62 }
0x1e28   : > { %v6980_v48 = vpop.f32.mrb[32].mxu1 }
0x1e29   : > { %v4927_v49 = vpop.f32.mrb[33].mxu1  ;;  %v4939_v50 = vsel %vm3107_vm11, %v6980_v48, -inf }
0x1e2a   : > { %4940 = vmax.xlane.f32.xlu0 %v4939_v50  ;;  %v4936_v51 = vsel %vm3103_vm10, %v4927_v49, -inf }
0x1e2b   : > { %4937 = vmax.xlane.f32.xlu1 %v4936_v51 }
0x1e3c   : > { %7506 = vrot.lane.b32.xlu1 %v8422_v13, %s8700_s4 }
0x1e40   : > { %7511 = vrot.lane.b32.xlu0 %v8422_v13, %s8701_s30  ;;  %5130 = vrot.lane.b32.xlu1 %v8424_v14, %s8702_s10  ;;  %s8707_s30 = sshll.u32 %s8709_s3, 4 }
0x1e44   : > { %5415 = vrot.lane.b32.xlu0 %v8424_v14, %s8703_s29 }
0x1eb7   : > { %v4941_v52 = vpop.xlane.xlu0 %4940 }
0x1eb8   : > { %v4943_v55 = vsub.f32 %v6980_v48, %v4941_v52  ;;  %v4938_v56 = vpop.xlane.xlu1 %4937 }
0x1eb9   : > { %v4942_v57 = vsub.f32 %v4927_v49, %v4938_v56 }
0x1eba   : > { %v4946_v58 = vmul.f32 1.442695, %v4943_v55 }
0x1ebb   : > { %v4944_v59 = vmul.f32 1.442695, %v4942_v57  ;;  %v7512_v63 = vpop.permute.xlu0 %7511 }
0x1ebc   : > { %7606 = vpow2.f32 %v4946_v58  ;;  %v7507_v0 = vpop.permute.xlu1 %7506  ;;  %v7514_v60 = vunpack.i.h.bf16 %v7512_v63  ;;  %v7513_v1 = vunpack.i.l.bf16 %v7512_v63 }
0x1ebd   : > { %v7509_v4 = vunpack.i.h.bf16 %v7507_v0  ;;  %v7508_v6 = vunpack.i.l.bf16 %v7507_v0  ;;  %7608 = vpow2.f32 %v4944_v59 }
0x1ebe   : > { %v7327_v8 = vpack.c.bf16 %v7514_v60, %v7513_v1  ;;  %v6311_v1 = vld [vmem:[%s8638_s15 + $0x30] sm:$0xff] }
0x1ebf   : > { %v7321_v7 = vpack.c.bf16 %v7509_v4, %v7508_v6 }
0x1ec0   : > { %v5131_v17 = vpop.permute.xlu1 %5130 }
0x1ec1   : > { %7323 = vmatprep.subr.msk.bf16.mxu0 %vm8237_vm13, %v7321_v7 }
0x1ec2   : > { %7326 = vmatpush3.bf16.msk.msra.mxu0 %vm8237_vm13, %v7321_v7 }
0x1ec3   : > { %7329 = vmatprep.subr.msk.bf16.mxu0 %vm8215_vm9, %v7327_v8 }
0x1ec6   : > { %v7607_v10 = vpop.eup %7606 }
0x1ec7   : > { %v4951_v12 = vsel %vm3107_vm11, %v7607_v10, 0.0  ;;  %v7609_v14 = vpop.eup %7608 }
0x1ec8   : > { %4952 = vadd.xlane.f32.xlu1 %v4951_v12  ;;  %v4948_v15 = vsel %vm3103_vm10, %v7609_v14, 0.0 }
0x1ecc   : > { %4949 = vadd.xlane.f32.xlu1 %v4948_v15 }
0x1edd   : > { %5132 = vrot.lane.b32.xlu1 %v8434_v19, %s8702_s10 }
0x1ee1   : > { %7516 = vrot.lane.b32.xlu1 %v8422_v13, %s8704_s7  ;;  %s799_s7 = scalar_lea.vmem %s8648_s25, %s8707_s30 }
0x1ee5   : > { %5417 = vrot.lane.b32.xlu1 %v8434_v19, %s8703_s29  ;;  %v5416_v19 = vpop.permute.xlu0 %5415 }
0x1f55   : > { %v4953_v18 = vpop.xlane.xlu1 %4952 }
0x1f56   : > { %7610 = vrcp.f32 %v4953_v18 }
0x1f59   : > { %v4950_v16 = vpop.xlane.xlu1 %4949 }
0x1f5a   : > { %7612 = vrcp.f32 %v4950_v16 }
0x1f5d   : > { %v5133_v20 = vpop.permute.xlu1 %5132 }
0x1f60   : > { %v7611_v22 = vpop.eup %7610 }
0x1f61   : > { %v7517_v21 = vpop.permute.xlu1 %7516  ;;  %v4957_v27 = vmul.f32 %v7611_v22, %v7607_v10 }
0x1f62   : > { %v7519_v25 = vunpack.i.h.bf16 %v7517_v21  ;;  %v7518_v23 = vunpack.i.l.bf16 %v7517_v21 }
0x1f64   : > { %v7613_v24 = vpop.eup %7612  ;;  %v7339_v28 = vpack.c.bf16 %v7519_v25, %v7518_v23 }
0x1f65   : > { %v4956_v26 = vmul.f32 %v7613_v24, %v7609_v14  ;;  %v5418_v61 = vpop.permute.xlu1 %5417  ;;  %v6321_v24 = vld [vmem:[%s8638_s15 + $0x38] sm:$0xff] }
0x1f67   : > { %6985 = vmatprep.mubr.msk.f32.mxu0 %vm3103_vm10, %v4956_v26 }
0x1f68   : > { %6986 = vmatmul.mubr.msk.f32.vlgmr.msra.gmra.mrb[10].mxu0 %vm3103_vm10, %v4957_v27  ;;  %v6283_v27 = vld [vmem:[%s8639_s16 + $0x1] ss:$0 sm:$0xff] }
0x1f69   : > { %7332 = vmatpush3.bf16.xpose.msk.msra.mxu0 %vm8215_vm9, %v7327_v8  ;;  %6997 = vmatprep.mubr.msk.f32.mxu0 %vm3017_vm8, %v5131_v17 }
0x1f6a   : > { %7341 = vmatprep.subr.msk.bf16.mxu0 %vm8215_vm9, %v7339_v28 }
0x1f70   : > { %6998 = vmatmul.mubr.msk.f32.vlgmr.msra.gmra.mrb[12].mxu0 %vm3017_vm8, %v5133_v20 }
0x1f71   : > { %7344 = vmatpush3.bf16.xpose.msk.msra.mxu0 %vm8215_vm9, %v7339_v28  ;;  %7016 = vmatprep.mubr.msk.f32.mxu0 %vm3017_vm8, %v5416_v19 }
0x1f78   : > { %7017 = vmatmul.mubr.msk.f32.vlgmr.msra.gmra.mrb[14].mxu0 %vm3017_vm8, %v5418_v61 }
0x203b   : > { %v6987_v29 = vpop.f32.mrb[10].mxu0 }
0x203c   : > { %v5037_v32 = vpop.f32.mrb[11].mxu0 }
0x203d   : > { %6990 = vmatprep.mubr.msk.f32.mxu1 %vm3017_vm8, %v5037_v32 }
0x203e   : > { %6991 = vmatmul.mubr.msk.f32.vlgmr.msra.gmra.mrb[30].mxu1 %vm3017_vm8, %v6987_v29 }
0x2043   : > { %v6999_v53 = vpop.f32.mrb[12].mxu0 }
0x2044   : > { %v5212_v2 = vpop.f32.mrb[13].mxu0  ;;  %v5224_v54 = vsel %vm3107_vm11, %v6999_v53, -inf }
0x2045   : > { %5225 = vmax.xlane.f32.xlu1 %v5224_v54  ;;  %v5221_v31 = vsel %vm3103_vm10, %v5212_v2, -inf }
0x2046   : > { %5222 = vmax.xlane.f32.xlu0 %v5221_v31 }
0x204b   : > { %v7018_v33 = vpop.f32.mrb[14].mxu0 }
0x204c   : > { %v5497_v9 = vpop.f32.mrb[15].mxu0  ;;  %v5509_v34 = vsel %vm3107_vm11, %v7018_v33, -inf }
0x204d   : > { %v5506_v11 = vsel %vm3103_vm10, %v5497_v9, -inf }
0x204e   : > { %5507 = vmax.xlane.f32.xlu1 %v5506_v11 }
0x2052   : > { %5510 = vmax.xlane.f32.xlu1 %v5509_v34 }
0x20d2   : > { %v5226_v35 = vpop.xlane.xlu1 %5225 }
0x20d3   : > { %v5228_v36 = vsub.f32 %v6999_v53, %v5226_v35  ;;  %v5223_v37 = vpop.xlane.xlu0 %5222 }
0x20d4   : > { %v5227_v38 = vsub.f32 %v5212_v2, %v5223_v37  ;;  %v6329_v37 = vld [vmem:[%s8642_s19 + $0x28] sm:$0xff] }
0x20d5   : > { %v5231_v39 = vmul.f32 1.442695, %v5228_v36 }
0x20d6   : > { %v5229_v40 = vmul.f32 1.442695, %v5227_v38 }
0x20d7   : > { %7614 = vpow2.f32 %v5231_v39  ;;  %v6330_v39 = vld [vmem:[%s8642_s19 + $0x30] sm:$0xff] }
0x20d8   : > { %7616 = vpow2.f32 %v5229_v40  ;;  %v6331_v40 = vld [vmem:[%s8642_s19 + $0x38] sm:$0xff] }
0x20db   : > { %v5508_v41 = vpop.xlane.xlu1 %5507 }
0x20dc   : > { %v5512_v42 = vsub.f32 %v5497_v9, %v5508_v41  ;;  %v7355_v41 = vpack.c.bf16 %v6331_v40, %v6330_v39 }
0x20de   : > { %v5514_v46 = vmul.f32 1.442695, %v5512_v42 }
0x20df   : > { %v5511_v43 = vpop.xlane.xlu1 %5510 }
0x20e0   : > { %v5513_v44 = vsub.f32 %v7018_v33, %v5511_v43 }
0x20e1   : > { %v7615_v45 = vpop.eup %7614 }
0x20e2   : > { %v5516_v47 = vmul.f32 1.442695, %v5513_v44  ;;  %v5236_v48 = vsel %vm3107_vm11, %v7615_v45, 0.0  ;;  %v7617_v49 = vpop.eup %7616 }
0x20e3   : > { %5237 = vadd.xlane.f32.xlu0 %v5236_v48  ;;  %v5233_v50 = vsel %vm3103_vm10, %v7617_v49, 0.0 }
0x20e4   : > { %7618 = vpow2.f32 %v5516_v47 }
0x20e5   : > { %7620 = vpow2.f32 %v5514_v46 }
0x20e7   : > { %5234 = vadd.xlane.f32.xlu0 %v5233_v50 }
0x20ee   : > { %v7619_v51 = vpop.eup %7618 }
0x20ef   : > { %v5521_v52 = vsel %vm3107_vm11, %v7619_v51, 0.0  ;;  %v7621_v55 = vpop.eup %7620 }
0x20f0   : > { %5522 = vadd.xlane.f32.xlu1 %v5521_v52  ;;  %v5518_v56 = vsel %vm3103_vm10, %v7621_v55, 0.0 }
0x20f4   : > { %5519 = vadd.xlane.f32.xlu1 %v5518_v56 }
0x20fd   : > { %7521 = vrot.lane.b32.xlu0 %v8422_v13, %s8705_s6 }
0x2105   : > { %7526 = vrot.lane.b32.xlu1 %v8422_v13, %s8706_s28 }
0x2170   : > { %v5238_v57 = vpop.xlane.xlu0 %5237 }
0x2171   : > { %7622 = vrcp.f32 %v5238_v57 }
0x2174   : > { %v5235_v58 = vpop.xlane.xlu0 %5234 }
0x2175   : > { %7624 = vrcp.f32 %v5235_v58 }
0x2178   : > { %v7522_v59 = vpop.permute.xlu0 %7521 }
0x2179   : > { %v7524_v63 = vunpack.i.h.bf16 %v7522_v59  ;;  %v7523_v0 = vunpack.i.l.bf16 %v7522_v59 }
0x217b   : > { %v7333_v60 = vpack.c.bf16 %v7524_v63, %v7523_v0  ;;  %v7623_v6 = vpop.eup %7622  ;;  %v6336_v63 = vld [vmem:[%s8644_s21 + $0x40] sm:$0xff]  ;;  %v6337_v0 = vld [vmem:[%s8644_s21 + $0x48] sm:$0xff] }
0x217c   : > { %v5242_v8 = vmul.f32 %v7623_v6, %v7615_v45 }
0x217d   : > { %v5523_v4 = vpop.xlane.xlu1 %5522  ;;  %7335 = vmatprep.subr.msk.bf16.mxu1 %vm8237_vm13, %v7333_v60 }
0x217e   : > { %7338 = vmatpush3.bf16.msk.msra.mxu1 %vm8237_vm13, %v7333_v60  ;;  %v6338_v60 = vld [vmem:[%s8644_s21 + $0x50] sm:$0xff] }
0x217f   : > { %v7625_v13 = vpop.eup %7624  ;;  %7007 = vmatprep.subr.mxu1 %v6311_v1 }
0x2180   : > { %v5241_v7 = vmul.f32 %v7625_v13, %v7617_v49  ;;  %v6326_v49 = vld [vmem:[%s8640_s17 + $0x1] ss:$0 sm:$0xff] }
0x2181   : > { %v5520_v10 = vpop.xlane.xlu1 %5519  ;;  %v6340_v13 = vld [vmem:[%s8644_s21 + $0x60] sm:$0xff] }
0x2182   : > { %7004 = vmatprep.mubr.msk.f32.mxu1 %vm3103_vm10, %v5241_v7  ;;  %7626 = vrcp.f32 %v5520_v10  ;;  %v6341_v7 = vld [vmem:[%s8644_s21 + $0x68] sm:$0xff]  ;;  %v6342_v10 = vld [vmem:[%s8644_s21 + $0x70] sm:$0xff] }
0x2183   : > { %7005 = vmatmul.mubr.msk.f32.vlgmr.msra.gmra.mrb[34].mxu1 %vm3103_vm10, %v5242_v8  ;;  %7628 = vrcp.f32 %v5523_v4  ;;  %v6339_v4 = vld [vmem:[%s8644_s21 + $0x58] sm:$0xff]  ;;  %v7367_v8 = vpack.c.bf16 %v6341_v7, %v6340_v13 }
0x2184   : > { %7008 = vmatpush3.msra.mxu1 %v6311_v1  ;;  %v7359_v1 = vpack.c.bf16 %v6337_v0, %v6336_v63  ;;  %v7363_v6 = vpack.c.bf16 %v6339_v4, %v6338_v60 }
0x2185   : > { %v7527_v12 = vpop.permute.xlu1 %7526 }
0x2186   : > { %v7529_v14 = vunpack.i.h.bf16 %v7527_v12  ;;  %v7528_v15 = vunpack.i.l.bf16 %v7527_v12  ;;  %v6343_v12 = vld [vmem:[%s8644_s21 + $0x78] sm:$0xff] }
0x2188   : > { %v7345_v17 = vpack.c.bf16 %v7529_v14, %v7528_v15  ;;  %v7371_v14 = vpack.c.bf16 %v6343_v12, %v6342_v10  ;;  %v6333_v15 = vld [vmem:[%s8643_s20 + $0x1] ss:$0 sm:$0xff] }
0x218a   : > { %7347 = vmatprep.subr.msk.bf16.mxu1 %vm8237_vm13, %v7345_v17 }
0x218c   : > { %v7627_v18 = vpop.eup %7626 }
0x218d   : > { %v7629_v21 = vpop.eup %7628  ;;  %v5526_v22 = vmul.f32 %v7627_v18, %v7621_v55 }
0x218e   : > { %v5527_v25 = vmul.f32 %v7629_v21, %v7619_v51  ;;  %v6327_v51 = vld [vmem:[%s8641_s18 + $0x1] ss:$0 sm:$0xff] }
0x2256   : > { %v7006_v16 = vpop.f32.mrb[34].mxu1 }
0x2257   : > { %v5322_v20 = vpop.f32.mrb[35].mxu1 }
0x2258   : > { %7009 = vmatprep.mubr.msk.f32.mxu1 %vm3017_vm8, %v5322_v20 }
0x2259   : > { %7010 = vmatmul.mubr.msk.f32.vlgmr.msra.gmra.mrb[30].mxu1 %vm3017_vm8, %v7006_v16 }
0x225a   : > { %7350 = vmatpush3.bf16.msk.msra.mxu1 %vm8237_vm13, %v7345_v17  ;;  %7023 = vmatprep.mubr.msk.f32.mxu1 %vm3103_vm10, %v5526_v22 }
0x225b   : > { %7026 = vmatprep.subr.mxu1 %v6321_v24 }
0x225d   : > { %7024 = vmatmul.mubr.msk.f32.vlgmr.msra.gmra.mrb[36].mxu1 %vm3103_vm10, %v5527_v25 }
0x225e   : > { %7027 = vmatpush3.msra.mxu1 %v6321_v24 }
0x225f   : > { %7360 = vmatprep.subr.bf16.mxu1 %v7359_v1 }
0x2330   : > { %v7025_v23 = vpop.f32.mrb[36].mxu1 }
0x2331   : > { %v5607_v26 = vpop.f32.mrb[37].mxu1 }
0x2332   : > { %7028 = vmatprep.mubr.msk.f32.mxu1 %vm3017_vm8, %v5607_v26 }
0x2333   : > { %7029 = vmatmul.mubr.msk.f32.vlgmr.msra.gmra.mrb[30].mxu1 %vm3017_vm8, %v7025_v23 }
0x2334   : > { %7362 = vmatpush3.bf16.msra.mxu1 %v7359_v1 }
0x2335   : > { %7364 = vmatprep.subr.bf16.mxu1 %v7363_v6 }
0x2338   : > { %7366 = vmatpush3.bf16.msra.mxu1 %v7363_v6 }
0x2339   : > { %7368 = vmatprep.subr.bf16.mxu1 %v7367_v8 }
0x233c   : > { %7370 = vmatpush3.bf16.msra.mxu1 %v7367_v8 }
0x233d   : > { %7372 = vmatprep.subr.bf16.mxu1 %v7371_v14 }
0x2340   : > { %7374 = vmatpush3.bf16.msra.mxu1 %v7371_v14 }
0x2406   : > { %v7030_v28 = vpop.f32.mrb[30].mxu1 }
0x2407   : > { %v7381_v30 = vadd.f32 %v7030_v28, %v6283_v27  ;;  %v5689_v19 = vpop.f32.mrb[31].mxu1 }
0x2408   : > { %v7382_v61 = vadd.f32 %v6283_v27, %v5689_v19 }
0x2409   : > { %v5701_v62 = vadd.f32 %v7381_v30, %v8415_v5 }
0x240a   : > { %v5700_v29 = vadd.f32 %v7382_v61, %v8411_v3  ;;  %v6328_v3 = vld [vmem:[%s8642_s19 + $0x20] sm:$0xff] }
0x240b   : > { %v5709_v32 = vsel %vm1257_vm7, %v5701_v62, 0.0  ;;  %v7351_v38 = vpack.c.bf16 %v6329_v37, %v6328_v3 }
0x240c   : > { %5710 = vadd.xlane.f32.xlu1 %v5709_v32  ;;  %v5706_v53 = vsel %vm1253_vm6, %v5700_v29, 0.0 }
0x240d   : > { %5707 = vadd.xlane.f32.xlu0 %v5706_v53  ;;  %7352 = vmatprep.subr.bf16.mxu0 %v7351_v38 }
0x240e   : > { %7354 = vmatpush3.bf16.msra.mxu0 %v7351_v38 }
0x240f   : > { %7356 = vmatprep.subr.bf16.mxu0 %v7355_v41 }
0x2412   : > { %7358 = vmatpush3.bf16.msra.mxu0 %v7355_v41 }
0x2499   : > { %v5711_v2 = vpop.xlane.xlu1 %5710 }
0x249a   : > { %v5713_v54 = vmul.f32 0.03125, %v5711_v2  ;;  %v5708_v31 = vpop.xlane.xlu0 %5707 }
0x249b   : > { %v5712_v33 = vmul.f32 0.03125, %v5708_v31 }
0x249c   : > { %v5715_v9 = vsub.f32 %v5701_v62, %v5713_v54 }
0x249d   : > { %v5714_v11 = vsub.f32 %v5700_v29, %v5712_v33  ;;  %v6345_v33 = vld [vmem:[%s8645_s22 + $0x1] ss:$0 sm:$0xff] }
0x249e   : > { %v5717_v36 = vmul.f32 %v5715_v9, %v5715_v9 }
0x249f   : > { %v5716_v34 = vmul.f32 %v5714_v11, %v5714_v11 }
0x24a0   : > { %v5721_v5 = vsel %vm1257_vm7, %v5717_v36, 0.0 }
0x24a1   : > { %v5718_v35 = vsel %vm1253_vm6, %v5716_v34, 0.0 }
0x24a2   : > { %5719 = vadd.xlane.f32.xlu0 %v5718_v35 }
0x24a6   : > { %5722 = vadd.xlane.f32.xlu0 %v5721_v5 }
0x252f   : > { %v5720_v42 = vpop.xlane.xlu0 %5719 }
0x2530   : > { %v5724_v43 = vmul.f32 0.03125, %v5720_v42 }
0x2532   : > { %v5726_v44 = vadd.f32 1e-05, %v5724_v43 }
0x2533   : > { %v5723_v45 = vpop.xlane.xlu0 %5722 }
0x2534   : > { %7630 = vrsqrt.f32 %v5726_v44  ;;  %v5725_v46 = vmul.f32 0.03125, %v5723_v45 }
0x2536   : > { %v5727_v47 = vadd.f32 1e-05, %v5725_v46 }
0x2538   : > { %7632 = vrsqrt.f32 %v5727_v47 }
0x253e   : > { %v7631_v48 = vpop.eup %7630 }
0x253f   : > { %v5730_v50 = vmul.f32 %v7631_v48, %v5714_v11 }
0x2541   : > { %v5738_v52 = vmul.f32 %v6326_v49, %v5730_v50 }
0x2542   : > { %v7633_v55 = vpop.eup %7632 }
0x2543   : > { %v5731_v56 = vmul.f32 %v7633_v55, %v5715_v9  ;;  %v5746_v57 = vadd.f32 %v6327_v51, %v5738_v52 }
0x2545   : > { %v5739_v58 = vmul.f32 %v6326_v49, %v5731_v56  ;;  %7039 = vmatprep.mubr.msk.f32.mxu0 %vm1253_vm6, %v5746_v57 }
0x2547   : > { %v5747_v59 = vadd.f32 %v6327_v51, %v5739_v58 }
0x2549   : > { %7040 = vmatmul.mubr.msk.f32.vlgmr.msra.gmra.mrb[16].mxu0 %vm1253_vm6, %v5747_v59 }
0x261c   : > { %v7041_v17 = vpop.f32.mrb[16].mxu0 }
0x261d   : > { %v5839_v18 = vadd.f32 %v7041_v17, %v6333_v15  ;;  %v5833_v16 = vpop.f32.mrb[17].mxu0 }
0x261e   : > { %v5834_v20 = vadd.f32 %v6333_v15, %v5833_v16 }
0x261f   : > { %v5845_v21 = vmul.f32 0.044715, %v5839_v18  ;;  %v5843_v2 = vmul.f32 0.5, %v5839_v18 }
0x2620   : > { %v5844_v22 = vmul.f32 0.044715, %v5834_v20  ;;  %v5842_v32 = vmul.f32 0.5, %v5834_v20 }
0x2621   : > { %v5847_v24 = vmul.f32 %v5845_v21, %v5839_v18 }
0x2622   : > { %v5846_v25 = vmul.f32 %v5844_v22, %v5834_v20 }
0x2623   : > { %v5849_v23 = vmul.f32 %v5847_v24, %v5839_v18 }
0x2624   : > { %v5848_v26 = vmul.f32 %v5846_v25, %v5834_v20 }
0x2625   : > { %v5851_v27 = vadd.f32 %v5849_v23, %v5839_v18 }
0x2626   : > { %v5850_v28 = vadd.f32 %v5848_v26, %v5834_v20 }
0x2627   : > { %v5853_v30 = vmul.f32 0.7978846, %v5851_v27 }
0x2628   : > { %v5852_v19 = vmul.f32 0.7978846, %v5850_v28 }
0x2629   : > { %7634 = vtanh.f32 %v5853_v30 }
0x262a   : > { %7636 = vtanh.f32 %v5852_v19 }
0x2633   : > { %v7635_v61 = vpop.eup %7634 }
0x2634   : > { %v7637_v62 = vpop.eup %7636  ;;  %v5857_v29 = vadd.f32 1.0, %v7635_v61 }
0x2635   : > { %v5856_v53 = vadd.f32 1.0, %v7637_v62 }
0x2636   : > { %v5859_v31 = vmul.f32 %v5857_v29, %v5843_v2 }
0x2637   : > { %v5858_v54 = vmul.f32 %v5856_v53, %v5842_v32 }
0x2639   : > { %7058 = vmatprep.mubr.msk.f32.mxu1 %vm4326_vm14, %v5858_v54 }
0x263a   : > { %7059 = vmatmul.mubr.msk.f32.vlgmr.msra.gmra.mrb[38].mxu1 %vm4326_vm14, %v5859_v31 }
0x270d   : > { %v7060_v9 = vpop.f32.mrb[38].mxu1 }
0x270e   : > { %v5949_v11 = vpop.f32.mrb[39].mxu1  ;;  %v5955_v34 = vadd.f32 %v7060_v9, %v6345_v33 }
0x270f   : > { %v5950_v35 = vadd.f32 %v6345_v33, %v5949_v11 }
0x2710   : > { %v5959_v3 = vadd.f32 %v5955_v34, %v5747_v59  ;;  %v6351_v59 = vld [vmem:[%s8647_s24 + $0x1] ss:$0 sm:$0xff] }
0x2711   : > { %v5958_v36 = vadd.f32 %v5950_v35, %v5746_v57  ;;  %v6350_v57 = vld [vmem:[%s8646_s23 + $0x1] ss:$0 sm:$0xff] }
0x2712   : > { %v5967_v37 = vsel %vm1257_vm7, %v5959_v3, 0.0 }
0x2713   : > { %v5964_v5 = vsel %vm1253_vm6, %v5958_v36, 0.0 }
0x2714   : > { %5965 = vadd.xlane.f32.xlu0 %v5964_v5 }
0x2718   : > { %5968 = vadd.xlane.f32.xlu0 %v5967_v37 }
0x27a1   : > { %v5966_v38 = vpop.xlane.xlu0 %5965 }
0x27a2   : > { %v5970_v39 = vmul.f32 0.03125, %v5966_v38 }
0x27a4   : > { %v5972_v40 = vsub.f32 %v5958_v36, %v5970_v39 }
0x27a5   : > { %v5969_v41 = vpop.xlane.xlu0 %5968 }
0x27a6   : > { %v5971_v42 = vmul.f32 0.03125, %v5969_v41  ;;  %v5974_v43 = vmul.f32 %v5972_v40, %v5972_v40 }
0x27a8   : > { %v5973_v44 = vsub.f32 %v5959_v3, %v5971_v42  ;;  %v5976_v45 = vsel %vm1253_vm6, %v5974_v43, 0.0 }
0x27a9   : > { %5977 = vadd.xlane.f32.xlu0 %v5976_v45 }
0x27aa   : > { %v5975_v46 = vmul.f32 %v5973_v44, %v5973_v44 }
0x27ac   : > { %v5979_v47 = vsel %vm1257_vm7, %v5975_v46, 0.0 }
0x27ad   : > { %5980 = vadd.xlane.f32.xlu1 %v5979_v47 }
0x2836   : > { %v5978_v48 = vpop.xlane.xlu0 %5977 }
0x2837   : > { %v5982_v49 = vmul.f32 0.03125, %v5978_v48 }
0x2839   : > { %v5984_v50 = vadd.f32 1e-05, %v5982_v49 }
0x283a   : > { %v5981_v51 = vpop.xlane.xlu1 %5980 }
0x283b   : > { %7638 = vrsqrt.f32 %v5984_v50  ;;  %v5983_v52 = vmul.f32 0.03125, %v5981_v51 }
0x283d   : > { %v5985_v55 = vadd.f32 1e-05, %v5983_v52 }
0x283f   : > { %7640 = vrsqrt.f32 %v5985_v55 }
0x2845   : > { %v7639_v56 = vpop.eup %7638 }
0x2846   : > { %v5988_v58 = vmul.f32 %v7639_v56, %v5972_v40 }
0x2848   : > { %v5996_v63 = vmul.f32 %v6350_v57, %v5988_v58 }
0x2849   : > { %v7641_v0 = vpop.eup %7640 }
0x284a   : > { %v6004_v60 = vadd.f32 %v6351_v59, %v5996_v63  ;;  %v5989_v1 = vmul.f32 %v7641_v0, %v5973_v44 }
0x284c   : > { %6006 = vst.msk [vmem:[%s799_s7] sm:$0xff] %vm1253_vm6, %v6004_v60  ;;  %v5997_v4 = vmul.f32 %v6350_v57, %v5989_v1 }
0x284e   : > { %v6005_v6 = vadd.f32 %v6351_v59, %v5997_v4 }
0x2850   : > { %6007 = vst.msk [vmem:[%s799_s7 + $0x8] sm:$0x7f] %vm1257_vm7, %v6005_v6 }
0x2851 PF: > { %s37_s27 = sadd.s32 1, %s7648_s27  }
0x2852   : > { %p34_p4 = scmp.ge.s32.totalorder %s37_s27, 4  }
0x2854   :  { %36 = sbr.rel (!%p34_p4) target bundleno = 12 (0xc), region = 191 }

</bundles_post_ra>
